<compile_context>
chip_gen: v7x
topology: tpu7x:2x2x1
jax: 0.10.0
libtpu: 0.0.40
codegen_flags: <defaults>
</compile_context>

<pallas_src>
import math
import numpy as np
import jax
import jax.numpy as jnp
from jax.experimental import pallas as pl
from jax.experimental.pallas import tpu as pltpu

# ---------------- configuration (small but structurally faithful) -----------
B          = 2
SR         = 22050
WAV_LEN    = 4000
# TDNN_Extractor (synthetic): Conv1d(1, LATENT, kernel=WIN, stride=HOP_TDNN)
LATENT     = 32
WIN        = 100
HOP_TDNN   = 100
TDNN_K     = 128                                   # WIN zero-padded to 128 (aligned K)
L          = (WAV_LEN - WIN) // HOP_TDNN + 1       # wave_conv.length == 40
# MelSpectrogram (small analogue of n_fft=2048 / hop=512 / n_mels=64)
N_MELS     = 8
N_FFT      = 256
HOP_MEL    = 128
N_FREQ     = N_FFT // 2 + 1                        # 129
N_FREQ_PAD = 128                                   # drop Nyquist bin (mel weight ~0)
T_MEL      = WAV_LEN // HOP_MEL + 1                # 32 frames (center=True)
# fusion head
C_CONV     = 16                                    # mel_conv channels
CH8        = C_CONV * N_MELS                       # 128 == conv slab lane width
EVENTS     = 8                                     # multi_event_num
EVENT_LEN  = L // EVENTS
LV         = LATENT + CH8                          # concat feature dim = 160
POOL_K     = 4                                     # MaxPool1d(kernel_size=4)
D_MODEL    = LV // POOL_K                          # 40 == event_dim == L
N_HEADS    = 4
HEAD_DIM   = D_MODEL // N_HEADS
HIDDEN     = 16
NCLASS     = 2
BN_EPS     = 1e-5

assert D_MODEL == L and L % EVENTS == 0 and D_MODEL % N_HEADS == 0 and CH8 == 128

# --------------------- packed-constant slab layout (rows) -------------------
# Slab A: width 128 (f32).  All row offsets are multiples of 8; lane offset 0.
A_WTD   = 0                          # (128, 32)  TDNN weight (K padded 100->128)
A_COS   = A_WTD + TDNN_K             # (256, 128) windowed DFT cos
A_SIN   = A_COS + N_FFT              # (256, 128) windowed DFT -sin
A_FB    = A_SIN + N_FFT              # (128, 8)   mel filterbank
A_POOLT = A_FB + N_FREQ_PAD          # (40, 32)   AdaptiveAvgPool (time) matrix
A_EMEAN = A_POOLT + L                # (8, 40)    event-mean matrix
A_RREP  = A_EMEAN + EVENTS           # (32, 8)    per-head row replication
A_RT    = A_RREP + N_HEADS * EVENTS  # (8, 32)    head recombine (rrep^T)
A_BM    = A_RT + EVENTS              # (32, 128)  head-column block mask (padded)
A_WO    = A_BM + N_HEADS * EVENTS    # (128, 40)  attention out-proj (rows 40: zero)
A_WFC   = A_WO + CH8                 # (40, 16)   attention_fc
A_WCLS  = A_WFC + D_MODEL            # (16, 2)    classifier
A_BIAS  = A_WCLS + HIDDEN            # 11 bias/affine rows, one every 8 sublanes
BR_TDNN, BR_SC1, BR_SH1, BR_SC2, BR_SH2 = 0, 1, 2, 3, 4
BR_Q, BR_K, BR_V, BR_O, BR_FC, BR_CLS = 5, 6, 7, 8, 9, 10
N_BIAS  = 11
A_ROWS  = A_BIAS + 8 * N_BIAS        # 1160

# Slab B: width 512 (f32).
B_M1    = 0                          # (8, 384)   conv1 per-kw channel-mix matrices
B_M2    = B_M1 + N_MELS              # (128, 384) conv2 per-kw channel-mix matrices
B_SELW  = B_M2 + CH8                 # (32, 512)  maxpool selection, wave half
B_SELM  = B_SELW + LATENT            # (128, 512) maxpool selection, mel half
B_WQKV  = B_SELM + CH8               # (128, 384) fused q|k|v weights (128-lane blocks)
B_ROWS  = B_WQKV + CH8               # 424
B_COLS  = POOL_K * CH8               # 512


# =========================== the fused Pallas kernel =========================
def _csednn_kernel(tdnn_ref, melfr_ref, ca_ref, cb_ref, o_ref):
    f32 = jnp.float32

    def bias_row(idx, width=128):
        r = A_BIAS + 8 * idx
        return ca_ref[r:r + 1, 0:width]                                   # (1, width)

    # ---- wave branch: TDNN_Extractor (framed conv1d == one matmul) ---------
    wave_feat = (jnp.dot(tdnn_ref[...], ca_ref[A_WTD:A_WTD + TDNN_K, 0:LATENT],
                         preferred_element_type=f32)
                 + bias_row(BR_TDNN, LATENT))                             # (40, 32)

    # ---- mel branch: log-MelSpectrogram (windowed DFT + |.|^2 + mel fb) ----
    fr = melfr_ref[...]                                                   # (32, 256)
    re = jnp.dot(fr, ca_ref[A_COS:A_COS + N_FFT, :], preferred_element_type=f32)
    im = jnp.dot(fr, ca_ref[A_SIN:A_SIN + N_FFT, :], preferred_element_type=f32)
    power = re * re + im * im                                             # (32, 128)
    logmel = jnp.log(jnp.dot(power, ca_ref[A_FB:A_FB + N_FREQ_PAD, 0:N_MELS],
                             preferred_element_type=f32) + 1e-6)          # (32, 8)

    # ---- mel_conv: 2x (3x3 Conv2d + BN + SiLU), lane-dense (t, c*8+h) slab --
    row_t = jax.lax.broadcasted_iota(jnp.int32, (T_MEL, CH8), 0)

    def conv_bn_silu(x, m_row, m_rows, br_sc, br_sh):
        # One matmul folds the kh taps + channel mixing for all three kw taps.
        z = jnp.dot(x, cb_ref[m_row:m_row + m_rows, 0:3 * CH8],
                    preferred_element_type=f32)                           # (32, 384)
        # kw = +-1 time taps: sublane rolls (XLU) + boundary-row zero masks.
        up = jnp.where(row_t == 0, 0.0,
                       pltpu.roll(z[:, 0:CH8], shift=1, axis=0))          # z0[t-1]
        dn = jnp.where(row_t == T_MEL - 1, 0.0,
                       pltpu.roll(z[:, 2 * CH8:3 * CH8], shift=T_MEL - 1, axis=0))  # z2[t+1]
        y = z[:, CH8:2 * CH8] + up + dn
        y = y * bias_row(br_sc) + bias_row(br_sh)                         # conv bias + BN (eval)
        return y * pl.reciprocal(1.0 + jnp.exp(-y), approx=True)          # SiLU

    x1 = conv_bn_silu(logmel, B_M1, N_MELS, BR_SC1, BR_SH1)               # (32, 128)
    x2 = conv_bn_silu(x1,     B_M2, CH8,    BR_SC2, BR_SH2)               # (32, 128)

    # ---- AdaptiveAvgPool2d((None, L)) over time, as one matmul -------------
    mel_feat = jnp.dot(ca_ref[A_POOLT:A_POOLT + L, 0:T_MEL], x2,
                       preferred_element_type=f32)                        # (40, 128)

    # ---- event mean + MaxPool1d(4): fused selection matmuls ----------------
    emean = ca_ref[A_EMEAN:A_EMEAN + EVENTS, 0:L]                         # (8, 40)
    ev_w = jnp.dot(emean, wave_feat, preferred_element_type=f32)          # (8, 32)
    ev_m = jnp.dot(emean, mel_feat, preferred_element_type=f32)           # (8, 128)
    # Pool phase j lives in lane block [j*128, j*128+40); all slices aligned.
    views = (jnp.dot(ev_w, cb_ref[B_SELW:B_SELW + LATENT, :], preferred_element_type=f32)
             + jnp.dot(ev_m, cb_ref[B_SELM:B_SELM + CH8, :], preferred_element_type=f32))
    xa = jnp.maximum(jnp.maximum(views[:, 0:CH8], views[:, CH8:2 * CH8]),
                     jnp.maximum(views[:, 2 * CH8:3 * CH8], views[:, 3 * CH8:4 * CH8]))
    # xa: (8, 128); columns >= D_MODEL are zero by construction.

    # ---- SimpleSelfAttention: fused QKV, all heads batched in one softmax --
    qkv = jnp.dot(xa, cb_ref[B_WQKV:B_WQKV + CH8, 0:3 * CH8],
                  preferred_element_type=f32)                             # (8, 384)
    q = qkv[:, 0:CH8] + bias_row(BR_Q)                                    # (8, 128)
    k = qkv[:, CH8:2 * CH8] + bias_row(BR_K)
    v = qkv[:, 2 * CH8:3 * CH8] + bias_row(BR_V)
    bm = ca_ref[A_BM:A_BM + N_HEADS * EVENTS, :]                          # (32, 128) head mask
    qs = jnp.dot(ca_ref[A_RREP:A_RREP + N_HEADS * EVENTS, 0:EVENTS], q,
                 preferred_element_type=f32) * bm                         # (32, 128) head-stacked
    s = jax.lax.dot_general(qs, k, (((1,), (1,)), ((), ())),
                            preferred_element_type=f32) * (1.0 / math.sqrt(HEAD_DIM))  # (32, 8)
    s = s - jnp.max(s, axis=-1, keepdims=True)
    e = jnp.exp(s)
    p = e * pl.reciprocal(jnp.sum(e, axis=-1, keepdims=True), approx=True)   # softmax
    o_heads = jnp.dot(p, v, preferred_element_type=f32) * bm              # (32, 128)
    attn = jnp.dot(ca_ref[A_RT:A_RT + EVENTS, 0:N_HEADS * EVENTS], o_heads,
                   preferred_element_type=f32)                            # (8, 128) concat heads
    attn = (jnp.dot(attn, ca_ref[A_WO:A_WO + CH8, 0:D_MODEL],
                    preferred_element_type=f32)
            + bias_row(BR_O, D_MODEL))                                    # (8, 40)

    # ---- attention_fc + ReLU + mean over events + (Dropout=id) + classifier -
    h1 = jnp.maximum(jnp.dot(attn, ca_ref[A_WFC:A_WFC + D_MODEL, 0:HIDDEN],
                             preferred_element_type=f32)
                     + bias_row(BR_FC, HIDDEN), 0.0)                      # (8, 16)
    pooled = jnp.mean(h1, axis=0, keepdims=True)                          # (1, 16)
    o_ref[...] = (jnp.dot(pooled, ca_ref[A_WCLS:A_WCLS + HIDDEN, 0:NCLASS],
                          preferred_element_type=f32)
                  + bias_row(BR_CLS, NCLASS))                             # (1, 2)


# ============================ constant / weight prep ==========================
def build_model(key):
    """Builds fixed constants + synthetic weights and packs them into 2 slabs."""
    ks = jax.random.split(key, 18)

    def rnd(kk, shape, scale=0.05):
        return np.asarray(scale * jax.random.normal(kk, shape, dtype=jnp.float32),
                          dtype=np.float32)

    # Hann window (periodic) folded into real-DFT matrices, 128 freq bins
    # (the dropped Nyquist bin carries ~zero mel-filter weight).
    n = np.arange(N_FFT)
    win = 0.5 - 0.5 * np.cos(2.0 * np.pi * n / N_FFT)
    kf = np.arange(N_FREQ)
    ang = 2.0 * np.pi * np.outer(n, kf) / N_FFT
    cos_w = (win[:, None] * np.cos(ang)).astype(np.float32)[:, :N_FREQ_PAD]
    sin_w = (-win[:, None] * np.sin(ang)).astype(np.float32)[:, :N_FREQ_PAD]

    # HTK mel filterbank, norm=None (torchaudio MelSpectrogram defaults).
    def hz_to_mel(f): return 2595.0 * np.log10(1.0 + f / 700.0)
    def mel_to_hz(m): return 700.0 * (10.0 ** (m / 2595.0) - 1.0)
    all_freqs = np.linspace(0.0, SR / 2.0, N_FREQ)
    f_pts = mel_to_hz(np.linspace(hz_to_mel(0.0), hz_to_mel(SR / 2.0), N_MELS + 2))
    f_diff = np.diff(f_pts)
    slopes = f_pts[None, :] - all_freqs[:, None]
    down = -slopes[:, :-2] / f_diff[:-1]
    up = slopes[:, 2:] / f_diff[1:]
    fb = np.maximum(0.0, np.minimum(down, up)).astype(np.float32)[:N_FREQ_PAD]  # (128, 8)

    # AdaptiveAvgPool2d((None, L)) along time as an (L, T_MEL) matrix.
    poolT = np.zeros((L, T_MEL), np.float32)
    for j in range(L):
        s = (j * T_MEL) // L
        en = -((-(j + 1) * T_MEL) // L)                     # ceil
        poolT[j, s:en] = 1.0 / (en - s)

    # Event-mean matrix (mean over EVENT_LEN within each of the 8 events).
    emean = np.zeros((EVENTS, L), np.float32)
    for ev in range(EVENTS):
        emean[ev, ev * EVENT_LEN:(ev + 1) * EVENT_LEN] = 1.0 / EVENT_LEN

    # MaxPool1d(4) selection matrix; pool phase j placed in lane block j*128.
    sel_pad = np.zeros((LV, POOL_K * CH8), np.float32)
    for kk in range(D_MODEL):
        for j in range(POOL_K):
            sel_pad[POOL_K * kk + j, j * CH8 + kk] = 1.0
    selw_pad = sel_pad[:LATENT]                              # (32, 512)
    selm_pad = sel_pad[LATENT:]                              # (128, 512)

    # Batched multi-head attention helpers: per-head row replication, head
    # feature-column block mask (128-lane padded), and the head recombine.
    rrep = np.zeros((N_HEADS * EVENTS, EVENTS), np.float32)
    bm = np.zeros((N_HEADS * EVENTS, 128), np.float32)
    for h in range(N_HEADS):
        for i in range(EVENTS):
            rrep[h * EVENTS + i, i] = 1.0
        bm[h * EVENTS:(h + 1) * EVENTS, h * HEAD_DIM:(h + 1) * HEAD_DIM] = 1.0
    rt = rrep.T.copy()

    # --- synthetic learned weights -------------------------------------------
    w_tdnn = np.zeros((TDNN_K, LATENT), np.float32)
    w_tdnn[:WIN] = rnd(ks[0], (WIN, LATENT))
    b_tdnn = rnd(ks[1], (1, LATENT))

    w1 = rnd(ks[2], (C_CONV, 1, 3, 3));      b1 = rnd(ks[3], (C_CONV,))
    w2 = rnd(ks[4], (C_CONV, C_CONV, 3, 3)); b2 = rnd(ks[5], (C_CONV,))

    def conv_to_m(w):
        cout, cin = w.shape[0], w.shape[1]
        mats = []
        for kw in range(3):
            m = np.zeros((cin * N_MELS, cout * N_MELS), np.float32)
            for kh in range(3):
                for ho in range(N_MELS):
                    hi = ho + kh - 1
                    if 0 <= hi < N_MELS:
                        m[hi::N_MELS, ho::N_MELS] = w[:, :, kh, kw].T
            mats.append(m)
        return np.concatenate(mats, axis=1)                  # (cin*8, 3*cout*8)

    m1 = conv_to_m(w1)                                        # (8, 384)
    m2 = conv_to_m(w2)                                        # (128, 384)

    # Eval-mode BatchNorm2d (+ conv bias) folded into a per-channel affine,
    # expanded to the (c*8 + h) column layout of the conv slab.
    gamma = np.ones((C_CONV,), np.float32); beta = np.zeros((C_CONV,), np.float32)
    mean = np.zeros((C_CONV,), np.float32); var = np.ones((C_CONV,), np.float32)
    sc1 = gamma / np.sqrt(var + BN_EPS); sh1 = beta + (b1 - mean) * sc1
    sc2 = gamma / np.sqrt(var + BN_EPS); sh2 = beta + (b2 - mean) * sc2
    sc1 = np.repeat(sc1, N_MELS); sh1 = np.repeat(sh1, N_MELS)
    sc2 = np.repeat(sc2, N_MELS); sh2 = np.repeat(sh2, N_MELS)

    wq = rnd(ks[6], (D_MODEL, D_MODEL));  bq = rnd(ks[7], (1, D_MODEL))
    wk = rnd(ks[8], (D_MODEL, D_MODEL));  bk = rnd(ks[9], (1, D_MODEL))
    wv = rnd(ks[10], (D_MODEL, D_MODEL)); bv = rnd(ks[11], (1, D_MODEL))
    wo = rnd(ks[12], (D_MODEL, D_MODEL)); bo = rnd(ks[13], (1, D_MODEL))
    wfc = rnd(ks[14], (D_MODEL, HIDDEN)); bfc = rnd(ks[15], (1, HIDDEN))
    wcls = rnd(ks[16], (HIDDEN, NCLASS)); bcls = rnd(ks[17], (1, NCLASS))

    # Fused q|k|v weight: each projection in its own 128-lane block (K padded
    # to 128 rows because the pooled features xa are carried 128-lane wide).
    wqkv_pad = np.zeros((CH8, 3 * CH8), np.float32)
    wqkv_pad[:D_MODEL, 0:D_MODEL] = wq
    wqkv_pad[:D_MODEL, CH8:CH8 + D_MODEL] = wk
    wqkv_pad[:D_MODEL, 2 * CH8:2 * CH8 + D_MODEL] = wv
    wo_pad = np.zeros((CH8, D_MODEL), np.float32)
    wo_pad[:D_MODEL] = wo

    # --- pack slab A (width 128) ---------------------------------------------
    slab_a = np.zeros((A_ROWS, 128), np.float32)

    def put_a(row, arr):
        r, c = arr.shape
        slab_a[row:row + r, :c] = arr

    def put_bias(idx, vec):
        v = np.asarray(vec, np.float32).reshape(-1)
        slab_a[A_BIAS + 8 * idx, :v.shape[0]] = v

    put_a(A_WTD, w_tdnn)
    put_a(A_COS, cos_w)
    put_a(A_SIN, sin_w)
    put_a(A_FB, fb)
    put_a(A_POOLT, poolT)
    put_a(A_EMEAN, emean)
    put_a(A_RREP, rrep)
    put_a(A_RT, rt)
    put_a(A_BM, bm)
    put_a(A_WO, wo_pad)
    put_a(A_WFC, wfc)
    put_a(A_WCLS, wcls)
    put_bias(BR_TDNN, b_tdnn)
    put_bias(BR_SC1, sc1); put_bias(BR_SH1, sh1)
    put_bias(BR_SC2, sc2); put_bias(BR_SH2, sh2)
    put_bias(BR_Q, bq); put_bias(BR_K, bk); put_bias(BR_V, bv)
    put_bias(BR_O, bo); put_bias(BR_FC, bfc); put_bias(BR_CLS, bcls)

    # --- pack slab B (width 512) ---------------------------------------------
    slab_b = np.zeros((B_ROWS, B_COLS), np.float32)
    slab_b[B_M1:B_M1 + N_MELS, :3 * CH8] = m1
    slab_b[B_M2:B_M2 + CH8, :3 * CH8] = m2
    slab_b[B_SELW:B_SELW + LATENT, :] = selw_pad
    slab_b[B_SELM:B_SELM + CH8, :] = selm_pad
    slab_b[B_WQKV:B_WQKV + CH8, :3 * CH8] = wqkv_pad

    return jnp.asarray(slab_a), jnp.asarray(slab_b)


# ================================ forward ====================================
def csednn_forward(x, slab_a, slab_b):
    xw = x[:, 0, :]                                              # (B, WAV_LEN)

    # TDNN frames (WIN == hop -> non-overlapping), K zero-padded 100 -> 128.
    tdnn_frames = jnp.pad(xw.reshape(B, L, WIN),
                          ((0, 0), (0, 0), (0, TDNN_K - WIN)))   # (B, 40, 128)

    # Mel STFT frames: center=True reflect padding + hop framing.
    padded = jnp.pad(xw, ((0, 0), (N_FFT // 2, N_FFT // 2)), mode="reflect")
    idx = np.arange(T_MEL)[:, None] * HOP_MEL + np.arange(N_FFT)[None, :]
    mel_frames = padded[:, idx]                                  # (B, 32, 256)

    out = pl.pallas_call(
        _csednn_kernel,
        out_shape=jax.ShapeDtypeStruct((B, 1, NCLASS), jnp.float32),
        grid=(B,),
        in_specs=[
            pl.BlockSpec((None, L, TDNN_K), lambda b: (b, 0, 0)),
            pl.BlockSpec((None, T_MEL, N_FFT), lambda b: (b, 0, 0)),
            # Packed constant slabs: block index is constant across the grid,
            # so they are DMA'd once and re-used by every grid step.
            pl.BlockSpec((A_ROWS, 128), lambda b: (0, 0)),
            pl.BlockSpec((B_ROWS, B_COLS), lambda b: (0, 0)),
        ],
        out_specs=pl.BlockSpec((None, 1, NCLASS), lambda b: (b, 0, 0)),
        compiler_params=pltpu.CompilerParams(dimension_semantics=("parallel",)),
    )(tdnn_frames, mel_frames, slab_a, slab_b)
    return out[:, 0, :]


if __name__ == "__main__":
    key = jax.random.PRNGKey(0)
    k_in, k_par = jax.random.split(key)
    x = jax.random.normal(k_in, (B, 1, WAV_LEN), dtype=jnp.float32)
    slab_a, slab_b = build_model(k_par)
    logits = jax.jit(csednn_forward)(x, slab_a, slab_b)
    logits = jax.block_until_ready(logits)
    assert logits.shape == (B, NCLASS), logits.shape
    assert bool(jnp.all(jnp.isfinite(logits)))
    print("KERNEL_OK")
</pallas_src>

<mosaic_0001>
module attributes {stable_mosaic.version = 11 : i64} {
  func.func private @main(%arg0: i32) attributes {dimension_semantics = [#tpu.dimension_semantics<core_parallel>], iteration_bounds = array<i64: 2>, tpu.core_type = #tpu.core_type<sc_scalar_subcore>, window_params = []} {
    return
  }
}

module attributes {stable_mosaic.version = 11 : i64} {
  func.func private @main(%arg0: i32) attributes {dimension_semantics = [#tpu.dimension_semantics<core_parallel>], iteration_bounds = array<i64: 2>, tpu.core_type = #tpu.core_type<sc_scalar_subcore>, window_params = []} {
    return
  }
}

module attributes {stable_mosaic.version = 11 : i64} {
  func.func @_csednn_kernel(%arg0: i32, %arg1: memref<1x40x128xf32, #tpu.memory_space<vmem>>, %arg2: memref<1x32x256xf32, #tpu.memory_space<vmem>>, %arg3: memref<1160x128xf32, #tpu.memory_space<vmem>>, %arg4: memref<424x512xf32, #tpu.memory_space<vmem>>, %arg5: memref<1x1x2xf32, #tpu.memory_space<vmem>>) attributes {dimension_semantics = [#tpu.dimension_semantics<parallel>], iteration_bounds = array<i64: 2>, scalar_prefetch = 0 : i64, scratch_operands = 0 : i64, tpu.core_type = #tpu.core_type<tc>, window_params = [{transform_indices = @transform_0, window_bounds = array<i64: 1, 40, 128>}, {transform_indices = @transform_1, window_bounds = array<i64: 1, 32, 256>}, {pipeline_mode = #tpu.pipeline_mode<synchronous>, transform_indices = @transform_2, window_bounds = array<i64: 1160, 128>}, {pipeline_mode = #tpu.pipeline_mode<synchronous>, transform_indices = @transform_3, window_bounds = array<i64: 424, 512>}, {transform_indices = @transform_4, window_bounds = array<i64: 1, 1, 2>}]} {
    %c0 = arith.constant 0 : index
    %c0_0 = arith.constant 0 : index
    %c0_1 = arith.constant 0 : index
    %0 = vector.load %arg1[%c0, %c0_0, %c0_1] : memref<1x40x128xf32, #tpu.memory_space<vmem>>, vector<1x40x128xf32>
    %1 = vector.shape_cast %0 : vector<1x40x128xf32> to vector<40x128xf32>
    %c0_2 = arith.constant 0 : index
    %c0_3 = arith.constant 0 : index
    %2 = vector.load %arg3[%c0_2, %c0_3] : memref<1160x128xf32, #tpu.memory_space<vmem>>, vector<128x32xf32>
    %cst = arith.constant dense<0.000000e+00> : vector<40x32xf32>
    %3 = tpu.matmul %1, %2, %cst {dimension_numbers = #tpu.dot_dimension_numbers<[1], [0], [0], [1], [0, 0, 1, 1], [], []>} : vector<40x128xf32>, vector<128x32xf32>, vector<40x32xf32> -> vector<40x32xf32>
    %c1072 = arith.constant 1072 : index
    %c0_4 = arith.constant 0 : index
    %4 = vector.load %arg3[%c1072, %c0_4] : memref<1160x128xf32, #tpu.memory_space<vmem>>, vector<1x32xf32>
    %5 = vector.broadcast %4 : vector<1x32xf32> to vector<40x32xf32>
    %6 = arith.addf %3, %5 : vector<40x32xf32>
    %c0_5 = arith.constant 0 : index
    %c0_6 = arith.constant 0 : index
    %c0_7 = arith.constant 0 : index
    %7 = vector.load %arg2[%c0_5, %c0_6, %c0_7] : memref<1x32x256xf32, #tpu.memory_space<vmem>>, vector<1x32x256xf32>
    %8 = vector.shape_cast %7 : vector<1x32x256xf32> to vector<32x256xf32>
    %c128 = arith.constant 128 : index
    %c0_8 = arith.constant 0 : index
    %9 = vector.load %arg3[%c128, %c0_8] : memref<1160x128xf32, #tpu.memory_space<vmem>>, vector<256x128xf32>
    %cst_9 = arith.constant dense<0.000000e+00> : vector<32x128xf32>
    %10 = tpu.matmul %8, %9, %cst_9 {dimension_numbers = #tpu.dot_dimension_numbers<[1], [0], [0], [1], [0, 0, 1, 1], [], []>} : vector<32x256xf32>, vector<256x128xf32>, vector<32x128xf32> -> vector<32x128xf32>
    %c384 = arith.constant 384 : index
    %c0_10 = arith.constant 0 : index
    %11 = vector.load %arg3[%c384, %c0_10] : memref<1160x128xf32, #tpu.memory_space<vmem>>, vector<256x128xf32>
    %cst_11 = arith.constant dense<0.000000e+00> : vector<32x128xf32>
    %12 = tpu.matmul %8, %11, %cst_11 {dimension_numbers = #tpu.dot_dimension_numbers<[1], [0], [0], [1], [0, 0, 1, 1], [], []>} : vector<32x256xf32>, vector<256x128xf32>, vector<32x128xf32> -> vector<32x128xf32>
    %13 = arith.mulf %10, %10 : vector<32x128xf32>
    %14 = arith.mulf %12, %12 : vector<32x128xf32>
    %15 = arith.addf %13, %14 : vector<32x128xf32>
    %c640 = arith.constant 640 : index
    %c0_12 = arith.constant 0 : index
    %16 = vector.load %arg3[%c640, %c0_12] : memref<1160x128xf32, #tpu.memory_space<vmem>>, vector<128x8xf32>
    %cst_13 = arith.constant dense<0.000000e+00> : vector<32x8xf32>
    %17 = tpu.matmul %15, %16, %cst_13 {dimension_numbers = #tpu.dot_dimension_numbers<[1], [0], [0], [1], [0, 0, 1, 1], [], []>} : vector<32x128xf32>, vector<128x8xf32>, vector<32x8xf32> -> vector<32x8xf32>
    %cst_14 = arith.constant 9.99999997E-7 : f32
    %18 = vector.broadcast %cst_14 : f32 to vector<32x8xf32>
    %19 = arith.addf %17, %18 : vector<32x8xf32>
    %20 = math.log %19 : vector<32x8xf32>
    %21 = tpu.iota {dimensions = array<i32: 0>} : vector<32x128xi32>
    %c0_15 = arith.constant 0 : index
    %c0_16 = arith.constant 0 : index
    %22 = vector.load %arg4[%c0_15, %c0_16] : memref<424x512xf32, #tpu.memory_space<vmem>>, vector<8x384xf32>
    %cst_17 = arith.constant dense<0.000000e+00> : vector<32x384xf32>
    %23 = tpu.matmul %20, %22, %cst_17 {dimension_numbers = #tpu.dot_dimension_numbers<[1], [0], [0], [1], [0, 0, 1, 1], [], []>} : vector<32x8xf32>, vector<8x384xf32>, vector<32x384xf32> -> vector<32x384xf32>
    %c0_i32 = arith.constant 0 : i32
    %24 = vector.broadcast %c0_i32 : i32 to vector<32x128xi32>
    %25 = arith.cmpi eq, %21, %24 : vector<32x128xi32>
    %26 = vector.extract_strided_slice %23 {offsets = [0, 0], sizes = [32, 128], strides = [1, 1]} : vector<32x384xf32> to vector<32x128xf32>
    %c1_i32 = arith.constant 1 : i32
    %27 = tpu.dynamic_rotate %26 by %c1_i32 dim 0 : vector<32x128xf32>, i32 -> vector<32x128xf32>
    %cst_18 = arith.constant 0.000000e+00 : f32
    %28 = vector.broadcast %cst_18 : f32 to vector<32x128xf32>
    %29 = arith.select %25, %28, %27 : vector<32x128xi1>, vector<32x128xf32>
    %c31_i32 = arith.constant 31 : i32
    %30 = vector.broadcast %c31_i32 : i32 to vector<32x128xi32>
    %31 = arith.cmpi eq, %21, %30 : vector<32x128xi32>
    %32 = vector.extract_strided_slice %23 {offsets = [0, 256], sizes = [32, 128], strides = [1, 1]} : vector<32x384xf32> to vector<32x128xf32>
    %c31_i32_19 = arith.constant 31 : i32
    %33 = tpu.dynamic_rotate %32 by %c31_i32_19 dim 0 : vector<32x128xf32>, i32 -> vector<32x128xf32>
    %cst_20 = arith.constant 0.000000e+00 : f32
    %34 = vector.broadcast %cst_20 : f32 to vector<32x128xf32>
    %35 = arith.select %31, %34, %33 : vector<32x128xi1>, vector<32x128xf32>
    %36 = vector.extract_strided_slice %23 {offsets = [0, 128], sizes = [32, 128], strides = [1, 1]} : vector<32x384xf32> to vector<32x128xf32>
    %37 = arith.addf %36, %29 : vector<32x128xf32>
    %38 = arith.addf %37, %35 : vector<32x128xf32>
    %c1080 = arith.constant 1080 : index
    %c0_21 = arith.constant 0 : index
    %39 = vector.load %arg3[%c1080, %c0_21] : memref<1160x128xf32, #tpu.memory_space<vmem>>, vector<1x128xf32>
    %40 = vector.broadcast %39 : vector<1x128xf32> to vector<32x128xf32>
    %41 = arith.mulf %38, %40 : vector<32x128xf32>
    %c1088 = arith.constant 1088 : index
    %c0_22 = arith.constant 0 : index
    %42 = vector.load %arg3[%c1088, %c0_22] : memref<1160x128xf32, #tpu.memory_space<vmem>>, vector<1x128xf32>
    %43 = vector.broadcast %42 : vector<1x128xf32> to vector<32x128xf32>
    %44 = arith.addf %41, %43 : vector<32x128xf32>
    %cst_23 = arith.constant 0.000000e+00 : f32
    %45 = vector.broadcast %cst_23 : f32 to vector<32x128xf32>
    %46 = arith.subf %45, %44 : vector<32x128xf32>
    %47 = math.exp %46 : vector<32x128xf32>
    %cst_24 = arith.constant 1.000000e+00 : f32
    %48 = vector.broadcast %cst_24 : f32 to vector<32x128xf32>
    %49 = arith.addf %48, %47 : vector<32x128xf32>
    %50 = tpu.reciprocal %49 {approx = true} : vector<32x128xf32> -> vector<32x128xf32>
    %51 = arith.mulf %44, %50 : vector<32x128xf32>
    %c8 = arith.constant 8 : index
    %c0_25 = arith.constant 0 : index
    %52 = vector.load %arg4[%c8, %c0_25] : memref<424x512xf32, #tpu.memory_space<vmem>>, vector<128x384xf32>
    %cst_26 = arith.constant dense<0.000000e+00> : vector<32x384xf32>
    %53 = tpu.matmul %51, %52, %cst_26 {dimension_numbers = #tpu.dot_dimension_numbers<[1], [0], [0], [1], [0, 0, 1, 1], [], []>} : vector<32x128xf32>, vector<128x384xf32>, vector<32x384xf32> -> vector<32x384xf32>
    %c0_i32_27 = arith.constant 0 : i32
    %54 = vector.broadcast %c0_i32_27 : i32 to vector<32x128xi32>
    %55 = arith.cmpi eq, %21, %54 : vector<32x128xi32>
    %56 = vector.extract_strided_slice %53 {offsets = [0, 0], sizes = [32, 128], strides = [1, 1]} : vector<32x384xf32> to vector<32x128xf32>
    %c1_i32_28 = arith.constant 1 : i32
    %57 = tpu.dynamic_rotate %56 by %c1_i32_28 dim 0 : vector<32x128xf32>, i32 -> vector<32x128xf32>
    %cst_29 = arith.constant 0.000000e+00 : f32
    %58 = vector.broadcast %cst_29 : f32 to vector<32x128xf32>
    %59 = arith.select %55, %58, %57 : vector<32x128xi1>, vector<32x128xf32>
    %c31_i32_30 = arith.constant 31 : i32
    %60 = vector.broadcast %c31_i32_30 : i32 to vector<32x128xi32>
    %61 = arith.cmpi eq, %21, %60 : vector<32x128xi32>
    %62 = vector.extract_strided_slice %53 {offsets = [0, 256], sizes = [32, 128], strides = [1, 1]} : vector<32x384xf32> to vector<32x128xf32>
    %c31_i32_31 = arith.constant 31 : i32
    %63 = tpu.dynamic_rotate %62 by %c31_i32_31 dim 0 : vector<32x128xf32>, i32 -> vector<32x128xf32>
    %cst_32 = arith.constant 0.000000e+00 : f32
    %64 = vector.broadcast %cst_32 : f32 to vector<32x128xf32>
    %65 = arith.select %61, %64, %63 : vector<32x128xi1>, vector<32x128xf32>
    %66 = vector.extract_strided_slice %53 {offsets = [0, 128], sizes = [32, 128], strides = [1, 1]} : vector<32x384xf32> to vector<32x128xf32>
    %67 = arith.addf %66, %59 : vector<32x128xf32>
    %68 = arith.addf %67, %65 : vector<32x128xf32>
    %c1096 = arith.constant 1096 : index
    %c0_33 = arith.constant 0 : index
    %69 = vector.load %arg3[%c1096, %c0_33] : memref<1160x128xf32, #tpu.memory_space<vmem>>, vector<1x128xf32>
    %70 = vector.broadcast %69 : vector<1x128xf32> to vector<32x128xf32>
    %71 = arith.mulf %68, %70 : vector<32x128xf32>
    %c1104 = arith.constant 1104 : index
    %c0_34 = arith.constant 0 : index
    %72 = vector.load %arg3[%c1104, %c0_34] : memref<1160x128xf32, #tpu.memory_space<vmem>>, vector<1x128xf32>
    %73 = vector.broadcast %72 : vector<1x128xf32> to vector<32x128xf32>
    %74 = arith.addf %71, %73 : vector<32x128xf32>
    %cst_35 = arith.constant 0.000000e+00 : f32
    %75 = vector.broadcast %cst_35 : f32 to vector<32x128xf32>
    %76 = arith.subf %75, %74 : vector<32x128xf32>
    %77 = math.exp %76 : vector<32x128xf32>
    %cst_36 = arith.constant 1.000000e+00 : f32
    %78 = vector.broadcast %cst_36 : f32 to vector<32x128xf32>
    %79 = arith.addf %78, %77 : vector<32x128xf32>
    %80 = tpu.reciprocal %79 {approx = true} : vector<32x128xf32> -> vector<32x128xf32>
    %81 = arith.mulf %74, %80 : vector<32x128xf32>
    %c768 = arith.constant 768 : index
    %c0_37 = arith.constant 0 : index
    %82 = vector.load %arg3[%c768, %c0_37] : memref<1160x128xf32, #tpu.memory_space<vmem>>, vector<40x32xf32>
    %cst_38 = arith.constant dense<0.000000e+00> : vector<40x128xf32>
    %83 = tpu.matmul %82, %81, %cst_38 {dimension_numbers = #tpu.dot_dimension_numbers<[1], [0], [0], [1], [0, 0, 1, 1], [], []>} : vector<40x32xf32>, vector<32x128xf32>, vector<40x128xf32> -> vector<40x128xf32>
    %c808 = arith.constant 808 : index
    %c0_39 = arith.constant 0 : index
    %84 = vector.load %arg3[%c808, %c0_39] : memref<1160x128xf32, #tpu.memory_space<vmem>>, vector<8x40xf32>
    %cst_40 = arith.constant dense<0.000000e+00> : vector<8x32xf32>
    %85 = tpu.matmul %84, %6, %cst_40 {dimension_numbers = #tpu.dot_dimension_numbers<[1], [0], [0], [1], [0, 0, 1, 1], [], []>} : vector<8x40xf32>, vector<40x32xf32>, vector<8x32xf32> -> vector<8x32xf32>
    %cst_41 = arith.constant dense<0.000000e+00> : vector<8x128xf32>
    %86 = tpu.matmul %84, %83, %cst_41 {dimension_numbers = #tpu.dot_dimension_numbers<[1], [0], [0], [1], [0, 0, 1, 1], [], []>} : vector<8x40xf32>, vector<40x128xf32>, vector<8x128xf32> -> vector<8x128xf32>
    %c136 = arith.constant 136 : index
    %c0_42 = arith.constant 0 : index
    %87 = vector.load %arg4[%c136, %c0_42] : memref<424x512xf32, #tpu.memory_space<vmem>>, vector<32x512xf32>
    %cst_43 = arith.constant dense<0.000000e+00> : vector<8x512xf32>
    %88 = tpu.matmul %85, %87, %cst_43 {dimension_numbers = #tpu.dot_dimension_numbers<[1], [0], [0], [1], [0, 0, 1, 1], [], []>} : vector<8x32xf32>, vector<32x512xf32>, vector<8x512xf32> -> vector<8x512xf32>
    %c168 = arith.constant 168 : index
    %c0_44 = arith.constant 0 : index
    %89 = vector.load %arg4[%c168, %c0_44] : memref<424x512xf32, #tpu.memory_space<vmem>>, vector<128x512xf32>
    %cst_45 = arith.constant dense<0.000000e+00> : vector<8x512xf32>
    %90 = tpu.matmul %86, %89, %cst_45 {dimension_numbers = #tpu.dot_dimension_numbers<[1], [0], [0], [1], [0, 0, 1, 1], [], []>} : vector<8x128xf32>, vector<128x512xf32>, vector<8x512xf32> -> vector<8x512xf32>
    %91 = arith.addf %88, %90 : vector<8x512xf32>
    %92 = vector.extract_strided_slice %91 {offsets = [0, 0], sizes = [8, 128], strides = [1, 1]} : vector<8x512xf32> to vector<8x128xf32>
    %93 = vector.extract_strided_slice %91 {offsets = [0, 128], sizes = [8, 128], strides = [1, 1]} : vector<8x512xf32> to vector<8x128xf32>
    %94 = arith.maximumf %92, %93 : vector<8x128xf32>
    %95 = vector.extract_strided_slice %91 {offsets = [0, 256], sizes = [8, 128], strides = [1, 1]} : vector<8x512xf32> to vector<8x128xf32>
    %96 = vector.extract_strided_slice %91 {offsets = [0, 384], sizes = [8, 128], strides = [1, 1]} : vector<8x512xf32> to vector<8x128xf32>
    %97 = arith.maximumf %95, %96 : vector<8x128xf32>
    %98 = arith.maximumf %94, %97 : vector<8x128xf32>
    %c296 = arith.constant 296 : index
    %c0_46 = arith.constant 0 : index
    %99 = vector.load %arg4[%c296, %c0_46] : memref<424x512xf32, #tpu.memory_space<vmem>>, vector<128x384xf32>
    %cst_47 = arith.constant dense<0.000000e+00> : vector<8x384xf32>
    %100 = tpu.matmul %98, %99, %cst_47 {dimension_numbers = #tpu.dot_dimension_numbers<[1], [0], [0], [1], [0, 0, 1, 1], [], []>} : vector<8x128xf32>, vector<128x384xf32>, vector<8x384xf32> -> vector<8x384xf32>
    %101 = vector.extract_strided_slice %100 {offsets = [0, 0], sizes = [8, 128], strides = [1, 1]} : vector<8x384xf32> to vector<8x128xf32>
    %c1112 = arith.constant 1112 : index
    %c0_48 = arith.constant 0 : index
    %102 = vector.load %arg3[%c1112, %c0_48] : memref<1160x128xf32, #tpu.memory_space<vmem>>, vector<1x128xf32>
    %103 = vector.broadcast %102 : vector<1x128xf32> to vector<8x128xf32>
    %104 = arith.addf %101, %103 : vector<8x128xf32>
    %105 = vector.extract_strided_slice %100 {offsets = [0, 128], sizes = [8, 128], strides = [1, 1]} : vector<8x384xf32> to vector<8x128xf32>
    %c1120 = arith.constant 1120 : index
    %c0_49 = arith.constant 0 : index
    %106 = vector.load %arg3[%c1120, %c0_49] : memref<1160x128xf32, #tpu.memory_space<vmem>>, vector<1x128xf32>
    %107 = vector.broadcast %106 : vector<1x128xf32> to vector<8x128xf32>
    %108 = arith.addf %105, %107 : vector<8x128xf32>
    %109 = vector.extract_strided_slice %100 {offsets = [0, 256], sizes = [8, 128], strides = [1, 1]} : vector<8x384xf32> to vector<8x128xf32>
    %c1128 = arith.constant 1128 : index
    %c0_50 = arith.constant 0 : index
    %110 = vector.load %arg3[%c1128, %c0_50] : memref<1160x128xf32, #tpu.memory_space<vmem>>, vector<1x128xf32>
    %111 = vector.broadcast %110 : vector<1x128xf32> to vector<8x128xf32>
    %112 = arith.addf %109, %111 : vector<8x128xf32>
    %c856 = arith.constant 856 : index
    %c0_51 = arith.constant 0 : index
    %113 = vector.load %arg3[%c856, %c0_51] : memref<1160x128xf32, #tpu.memory_space<vmem>>, vector<32x128xf32>
    %c816 = arith.constant 816 : index
    %c0_52 = arith.constant 0 : index
    %114 = vector.load %arg3[%c816, %c0_52] : memref<1160x128xf32, #tpu.memory_space<vmem>>, vector<32x8xf32>
    %cst_53 = arith.constant dense<0.000000e+00> : vector<32x128xf32>
    %115 = tpu.matmul %114, %104, %cst_53 {dimension_numbers = #tpu.dot_dimension_numbers<[1], [0], [0], [1], [0, 0, 1, 1], [], []>} : vector<32x8xf32>, vector<8x128xf32>, vector<32x128xf32> -> vector<32x128xf32>
    %116 = arith.mulf %115, %113 : vector<32x128xf32>
    %cst_54 = arith.constant dense<0.000000e+00> : vector<32x8xf32>
    %117 = tpu.matmul %116, %108, %cst_54 {dimension_numbers = #tpu.dot_dimension_numbers<[1], [1], [0], [0], [0, 0, 1, 0], [], []>} : vector<32x128xf32>, vector<8x128xf32>, vector<32x8xf32> -> vector<32x8xf32>
    %cst_55 = arith.constant 0.316227764 : f32
    %118 = vector.broadcast %cst_55 : f32 to vector<32x8xf32>
    %119 = arith.mulf %117, %118 : vector<32x8xf32>
    %cst_56 = arith.constant dense<0xFF800000> : vector<32xf32>
    %120 = vector.multi_reduction <maximumf>, %119, %cst_56 [1] : vector<32x8xf32> to vector<32xf32>
    %121 = vector.shape_cast %120 : vector<32xf32> to vector<32x1xf32>
    %122 = vector.broadcast %121 : vector<32x1xf32> to vector<32x8xf32>
    %123 = arith.subf %119, %122 : vector<32x8xf32>
    %124 = math.exp %123 : vector<32x8xf32>
    %cst_57 = arith.constant dense<0.000000e+00> : vector<32xf32>
    %125 = vector.multi_reduction <add>, %124, %cst_57 [1] : vector<32x8xf32> to vector<32xf32>
    %126 = vector.shape_cast %125 : vector<32xf32> to vector<32x1xf32>
    %127 = tpu.reciprocal %126 {approx = true} : vector<32x1xf32> -> vector<32x1xf32>
    %128 = vector.broadcast %127 : vector<32x1xf32> to vector<32x8xf32>
    %129 = arith.mulf %124, %128 : vector<32x8xf32>
    %cst_58 = arith.constant dense<0.000000e+00> : vector<32x128xf32>
    %130 = tpu.matmul %129, %112, %cst_58 {dimension_numbers = #tpu.dot_dimension_numbers<[1], [0], [0], [1], [0, 0, 1, 1], [], []>} : vector<32x8xf32>, vector<8x128xf32>, vector<32x128xf32> -> vector<32x128xf32>
    %131 = arith.mulf %130, %113 : vector<32x128xf32>
    %c848 = arith.constant 848 : index
    %c0_59 = arith.constant 0 : index
    %132 = vector.load %arg3[%c848, %c0_59] : memref<1160x128xf32, #tpu.memory_space<vmem>>, vector<8x32xf32>
    %cst_60 = arith.constant dense<0.000000e+00> : vector<8x128xf32>
    %133 = tpu.matmul %132, %131, %cst_60 {dimension_numbers = #tpu.dot_dimension_numbers<[1], [0], [0], [1], [0, 0, 1, 1], [], []>} : vector<8x32xf32>, vector<32x128xf32>, vector<8x128xf32> -> vector<8x128xf32>
    %c888 = arith.constant 888 : index
    %c0_61 = arith.constant 0 : index
    %134 = vector.load %arg3[%c888, %c0_61] : memref<1160x128xf32, #tpu.memory_space<vmem>>, vector<128x40xf32>
    %cst_62 = arith.constant dense<0.000000e+00> : vector<8x40xf32>
    %135 = tpu.matmul %133, %134, %cst_62 {dimension_numbers = #tpu.dot_dimension_numbers<[1], [0], [0], [1], [0, 0, 1, 1], [], []>} : vector<8x128xf32>, vector<128x40xf32>, vector<8x40xf32> -> vector<8x40xf32>
    %c1136 = arith.constant 1136 : index
    %c0_63 = arith.constant 0 : index
    %136 = vector.load %arg3[%c1136, %c0_63] : memref<1160x128xf32, #tpu.memory_space<vmem>>, vector<1x40xf32>
    %137 = vector.broadcast %136 : vector<1x40xf32> to vector<8x40xf32>
    %138 = arith.addf %135, %137 : vector<8x40xf32>
    %c1016 = arith.constant 1016 : index
    %c0_64 = arith.constant 0 : index
    %139 = vector.load %arg3[%c1016, %c0_64] : memref<1160x128xf32, #tpu.memory_space<vmem>>, vector<40x16xf32>
    %cst_65 = arith.constant dense<0.000000e+00> : vector<8x16xf32>
    %140 = tpu.matmul %138, %139, %cst_65 {dimension_numbers = #tpu.dot_dimension_numbers<[1], [0], [0], [1], [0, 0, 1, 1], [], []>} : vector<8x40xf32>, vector<40x16xf32>, vector<8x16xf32> -> vector<8x16xf32>
    %c1144 = arith.constant 1144 : index
    %c0_66 = arith.constant 0 : index
    %141 = vector.load %arg3[%c1144, %c0_66] : memref<1160x128xf32, #tpu.memory_space<vmem>>, vector<1x16xf32>
    %142 = vector.broadcast %141 : vector<1x16xf32> to vector<8x16xf32>
    %143 = arith.addf %140, %142 : vector<8x16xf32>
    %cst_67 = arith.constant 0.000000e+00 : f32
    %144 = vector.broadcast %cst_67 : f32 to vector<8x16xf32>
    %145 = arith.maximumf %143, %144 : vector<8x16xf32>
    %cst_68 = arith.constant dense<0.000000e+00> : vector<16xf32>
    %146 = vector.multi_reduction <add>, %145, %cst_68 [0] : vector<8x16xf32> to vector<16xf32>
    %147 = vector.shape_cast %146 : vector<16xf32> to vector<1x16xf32>
    %cst_69 = arith.constant 8.000000e+00 : f32
    %148 = vector.broadcast %cst_69 : f32 to vector<1x16xf32>
    %149 = arith.divf %147, %148 : vector<1x16xf32>
    %c1056 = arith.constant 1056 : index
    %c0_70 = arith.constant 0 : index
    %150 = vector.load %arg3[%c1056, %c0_70] : memref<1160x128xf32, #tpu.memory_space<vmem>>, vector<16x2xf32>
    %cst_71 = arith.constant dense<0.000000e+00> : vector<1x2xf32>
    %151 = tpu.matmul %149, %150, %cst_71 {dimension_numbers = #tpu.dot_dimension_numbers<[1], [0], [0], [1], [0, 0, 1, 1], [], []>} : vector<1x16xf32>, vector<16x2xf32>, vector<1x2xf32> -> vector<1x2xf32>
    %c1152 = arith.constant 1152 : index
    %c0_72 = arith.constant 0 : index
    %152 = vector.load %arg3[%c1152, %c0_72] : memref<1160x128xf32, #tpu.memory_space<vmem>>, vector<1x2xf32>
    %153 = arith.addf %151, %152 : vector<1x2xf32>
    %c0_73 = arith.constant 0 : index
    %c0_74 = arith.constant 0 : index
    %c0_75 = arith.constant 0 : index
    %154 = vector.load %arg5[%c0_73, %c0_74, %c0_75] : memref<1x1x2xf32, #tpu.memory_space<vmem>>, vector<1x1x2xf32>
    %155 = vector.shape_cast %154 : vector<1x1x2xf32> to vector<1x2xf32>
    %156 = vector.shape_cast %153 : vector<1x2xf32> to vector<1x1x2xf32>
    tpu.vector_store %arg5[%c0_73, %c0_74, %c0_75], %156 {strides = array<i32>} : memref<1x1x2xf32, #tpu.memory_space<vmem>>, vector<1x1x2xf32>,
    return
  }
  func.func @transform_0(%arg0: i32) -> (i32, i32, i32) {
    %c0_i32 = arith.constant 0 : i32
    %c0_i32_0 = arith.constant 0 : i32
    %c0_i32_1 = arith.constant 0 : i32
    return %arg0, %c0_i32, %c0_i32_0 : i32, i32, i32
  }
  func.func @transform_1(%arg0: i32) -> (i32, i32, i32) {
    %c0_i32 = arith.constant 0 : i32
    %c0_i32_0 = arith.constant 0 : i32
    %c0_i32_1 = arith.constant 0 : i32
    return %arg0, %c0_i32, %c0_i32_0 : i32, i32, i32
  }
  func.func @transform_2(%arg0: i32) -> (i32, i32) {
    %c0_i32 = arith.constant 0 : i32
    %c0_i32_0 = arith.constant 0 : i32
    %c0_i32_1 = arith.constant 0 : i32
    return %c0_i32, %c0_i32_0 : i32, i32
  }
  func.func @transform_3(%arg0: i32) -> (i32, i32) {
    %c0_i32 = arith.constant 0 : i32
    %c0_i32_0 = arith.constant 0 : i32
    %c0_i32_1 = arith.constant 0 : i32
    return %c0_i32, %c0_i32_0 : i32, i32
  }
  func.func @transform_4(%arg0: i32) -> (i32, i32, i32) {
    %c0_i32 = arith.constant 0 : i32
    %c0_i32_0 = arith.constant 0 : i32
    %c0_i32_1 = arith.constant 0 : i32
    return %arg0, %c0_i32, %c0_i32_0 : i32, i32, i32
  }
}

</mosaic_0001>

<bundles_post_ra>
// kernel: squeeze.4
= control target key start
LH: loop header
LB: loop body
LE: loop exit
PB: predicated region body
PF: predicated region fallthrough
CT: control target
= control target key end

     0   :  { %vm1216_vm0 = vcmask 261120   ;;  %vm1217_vm1 = vcmask 293888   ;;  %s254_s3 = smov 3  ;;  %s257_s4 = smov 3  ;;  %vm1218_vm2 = vcmask 326656   ;;  %vm194_vm3 = vcmask 1043458   ;;  %s1214_s0 = inlined_call_operand.vmem [shape: f32[2,4000], index: 0, kind: input, shape index: {}]   ;;  %s1215_s1 = inlined_call_operand.vmem [shape: f32[2,40,100], index: 1, kind: output, shape index: {}]  }
   0x1   :  { %v698_v0 = vld [vmem:[%s1214_s0 + $0xe] sm:$0x3]  ;;  %v699_v1 = vld [vmem:[%s1214_s0 + $0xc] sm:$0x3]  ;;  %v691_v2 = vld [vmem:[%s1214_s0 + $0x1c] sm:$0x3] }
   0x2   :  { %128 = vst [vmem:[#allocation0 + $0x38] sm:$0x3] %v698_v0  ;;  %133 = vst [vmem:[#allocation0 + $0x30] sm:$0x3] %v699_v1  ;;  %v692_v3 = vld [vmem:[%s1214_s0 + $0x1a] sm:$0x3] }
   0x3   :  { %93 = vst [vmem:[#allocation0 + $0x70] sm:$0x3] %v691_v2  ;;  %98 = vst [vmem:[#allocation0 + $0x68] sm:$0x3] %v692_v3  ;;  %v684_v4 = vld [vmem:[%s1214_s0 + $0x2a] sm:$0x3] }
   0x4   :  { %v685_v5 = vld [vmem:[%s1214_s0 + $0x28] sm:$0x3]  ;;  %58 = vst [vmem:[#allocation0 + $0xa8] sm:$0x3] %v684_v4  ;;  %v677_v6 = vld [vmem:[%s1214_s0 + $0x38] sm:$0x3] }
   0x5   :  { %63 = vst [vmem:[#allocation0 + $0xa0] sm:$0x3] %v685_v5  ;;  %23 = vst [vmem:[#allocation0 + $0xe0] sm:$0x3] %v677_v6  ;;  %v678_v7 = vld [vmem:[%s1214_s0 + $0x36] sm:$0x3] }
   0x6   :  { %v702_v8 = vld [vmem:[%s1214_s0 + $0x6] sm:$0x3]  ;;  %28 = vst [vmem:[#allocation0 + $0xd8] sm:$0x3] %v678_v7  ;;  %v703_v9 = vld [vmem:[%s1214_s0 + $0x4] sm:$0x3] }
   0x7   :  { %148 = vst [vmem:[#allocation0 + $0x18] sm:$0x3] %v702_v8  ;;  %v695_v10 = vld [vmem:[%s1214_s0 + $0x14] sm:$0x3]  ;;  %153 = vst [vmem:[#allocation0 + $0x10] sm:$0x3] %v703_v9 }
   0x8   :  { %113 = vst [vmem:[#allocation0 + $0x50] sm:$0x3] %v695_v10  ;;  %v696_v11 = vld [vmem:[%s1214_s0 + $0x12] sm:$0x3]  ;;  %v688_v12 = vld [vmem:[%s1214_s0 + $0x22] sm:$0x3] }
   0x9   :  { %118 = vst [vmem:[#allocation0 + $0x48] sm:$0x3] %v696_v11  ;;  %78 = vst [vmem:[#allocation0 + $0x88] sm:$0x3] %v688_v12  ;;  %v689_v13 = vld [vmem:[%s1214_s0 + $0x20] sm:$0x3] }
   0xa   :  { %v681_v14 = vld [vmem:[%s1214_s0 + $0x30] sm:$0x3]  ;;  %v169_v15 = vld [vmem:[#allocation0 + $0x38] sm:$0x3]   ;;  %83 = vst [vmem:[#allocation0 + $0x80] sm:$0x3] %v689_v13 }
   0xb   :  { %v226_v16 = vld [vmem:[#allocation0 + $0x30] sm:$0x3]   ;;  %v228_v17 = vld [vmem:[#allocation0 + $0x38] sm:$0x3]   ;;  %43 = vst [vmem:[#allocation0 + $0xc0] sm:$0x3] %v681_v14 }
   0xc   :  { %s805_s9 = smov 124   ;;  %v230_v18 = vsel %vm1216_vm0, %v228_v17, %v226_v16  ;;  %v240_v19 = vld [vmem:[#allocation0 + $0x68] sm:$0x3]   ;;  %v242_v20 = vld [vmem:[#allocation0 + $0x70] sm:$0x3]   ;;  %s806_s10 = smov 96  }
   0xd   :  { %170 = vrot.lane.b32.xlu0 %v169_v15, %s805_s9  ;;  %231 = vrot.lane.b32.xlu1 %v230_v18, %s806_s10  ;;  %v176_v21 = vld [vmem:[#allocation0 + $0x70] sm:$0x3]   ;;  %vm1219_vm4 = vcmask 359424   ;;  %v682_v22 = vld [vmem:[%s1214_s0 + $0x2e] sm:$0x3]  ;;  %v244_v23 = vsel %vm1217_vm1, %v242_v20, %v240_v19  ;;  %s807_s15 = smov 120  }
   0xe   :  { %v255_v24 = vld [vmem:[#allocation0 + $0xa1] ss:$-1 sm:%s254_s3]   ;;  %v258_v25 = vld [vmem:[#allocation0 + $0xa9] ss:$-1 sm:%s257_s4]   ;;  %48 = vst [vmem:[#allocation0 + $0xb8] sm:$0x3] %v682_v22 }
   0xf   :  { %v278_v26 = vld [vmem:[#allocation0 + $0xde] sm:$0xc]   ;;  %v272_v27 = vld [vmem:[#allocation0 + $0xd6] sm:$0xc]   ;;  %v674_v29 = vld [vmem:[%s1214_s0 + $0x3e] sm:$0x3]  ;;  %v260_v33 = vsel %vm1218_vm2, %v258_v25, %v255_v24 }
  0x10   :  { %v276_v28 = vld [vmem:[#allocation0 + $0x18] sm:$0x3]   ;;  %v270_v30 = vld [vmem:[#allocation0 + $0x10] sm:$0x3]   ;;  %8 = vst [vmem:[#allocation0 + $0xf8] sm:$0x3] %v674_v29 }
  0x11   :  { %177 = vrot.lane.b32.xlu0 %v176_v21, %s807_s15  ;;  %v280_v31 = vsel %vm194_vm3, %v278_v26, %v276_v28  ;;  %v675_v32 = vld [vmem:[%s1214_s0 + $0x3c] sm:$0x3]  ;;  %s808_s18 = smov 92   ;;  %v274_v34 = vsel %vm194_vm3, %v272_v27, %v270_v30  ;;  %vm1220_vm5 = vcmask 392192   ;;  %vm313_vm6 = vcmask 424960   ;;  %s324_s21 = smov 3 }
  0x12   :  { %245 = vrot.lane.b32.xlu1 %v244_v23, %s808_s18  ;;  %13 = vst [vmem:[#allocation0 + $0xf0] sm:$0x3] %v675_v32  ;;  %v700_v35 = vld [vmem:[%s1214_s0 + $0xa] sm:$0x3]  ;;  %v282_v36 = vsel %vm1219_vm4, %v280_v31, %v274_v34  ;;  %v296_v37 = vld [vmem:[#allocation0 + $0x48] sm:$0x3]  }
  0x13   :  { %v298_v38 = vld [vmem:[#allocation0 + $0x50] sm:$0x3]   ;;  %s327_s22 = smov 3  ;;  %138 = vst [vmem:[#allocation0 + $0x28] sm:$0x3] %v700_v35  ;;  %s809_s25 = smov 88  }
  0x14   :  { %v310_v39 = vld [vmem:[#allocation0 + $0x80] sm:$0x3]   ;;  %v312_v40 = vld [vmem:[#allocation0 + $0x88] sm:$0x3]   ;;  %v693_v41 = vld [vmem:[%s1214_s0 + $0x18] sm:$0x3]  ;;  %v300_v43 = vsel %vm1220_vm5, %v298_v38, %v296_v37 }
  0x15   :  { %261 = vrot.lane.b32.xlu0 %v260_v33, %s809_s25  ;;  %103 = vst [vmem:[#allocation0 + $0x60] sm:$0x3] %v693_v41  ;;  %v686_v42 = vld [vmem:[%s1214_s0 + $0x26] sm:$0x3]  ;;  %s810_s28 = smov 84   ;;  %vm329_vm7 = vcmask 457728   ;;  %v314_v46 = vsel %vm313_vm6, %v312_v40, %v310_v39 }
  0x16   :  { %283 = vrot.lane.b32.xlu1 %v282_v36, %s810_s28  ;;  %v346_v44 = vld [vmem:[#allocation0 + $0x30] sm:$0x3]   ;;  %68 = vst [vmem:[#allocation0 + $0x98] sm:$0x3] %v686_v42  ;;  %v679_v45 = vld [vmem:[%s1214_s0 + $0x34] sm:$0x3] }
  0x17   :  { %v325_v47 = vld [vmem:[#allocation0 + $0xb9] ss:$-1 sm:%s324_s21]   ;;  %v328_v48 = vld [vmem:[#allocation0 + $0xc1] ss:$-1 sm:%s327_s22]   ;;  %33 = vst [vmem:[#allocation0 + $0xd0] sm:$0x3] %v679_v45 }
  0x18   :  { %v704_v49 = vld [vmem:[%s1214_s0 + $0x2] sm:$0x3]  ;;  %v348_v50 = vld [vmem:[#allocation0 + $0xf6] sm:$0xc]   ;;  %vm351_vm8 = vcmask 490496   ;;  %s383_s4 = smov 3  ;;  %v330_v55 = vsel %vm329_vm7, %v328_v48, %v325_v47 }
  0x19   :  { %157 = vst [vmem:[#allocation0 + $0x8] sm:$0x3] %v704_v49  ;;  %s811_s5 = smov 80   ;;  %v342_v51 = vld [vmem:[#allocation0 + $0xee] sm:$0xc]   ;;  %v350_v52 = vsel %vm194_vm3, %v348_v50, %v346_v44  ;;  %vm369_vm9 = vcmask 523264  }
  0x1a   :  { %301 = vrot.lane.b32.xlu0 %v300_v43, %s811_s5  ;;  %v368_v53 = vld [vmem:[#allocation0 + $0x68] sm:$0x3]   ;;  %v697_v54 = vld [vmem:[%s1214_s0 + $0x10] sm:$0x3]  ;;  %s812_s8 = smov 76   ;;  %vm355_vm10 = vcmask 556032  }
  0x1b   :  { %315 = vrot.lane.b32.xlu1 %v314_v46, %s812_s8  ;;  %v340_v56 = vld [vmem:[#allocation0 + $0x28] sm:$0x3]   ;;  %s380_s9 = smov 3  ;;  %123 = vst [vmem:[#allocation0 + $0x40] sm:$0x3] %v697_v54  ;;  %s813_s16 = smov 72  }
  0x1c   :  { %v690_v57 = vld [vmem:[%s1214_s0 + $0x1e] sm:$0x3]  ;;  %v344_v58 = vsel %vm194_vm3, %v342_v51, %v340_v56  ;;  %v402_v60 = vld [vmem:[#allocation0 + $0x10] sm:$0x3]   ;;  %v683_v61 = vld [vmem:[%s1214_s0 + $0x2c] sm:$0x3] }
  0x1d   :  { %v384_v59 = vld [vmem:[#allocation0 + $0xa1] ss:$-1 sm:%s383_s4]   ;;  %88 = vst [vmem:[#allocation0 + $0x78] sm:$0x3] %v690_v57  ;;  %v352_v62 = vsel %vm351_vm8, %v350_v52, %v344_v58  ;;  %v404_v0 = vld [vmem:[#allocation0 + $0xd6] sm:$0xc]  }
  0x1e   :  { %v366_v63 = vld [vmem:[#allocation0 + $0x60] sm:$0x3]   ;;  %53 = vst [vmem:[#allocation0 + $0xb0] sm:$0x3] %v683_v61  ;;  %v676_v1 = vld [vmem:[%s1214_s0 + $0x3a] sm:$0x3]  ;;  %331 = vrot.lane.b32.xlu0 %v330_v55, %s813_s16  ;;  %v406_v8 = vsel %vm194_vm3, %v404_v0, %v402_v60 }
  0x1f   :  { %v381_v2 = vld [vmem:[#allocation0 + $0x99] ss:$-1 sm:%s380_s9]   ;;  %18 = vst [vmem:[#allocation0 + $0xe8] sm:$0x3] %v676_v1  ;;  %s814_s17 = smov 68   ;;  %v370_v3 = vsel %vm369_vm9, %v368_v53, %v366_v63  ;;  %vm333_vm11 = vcmask 588800  }
  0x20   :  { %353 = vrot.lane.b32.xlu1 %v352_v62, %s814_s17  ;;  %v398_v4 = vld [vmem:[#allocation0 + $0xce] sm:$0xc]   ;;  %v701_v5 = vld [vmem:[%s1214_s0 + $0x8] sm:$0x3]  ;;  %v386_v6 = vsel %vm355_vm10, %v384_v59, %v381_v2  ;;  %s453_s20 = smov 3  ;;  %vm317_vm12 = vcmask 621568  }
  0x21   :  { %v396_v7 = vld [vmem:[#allocation0 + $0x8] sm:$0x3]   ;;  %143 = vst [vmem:[#allocation0 + $0x20] sm:$0x3] %v701_v5  ;;  %v694_v11 = vld [vmem:[%s1214_s0 + $0x16] sm:$0x3] }
  0x22   :  { %v400_v9 = vsel %vm194_vm3, %v398_v4, %v396_v7  ;;  %v424_v10 = vld [vmem:[#allocation0 + $0x48] sm:$0x3]   ;;  %s815_s23 = smov 64   ;;  %v422_v12 = vld [vmem:[#allocation0 + $0x40] sm:$0x3]   ;;  %s450_s24 = smov 3 }
  0x23   :  { %371 = vrot.lane.b32.xlu0 %v370_v3, %s815_s23  ;;  %v438_v13 = vld [vmem:[#allocation0 + $0x80] sm:$0x3]   ;;  %108 = vst [vmem:[#allocation0 + $0x58] sm:$0x3] %v694_v11  ;;  %v687_v14 = vld [vmem:[%s1214_s0 + $0x24] sm:$0x3]  ;;  %v408_v15 = vsel %vm333_vm11, %v406_v8, %v400_v9  ;;  %v426_v18 = vsel %vm317_vm12, %v424_v10, %v422_v12 }
  0x24   :  { %s816_s27 = smov 60   ;;  %vm303_vm13 = vcmask 654336   ;;  %vm285_vm14 = vcmask 687104   ;;  %v454_v16 = vld [vmem:[#allocation0 + $0xb9] ss:$-1 sm:%s453_s20]   ;;  %s818_s3 = smov 52  }
  0x25   :  { %387 = vrot.lane.b32.xlu1 %v386_v6, %s816_s27  ;;  %v472_v17 = vld [vmem:[#allocation0 + $0x28] sm:$0x3]   ;;  %73 = vst [vmem:[#allocation0 + $0x90] sm:$0x3] %v687_v14  ;;  %v436_v19 = vld [vmem:[#allocation0 + $0x78] sm:$0x3]  }
  0x26   :  { %v680_v20 = vld [vmem:[%s1214_s0 + $0x32] sm:$0x3]  ;;  %v158_v21 = vld [vmem:[%s1214_s0] sm:$0x3]  ;;  %v451_v22 = vld [vmem:[#allocation0 + $0xb1] ss:$-1 sm:%s450_s24]   ;;  %v440_v25 = vsel %vm303_vm13, %v438_v13, %v436_v19 }
  0x27   :  { %v468_v23 = vld [vmem:[#allocation0 + $0xe6] sm:$0xc]   ;;  %v474_v24 = vld [vmem:[#allocation0 + $0xee] sm:$0xc]   ;;  %38 = vst [vmem:[#allocation0 + $0xc8] sm:$0x3] %v680_v20  ;;  %v456_v27 = vsel %vm285_vm14, %v454_v16, %v451_v22 }
  0x28   :  { %159 = vst [vmem:[#allocation0] sm:$0x3] %v158_v21  ;;  %s817_s0 = smov 56   ;;  %v466_v26 = vld [vmem:[#allocation0 + $0x20] sm:$0x3]   ;;  %vm263_vm15 = vcmask 719872   ;;  %v476_v29 = vsel %vm194_vm3, %v474_v24, %v472_v17 }
  0x29   :  { %409 = vrot.lane.b32.xlu0 %v408_v15, %s817_s0  ;;  %427 = vrot.lane.b32.xlu1 %v426_v18, %s818_s3  ;;  %v470_v28 = vsel %vm194_vm3, %v468_v23, %v466_v26  ;;  %s506_s4 = smov 3  ;;  %s509_s5 = smov 3  ;;  %vm247_vm0 = vcmask 752640   ;;  %v494_v31 = vld [vmem:[#allocation0 + $0x60] sm:$0x3]   ;;  %vm233_vm1 = vcmask 785408  }
  0x2a   :  { %v492_v30 = vld [vmem:[#allocation0 + $0x58] sm:$0x3]   ;;  %s819_s6 = smov 48   ;;  %v527_v32 = vld [vmem:[#allocation0 + $0x8] sm:$0x3]   ;;  %s820_s7 = smov 44   ;;  %v478_v34 = vsel %vm263_vm15, %v476_v29, %v470_v28 }
  0x2b   :  { %v529_v33 = vld [vmem:[#allocation0 + $0xce] sm:$0xc]   ;;  %v510_v36 = vld [vmem:[#allocation0 + $0x99] ss:$-1 sm:%s509_s5]   ;;  %vm161_vm2 = vcmask 818176   ;;  %v496_v37 = vsel %vm247_vm0, %v494_v31, %v492_v30  ;;  %s821_s12 = smov 40  }
  0x2c   :  { %v507_v35 = vld [vmem:[#allocation0 + $0x91] ss:$-1 sm:%s506_s4]   ;;  %v531_v42 = vsel %vm194_vm3, %v529_v33, %v527_v32  ;;  %s822_s13 = smov 36   ;;  %v547_v45 = vld [vmem:[#allocation0 + $0x38] sm:$0x3]   ;;  %vm550_vm4 = vcmask 850944  }
  0x2d   :  { %441 = vrot.lane.b32.xlu0 %v440_v25, %s819_s6  ;;  %457 = vrot.lane.b32.xlu1 %v456_v27, %s820_s7  ;;  %v512_v44 = vsel %vm233_vm1, %v510_v36, %v507_v35  ;;  %v549_v47 = vld [vmem:[#allocation0 + $0x40] sm:$0x3]   ;;  %v561_v48 = vld [vmem:[#allocation0 + $0x70] sm:$0x3]   ;;  %vm564_vm5 = vcmask 883712   ;;  %s575_s14 = smov 3 }
  0x2e   :  { %v164_v39 = vld [vmem:[#allocation0 + $0xc8] sm:$0x3]   ;;  %v563_v49 = vld [vmem:[#allocation0 + $0x78] sm:$0x3]   ;;  %s578_s15 = smov 3  ;;  %s823_s16 = smov 32   ;;  %v551_v54 = vsel %vm550_vm4, %v549_v47, %v547_v45 }
  0x2f   :  { %v160_v38 = vld [vmem:[#allocation0] sm:$0x3]   ;;  %705 = vst.msk [vmem:[%s1215_s1 + $0x20] ss:$40 sm:$0x3] %vm161_vm2, %v164_v39   ;;  %s824_s17 = smov 28   ;;  %v565_v55 = vsel %vm564_vm5, %v563_v49, %v561_v48 }
  0x30   :  { %v521_v40 = vld [vmem:[#allocation0] sm:$0x3]   ;;  %162 = vst.msk [vmem:[%s1215_s1] ss:$40 sm:$0x3] %vm161_vm2, %v160_v38   ;;  %vm580_vm4 = vcmask 916480  }
  0x31   :  { %v523_v41 = vld [vmem:[#allocation0 + $0xc6] sm:$0xc]   ;;  %479 = vrot.lane.b32.xlu0 %v478_v34, %s821_s12  ;;  %497 = vrot.lane.b32.xlu1 %v496_v37, %s822_s13  ;;  %v591_v50 = vld [vmem:[#allocation0 + $0x18] sm:$0x3]   ;;  %v593_v51 = vld [vmem:[#allocation0 + $0xde] sm:$0xc]  }
  0x32   :  { %v525_v43 = vsel %vm194_vm3, %v523_v41, %v521_v40  ;;  %v597_v52 = vld [vmem:[#allocation0 + $0x20] sm:$0x3]   ;;  %v599_v53 = vld [vmem:[#allocation0 + $0xe6] sm:$0xc]   ;;  %v579_v57 = vld [vmem:[#allocation0 + $0xb1] ss:$-1 sm:%s578_s15]   ;;  %v595_v58 = vsel %vm194_vm3, %v593_v51, %v591_v50 }
  0x33   :  { %v533_v46 = vsel %vm161_vm2, %v531_v42, %v525_v43  ;;  %v576_v56 = vld [vmem:[#allocation0 + $0xa9] ss:$-1 sm:%s575_s14]   ;;  %v601_v59 = vsel %vm194_vm3, %v599_v53, %v597_v52  ;;  %vm602_vm5 = vcmask 949248   ;;  %s825_s18 = smov 24   ;;  %s826_s19 = smov 20  }
  0x34   :  { %v581_v60 = vsel %vm580_vm4, %v579_v57, %v576_v56  ;;  %v603_v61 = vsel %vm602_vm5, %v601_v59, %v595_v58  ;;  %v617_v62 = vld [vmem:[#allocation0 + $0x50] sm:$0x3]   ;;  %v619_v63 = vld [vmem:[#allocation0 + $0x58] sm:$0x3]   ;;  %vm620_vm4 = vcmask 982016   ;;  %vm634_vm5 = vcmask 1014784  }
  0x35   :  { %513 = vrot.lane.b32.xlu0 %v512_v44, %s823_s16  ;;  %534 = vrot.lane.b32.xlu1 %v533_v46, %s824_s17  ;;  %v631_v0 = vld [vmem:[#allocation0 + $0x88] sm:$0x3]   ;;  %v633_v1 = vld [vmem:[#allocation0 + $0x90] sm:$0x3]   ;;  %s827_s20 = smov 16   ;;  %s828_s21 = smov 12   ;;  %v621_v2 = vsel %vm620_vm4, %v619_v63, %v617_v62 }
  0x36   :  { %v635_v3 = vsel %vm634_vm5, %v633_v1, %v631_v0  ;;  %s183_s22 = smov 3  ;;  %v191_v4 = vld [vmem:[#allocation0 + $0x18] sm:$0x3]   ;;  %v193_v5 = vld [vmem:[#allocation0 + $0xde] sm:$0xc]   ;;  %s829_s23 = smov 8  }
  0x37   :  { %s830_s24 = smov 4   ;;  %v184_v6 = vld [vmem:[#allocation0 + $0xa9] ss:$-1 sm:%s183_s22]   ;;  %v195_v7 = vsel %vm194_vm3, %v193_v5, %v191_v4  ;;  %s831_s25 = smov 116   ;;  %v204_v8 = vld [vmem:[#allocation0 + $0x50] sm:$0x3]  }
  0x38   :  { %s832_s26 = smov 112   ;;  %s218_s27 = smov 3  ;;  %v211_v9 = vld [vmem:[#allocation0 + $0x88] sm:$0x3]   ;;  %vm236_vm3 = vcmask 818944   ;;  %vm290_vm4 = vcmask 818848  }
  0x39   :  { %552 = vrot.lane.b32.xlu0 %v551_v54, %s825_s18  ;;  %566 = vrot.lane.b32.xlu1 %v565_v55, %s826_s19  ;;  %s833_s28 = smov 108   ;;  %v219_v10 = vld [vmem:[#allocation0 + $0xc1] ss:$-1 sm:%s218_s27]   ;;  %s834_s29 = smov 104   ;;  %vm1221_vm5 = vcmask 392192  }
  0x3a   :  { %s835_s30 = smov 100  }
  0x3d   :  { %582 = vrot.lane.b32.xlu0 %v581_v60, %s827_s20  ;;  %604 = vrot.lane.b32.xlu1 %v603_v61, %s828_s21 }
  0x41   :  { %622 = vrot.lane.b32.xlu0 %v621_v2, %s829_s23  ;;  %636 = vrot.lane.b32.xlu1 %v635_v3, %s830_s24 }
  0x45   :  { %185 = vrot.lane.b32.xlu0 %v184_v6, %s831_s25  ;;  %196 = vrot.lane.b32.xlu1 %v195_v7, %s832_s26 }
  0x49   :  { %205 = vrot.lane.b32.xlu0 %v204_v8, %s833_s28  ;;  %212 = vrot.lane.b32.xlu1 %v211_v9, %s834_s29 }
  0x4d   :  { %220 = vrot.lane.b32.xlu0 %v219_v10, %s835_s30 }
  0x7f   :  { %v171_v11 = vpop.permute.xlu0 %170   ;;  %v232_v12 = vpop.permute.xlu1 %231  }
  0x80   :  { %706 = vst.msk [vmem:[%s1215_s1 + $0x9] ss:$40 sm:$0x3] %vm161_vm2, %v171_v11  }
  0x81   :  { %714 = vst.msk [vmem:[%s1215_s1 + $0x8] ss:$40 sm:$0x3] %vm233_vm1, %v232_v12   ;;  %vm250_vm1 = vcmask 818912  }
  0x82   :  { %715 = vst.msk [vmem:[%s1215_s1 + $0x8] ss:$40 sm:$0x3] %vm236_vm3, %v232_v12   ;;  %vm1222_vm3 = vcmask 359424  }
  0x83   :  { %v178_v13 = vpop.permute.xlu0 %177  }
  0x84   :  { %707 = vst.msk [vmem:[%s1215_s1 + $0x12] ss:$40 sm:$0x3] %vm161_vm2, %v178_v13   ;;  %v246_v14 = vpop.permute.xlu1 %245  }
  0x85   :  { %716 = vst.msk [vmem:[%s1215_s1 + $0x11] ss:$40 sm:$0x3] %vm247_vm0, %v246_v14   ;;  %vm266_vm0 = vcmask 818880  }
  0x86   :  { %717 = vst.msk [vmem:[%s1215_s1 + $0x11] ss:$40 sm:$0x3] %vm250_vm1, %v246_v14   ;;  %vm486_vm1 = vcmask 818496  }
  0x87   :  { %v262_v15 = vpop.permute.xlu0 %261  }
  0x88   :  { %718 = vst.msk [vmem:[%s1215_s1 + $0x42] ss:$-40 sm:$0x3] %vm263_vm15, %v262_v15   ;;  %v284_v16 = vpop.permute.xlu1 %283   ;;  %vm320_vm15 = vcmask 818784  }
  0x89   :  { %719 = vst.msk [vmem:[%s1215_s1 + $0x42] ss:$-40 sm:$0x3] %vm266_vm0, %v262_v15   ;;  %vm502_vm0 = vcmask 818464  }
  0x8a   :  { %720 = vst.msk [vmem:[%s1215_s1 + $0x3] ss:$40 sm:$0x3] %vm285_vm14, %v284_v16   ;;  %721 = vst.msk [vmem:[%s1215_s1 - $0x2d] ss:$40 sm:$0xc] %vm285_vm14, %v284_v16  }
  0x8b   :  { %722 = vst.msk [vmem:[%s1215_s1 + $0x3] ss:$40 sm:$0x3] %vm290_vm4, %v284_v16   ;;  %723 = vst.msk [vmem:[%s1215_s1 - $0x2d] ss:$40 sm:$0xc] %vm290_vm4, %v284_v16  }
  0x8c   :  { %vm306_vm14 = vcmask 818816   ;;  %v302_v17 = vpop.permute.xlu0 %301   ;;  %vm1223_vm4 = vcmask 326656  }
  0x8d   :  { %724 = vst.msk [vmem:[%s1215_s1 + $0xc] ss:$40 sm:$0x3] %vm303_vm13, %v302_v17   ;;  %v316_v18 = vpop.permute.xlu1 %315   ;;  %vm360_vm13 = vcmask 818720  }
  0x8e   :  { %725 = vst.msk [vmem:[%s1215_s1 + $0xc] ss:$40 sm:$0x3] %vm306_vm14, %v302_v17   ;;  %vm1224_vm14 = vmmov %vm1223_vm4 }
  0x8f   :  { %726 = vst.msk [vmem:[%s1215_s1 + $0x15] ss:$40 sm:$0x3] %vm317_vm12, %v316_v18   ;;  %vm336_vm12 = vcmask 818752  }
  0x90   :  { %727 = vst.msk [vmem:[%s1215_s1 + $0x15] ss:$40 sm:$0x3] %vm320_vm15, %v316_v18   ;;  %v332_v19 = vpop.permute.xlu0 %331   ;;  %vm1225_vm15 = vcmask 293888  }
  0x91   :  { %728 = vst.msk [vmem:[%s1215_s1 + $0x46] ss:$-40 sm:$0x3] %vm333_vm11, %v332_v19   ;;  %vm392_vm11 = vcmask 818656  }
  0x92   :  { %v354_v20 = vpop.permute.xlu1 %353   ;;  %729 = vst.msk [vmem:[%s1215_s1 + $0x46] ss:$-40 sm:$0x3] %vm336_vm12, %v332_v19   ;;  %vm518_vm12 = vcmask 818432  }
  0x93   :  { %730 = vst.msk [vmem:[%s1215_s1 + $0x7] ss:$40 sm:$0x3] %vm355_vm10, %v354_v20   ;;  %731 = vst.msk [vmem:[%s1215_s1 - $0x29] ss:$40 sm:$0xc] %vm355_vm10, %v354_v20  }
  0x94   :  { %732 = vst.msk [vmem:[%s1215_s1 + $0x7] ss:$40 sm:$0x3] %vm360_vm13, %v354_v20   ;;  %733 = vst.msk [vmem:[%s1215_s1 - $0x29] ss:$40 sm:$0xc] %vm360_vm13, %v354_v20  }
  0x95   :  { %vm376_vm10 = vcmask 818688   ;;  %v372_v21 = vpop.permute.xlu0 %371   ;;  %vm536_vm13 = vcmask 228352  }
  0x96   :  { %734 = vst.msk [vmem:[%s1215_s1 + $0x10] ss:$40 sm:$0x3] %vm369_vm9, %v372_v21   ;;  %vm432_vm9 = vcmask 818592  }
  0x97   :  { %v388_v22 = vpop.permute.xlu1 %387   ;;  %735 = vst.msk [vmem:[%s1215_s1 + $0x10] ss:$40 sm:$0x3] %vm376_vm10, %v372_v21   ;;  %vm541_vm10 = vcmask 818400  }
  0x98   :  { %736 = vst.msk [vmem:[%s1215_s1 + $0x41] ss:$-40 sm:$0x3] %vm351_vm8, %v388_v22   ;;  %vm416_vm8 = vcmask 818624  }
  0x99   :  { %737 = vst.msk [vmem:[%s1215_s1 + $0x41] ss:$-40 sm:$0x3] %vm392_vm11, %v388_v22   ;;  %vm1226_vm11 = vcmask 261120  }
  0x9b   :  { %v410_v23 = vpop.permute.xlu0 %409   ;;  %v428_v24 = vpop.permute.xlu1 %427  }
  0x9c   :  { %738 = vst.msk [vmem:[%s1215_s1 + $0x2] ss:$40 sm:$0x3] %vm329_vm7, %v410_v23   ;;  %739 = vst.msk [vmem:[%s1215_s1 - $0x2e] ss:$40 sm:$0xc] %vm329_vm7, %v410_v23  }
  0x9d   :  { %740 = vst.msk [vmem:[%s1215_s1 + $0x2] ss:$40 sm:$0x3] %vm416_vm8, %v410_v23   ;;  %741 = vst.msk [vmem:[%s1215_s1 - $0x2e] ss:$40 sm:$0xc] %vm416_vm8, %v410_v23  }
  0x9e   :  { %742 = vst.msk [vmem:[%s1215_s1 + $0xb] ss:$40 sm:$0x3] %vm313_vm6, %v428_v24   ;;  %vm446_vm6 = vcmask 818560   ;;  %vm462_vm7 = vcmask 818528   ;;  %vm554_vm8 = vcmask 195584  }
  0x9f   :  { %743 = vst.msk [vmem:[%s1215_s1 + $0xb] ss:$40 sm:$0x3] %vm432_vm9, %v428_v24   ;;  %v442_v25 = vpop.permute.xlu0 %441   ;;  %v458_v26 = vpop.permute.xlu1 %457   ;;  %vm557_vm9 = vcmask 818368  }
  0xa0   :  { %744 = vst.msk [vmem:[%s1215_s1 + $0x14] ss:$40 sm:$0x3] %vm1221_vm5, %v442_v25   ;;  %vm584_vm5 = vcmask 130048  }
  0xa1   :  { %745 = vst.msk [vmem:[%s1215_s1 + $0x14] ss:$40 sm:$0x3] %vm446_vm6, %v442_v25   ;;  %vm568_vm6 = vcmask 162816  }
  0xa2   :  { %746 = vst.msk [vmem:[%s1215_s1 + $0x45] ss:$-40 sm:$0x3] %vm1222_vm3, %v458_v26   ;;  %vm587_vm3 = vcmask 818304  }
  0xa3   :  { %747 = vst.msk [vmem:[%s1215_s1 + $0x45] ss:$-40 sm:$0x3] %vm462_vm7, %v458_v26   ;;  %v480_v27 = vpop.permute.xlu0 %479   ;;  %v498_v28 = vpop.permute.xlu1 %497   ;;  %vm571_vm7 = vcmask 818336  }
  0xa4   :  { %748 = vst.msk [vmem:[%s1215_s1 + $0x6] ss:$40 sm:$0x3] %vm1223_vm4, %v480_v27   ;;  %vm624_vm4 = vcmask 64512  }
  0xa5   :  { %749 = vst.msk [vmem:[%s1215_s1 - $0x2a] ss:$40 sm:$0xc] %vm1224_vm14, %v480_v27   ;;  %vm627_vm14 = vcmask 818240  }
  0xa6   :  { %750 = vst.msk [vmem:[%s1215_s1 + $0x6] ss:$40 sm:$0x3] %vm486_vm1, %v480_v27   ;;  %751 = vst.msk [vmem:[%s1215_s1 - $0x2a] ss:$40 sm:$0xc] %vm486_vm1, %v480_v27  }
  0xa7   :  { %752 = vst.msk [vmem:[%s1215_s1 + $0xf] ss:$40 sm:$0x3] %vm1225_vm15, %v498_v28   ;;  %v514_v29 = vpop.permute.xlu0 %513   ;;  %v535_v30 = vpop.permute.xlu1 %534   ;;  %vm606_vm1 = vcmask 97280   ;;  %vm638_vm15 = vcmask 31744  }
  0xa8   :  { %753 = vst.msk [vmem:[%s1215_s1 + $0xf] ss:$40 sm:$0x3] %vm502_vm0, %v498_v28   ;;  %vm611_vm0 = vcmask 818272  }
  0xa9   :  { %754 = vst.msk [vmem:[%s1215_s1 + $0x40] ss:$-40 sm:$0x3] %vm1226_vm11, %v514_v29  }
  0xaa   :  { %755 = vst.msk [vmem:[%s1215_s1 + $0x40] ss:$-40 sm:$0x3] %vm518_vm12, %v514_v29   ;;  %vm641_vm12 = vcmask 818208  }
  0xab   :  { %756 = vst.msk [vmem:[%s1215_s1 + $0x1] ss:$40 sm:$0x3] %vm536_vm13, %v535_v30   ;;  %757 = vst.msk [vmem:[%s1215_s1 - $0x2f] ss:$40 sm:$0xc] %vm536_vm13, %v535_v30   ;;  %v553_v31 = vpop.permute.xlu0 %552   ;;  %v567_v32 = vpop.permute.xlu1 %566  }
  0xac   :  { %758 = vst.msk [vmem:[%s1215_s1 + $0x1] ss:$40 sm:$0x3] %vm541_vm10, %v535_v30   ;;  %759 = vst.msk [vmem:[%s1215_s1 - $0x2f] ss:$40 sm:$0xc] %vm541_vm10, %v535_v30  }
  0xad   :  { %760 = vst.msk [vmem:[%s1215_s1 + $0xa] ss:$40 sm:$0x3] %vm554_vm8, %v553_v31  }
  0xae   :  { %761 = vst.msk [vmem:[%s1215_s1 + $0xa] ss:$40 sm:$0x3] %vm557_vm9, %v553_v31  }
  0xaf   :  { %762 = vst.msk [vmem:[%s1215_s1 + $0x13] ss:$40 sm:$0x3] %vm568_vm6, %v567_v32   ;;  %v583_v33 = vpop.permute.xlu0 %582   ;;  %v605_v34 = vpop.permute.xlu1 %604  }
  0xb0   :  { %763 = vst.msk [vmem:[%s1215_s1 + $0x13] ss:$40 sm:$0x3] %vm571_vm7, %v567_v32  }
  0xb1   :  { %764 = vst.msk [vmem:[%s1215_s1 + $0x44] ss:$-40 sm:$0x3] %vm584_vm5, %v583_v33  }
  0xb2   :  { %765 = vst.msk [vmem:[%s1215_s1 + $0x44] ss:$-40 sm:$0x3] %vm587_vm3, %v583_v33  }
  0xb3   :  { %766 = vst.msk [vmem:[%s1215_s1 + $0x5] ss:$40 sm:$0x3] %vm606_vm1, %v605_v34   ;;  %767 = vst.msk [vmem:[%s1215_s1 - $0x2b] ss:$40 sm:$0xc] %vm606_vm1, %v605_v34   ;;  %v623_v35 = vpop.permute.xlu0 %622   ;;  %v637_v36 = vpop.permute.xlu1 %636  }
  0xb4   :  { %768 = vst.msk [vmem:[%s1215_s1 + $0x5] ss:$40 sm:$0x3] %vm611_vm0, %v605_v34   ;;  %769 = vst.msk [vmem:[%s1215_s1 - $0x2b] ss:$40 sm:$0xc] %vm611_vm0, %v605_v34  }
  0xb5   :  { %770 = vst.msk [vmem:[%s1215_s1 + $0xe] ss:$40 sm:$0x3] %vm624_vm4, %v623_v35  }
  0xb6   :  { %771 = vst.msk [vmem:[%s1215_s1 + $0xe] ss:$40 sm:$0x3] %vm627_vm14, %v623_v35  }
  0xb7   :  { %772 = vst.msk [vmem:[%s1215_s1 + $0x17] ss:$40 sm:$0x3] %vm638_vm15, %v637_v36   ;;  %v186_v37 = vpop.permute.xlu0 %185   ;;  %v197_v38 = vpop.permute.xlu1 %196  }
  0xb8   :  { %773 = vst.msk [vmem:[%s1215_s1 + $0x17] ss:$40 sm:$0x3] %vm641_vm12, %v637_v36  }
  0xb9   :  { %708 = vst.msk [vmem:[%s1215_s1 + $0x43] ss:$-40 sm:$0x3] %vm161_vm2, %v186_v37   ;;  %709 = vst.msk [vmem:[%s1215_s1 + $0x4] ss:$40 sm:$0x3] %vm161_vm2, %v197_v38  }
  0xba   :  { %710 = vst.msk [vmem:[%s1215_s1 - $0x2c] ss:$40 sm:$0xc] %vm161_vm2, %v197_v38  }
  0xbb   :  { %v206_v39 = vpop.permute.xlu0 %205   ;;  %v213_v40 = vpop.permute.xlu1 %212  }
  0xbc   :  { %711 = vst.msk [vmem:[%s1215_s1 + $0xd] ss:$40 sm:$0x3] %vm161_vm2, %v206_v39   ;;  %712 = vst.msk [vmem:[%s1215_s1 + $0x16] ss:$40 sm:$0x3] %vm161_vm2, %v213_v40  }
  0xbf   :  { %v221_v41 = vpop.permute.xlu0 %220  }
  0xc0   :  { %713 = vst.msk [vmem:[%s1215_s1 + $0x47] ss:$-40 sm:$0x3] %vm161_vm2, %v221_v41  }

// kernel: csednn_forward.1
= control target key start
LH: loop header
LB: loop body
LE: loop exit
PB: predicated region body
PF: predicated region fallthrough
CT: control target
= control target key end

     0   :  { %9 = vsyncpa [#allocation3], 0  ;;  %s5358_s0 = inlined_call_operand.vmem [shape: f32[2,40,128], index: 0, kind: input, shape index: {}]   ;;  %s5359_s1 = inlined_call_operand.vmem [shape: f32[2,32,256], index: 1, kind: input, shape index: {}]   ;;  %s5360_s2 = inlined_call_operand.vmem [shape: f32[1160,128], index: 2, kind: input, shape index: {}]   ;;  %s5361_s3 = inlined_call_operand.vmem [shape: f32[424,512], index: 3, kind: input, shape index: {}]   ;;  %s5362_s4 = inlined_call_operand.hbm [shape: f32[2,1,2], index: 4, kind: output, shape index: {}]  }
   0x1   :  { %11 = vsyncpa [#allocation3 + $0x1], 0  ;;  %s4027_s15 = smov 0   ;;  %s4029_s16 = smov 0  }
   0x2   :  { %s4031_s17 = smov 0   ;;  %s4033_s18 = smov 0  }
   0x3 LB: > { %s4048_s19 = sadd.s32 4294967295, %s3996_s18   ;;  %s2862_s20 = sadd.s32 4294967294, %s3996_s18   ;;  %s3996_s18 = sphi %s4033_s18, %s5368_s18   ;;  %s3992_s17 = sphi %s4031_s17, %s5367_s17   ;;  %s3988_s16 = sphi %s4029_s16, %s5366_s16   ;;  %s3984_s15 = sphi %s4027_s15, %s5365_s15  }
   0x4   : > { %s4052_s21 = sadd.s32 1, %s3996_s18   ;;  %s118_s22 = sadd.s32 1, %s3992_s17 }
   0x5   : > { %s115_s23 = ssub.s32 %s3996_s18, %s4052_s21  ;;  %p128_p0 = scmp.ne.s32.totalorder %s3992_s17, %s3988_s16 }
   0x6   : > { %p116_p1 = scmp.eq.s32.totalorder %s115_s23, 0  ;;  %p129_p2 = scmp.eq.s32.totalorder %s4048_s19, 1 }
   0x7   : > { %p134_p3 = scmp.ne.s32.totalorder %s3988_s16, %s3984_s15  ;;  %p135_p4 = scmp.eq.s32.totalorder %s2862_s20, 1 }
   0x8   : > { %s4063_s24 = scalar_select %p116_p1, %s3992_s17, %s118_s22  }
   0x9   : > { %p4065_p5 = por %p129_p2, %p128_p0  ;;  %p4069_p6 = por %p135_p4, %p134_p3 }
   0xa   : > { %p2865_p7 = scmp.ge.s32.totalorder %s3996_s18, 1  ;;  %p175_p8 = scmp.lt.s32.totalorder %s3996_s18, 3 }
   0xc   : > { %p176_p9 = pnand %p2865_p7, %p175_p8 }
   0xd   : > { %v220_v0 = vld [vmem:[%s5360_s2] sm:$0xff] (!%p176_p9)  ;;  %v221_v1 = vld [vmem:[%s5360_s2 + $0x8] sm:$0xff] (!%p176_p9)  ;;  %v222_v2 = vld [vmem:[%s5360_s2 + $0x10] sm:$0xff] (!%p176_p9)  ;;  %v3998_v3 = vmov (!%p176_p9), 0.0|0.0   ;;  %vm3999_vm0 = vmmov (!%p176_p9), 0   ;;  %v4000_v6 = vmov (!%p176_p9), 0.0  }
   0xe   : > { %179 = sbr.rel (%p176_p9) target bundleno = 3823 (0xeef), region = 36  ;;  %3454 = vmatprep.subr.bf16.mxu0 (!%p176_p9), %v3998_v3  ;;  %v3455_v4 = vpack.c.bf16 (!%p176_p9), %v221_v1, %v220_v0  ;;  %v223_v5 = vld [vmem:[%s5360_s2 + $0x18] sm:$0xff] (!%p176_p9)  ;;  %3181 = vmatprep.mubr.msk.f32.mxu0 (!%p176_p9), %vm3999_vm0, %v4000_v6  ;;  %v224_v8 = vld [vmem:[%s5360_s2 + $0x20] sm:$0xff] (!%p176_p9)  ;;  %v225_v9 = vld [vmem:[%s5360_s2 + $0x28] sm:$0xff] (!%p176_p9)  ;;  %p205_p10 = scmp.lt.s32.totalorder (!%p176_p9), %s4048_s19, 1  ;;  %vm702_vm1 = vcmask (!%p176_p9), 64512  }
   0xf   : > { %v3458_v7 = vpack.c.bf16 (!%p176_p9), %v223_v5, %v222_v2  ;;  %v355_v10 = vld [vmem:[%s5360_s2 + $0x100] sm:$0xff] (!%p176_p9)  ;;  %v356_v11 = vld [vmem:[%s5360_s2 + $0x108] sm:$0xff] (!%p176_p9)  ;;  %v3461_v15 = vpack.c.bf16 (!%p176_p9), %v225_v9, %v224_v8  ;;  %v226_v16 = vld [vmem:[%s5360_s2 + $0x30] sm:$0xff] (!%p176_p9)  ;;  %vm1274_vm6 = vcmask (!%p176_p9), 261120   ;;  %vm1381_vm7 = vcmask (!%p176_p9), 326656   ;;  %s203_s22 = sand.u32 (!%p176_p9), 1, %s3988_s16  }
  0x10   : > { %3456 = vmatpush3.bf16.msra.mxu0 (!%p176_p9), %v3455_v4  ;;  %v3478_v12 = vpack.c.bf16 (!%p176_p9), %v356_v11, %v355_v10  ;;  %v339_v13 = vld [vmem:[%s5360_s2 + $0x80] sm:$0xff] (!%p176_p9)  ;;  %v340_v14 = vld [vmem:[%s5360_s2 + $0x88] sm:$0xff] (!%p176_p9)  ;;  %v227_v18 = vld [vmem:[%s5360_s2 + $0x38] sm:$0xff] (!%p176_p9)  ;;  %vm2694_vm8 = vcmask (!%p176_p9), 130048   ;;  %s2907_s27 = sshll.u32 (!%p176_p9), %s4048_s19, 4  ;;  %s204_s30 = scalar_lea.vmem (!%p176_p9), [#allocation2], %s203_s22 }
  0x11   : > { %3457 = vmatprep.subr.bf16.mxu0 (!%p176_p9), %v3998_v3  ;;  %v3480_v17 = vpack.c.bf16 (!%p176_p9), %v340_v14, %v339_v13  ;;  %v357_v19 = vld [vmem:[%s5360_s2 + $0x110] sm:$0xff] (!%p176_p9)  ;;  %v358_v20 = vld [vmem:[%s5360_s2 + $0x118] sm:$0xff] (!%p176_p9)  ;;  %v3464_v25 = vpack.c.bf16 (!%p176_p9), %v227_v18, %v226_v16  ;;  %v228_v26 = vld [vmem:[%s5360_s2 + $0x40] sm:$0xff] (!%p176_p9)  ;;  %s2795_s8 = sshll.u32 (!%p176_p9), %s204_s30, 4  ;;  %vm2780_vm9 = vcmask (!%p176_p9), 8192   ;;  %s5316_s11 = scalar_lea.hbm (!%p176_p9), %s5362_s4, %s2907_s27  ;;  %s5318_s8 = int_to_ptr.vmem [resolvable:$true] %s2795_s8 }
  0x12   : > { %3479 = vmatprep.subr.bf16.mxu1 (!%p176_p9), %v3478_v12  ;;  %v3482_v21 = vpack.c.bf16 (!%p176_p9), %v358_v20, %v357_v19  ;;  %v341_v22 = vld [vmem:[%s5360_s2 + $0x90] sm:$0xff] (!%p176_p9)  ;;  %v342_v23 = vld [vmem:[%s5360_s2 + $0x98] sm:$0xff] (!%p176_p9)  ;;  %v359_v27 = vld [vmem:[%s5360_s2 + $0x120] sm:$0xff] (!%p176_p9)  ;;  %s2783_s12 = scalar_lea.sflag (!%p176_p9), [#allocation3], %s203_s22 }
  0x13   : > { %3481 = vmatpush3.bf16.msra.mxu1 (!%p176_p9), %v3480_v17  ;;  %v3484_v24 = vpack.c.bf16 (!%p176_p9), %v342_v23, %v341_v22  ;;  %v360_v28 = vld [vmem:[%s5360_s2 + $0x128] sm:$0xff] (!%p176_p9)  ;;  %v343_v31 = vld [vmem:[%s5360_s2 + $0xa0] sm:$0xff] (!%p176_p9)  ;;  %v361_v34 = vld [vmem:[%s5360_s2 + $0x130] sm:$0xff] (!%p176_p9) }
  0x14   : > { %3459 = vmatpush3.bf16.msra.mxu0 (!%p176_p9), %v3458_v7  ;;  %3483 = vmatprep.subr.bf16.mxu1 (!%p176_p9), %v3482_v21  ;;  %v229_v29 = vld [vmem:[%s5360_s2 + $0x48] sm:$0xff] (!%p176_p9)  ;;  %v3486_v30 = vpack.c.bf16 (!%p176_p9), %v360_v28, %v359_v27  ;;  %v362_v35 = vld [vmem:[%s5360_s2 + $0x138] sm:$0xff] (!%p176_p9)  ;;  %v345_v36 = vld [vmem:[%s5360_s2 + $0xb0] sm:$0xff] (!%p176_p9) }
  0x15   : > { %3460 = vmatprep.subr.bf16.mxu0 %v3998_v3  ;;  %v344_v32 = vld [vmem:[%s5360_s2 + $0xa8] sm:$0xff]  ;;  %v3467_v37 = vpack.c.bf16 %v229_v29, %v228_v26  ;;  %v3490_v38 = vpack.c.bf16 %v362_v35, %v361_v34  ;;  %v346_v39 = vld [vmem:[%s5360_s2 + $0xb8] sm:$0xff]  ;;  %v230_v40 = vld [vmem:[%s5360_s2 + $0x50] sm:$0xff]  ;;  %s4192_s29 = scalar_select %p205_p10, %s4048_s19, 1 }
  0x16   : > { %v3488_v33 = vpack.c.bf16 %v344_v32, %v343_v31  ;;  %v231_v41 = vld [vmem:[%s5360_s2 + $0x58] sm:$0xff]  ;;  %v363_v42 = vld [vmem:[%s5360_s2 + $0x140] sm:$0xff]  ;;  %v3492_v43 = vpack.c.bf16 %v346_v39, %v345_v36  ;;  %v364_v44 = vld [vmem:[%s5360_s2 + $0x148] sm:$0xff]  ;;  %s4001_s19 = smov [#allocation2]  }
  0x17   : > { %3485 = vmatpush3.bf16.msra.mxu1 %v3484_v24  ;;  %v3494_v45 = vpack.c.bf16 %v364_v44, %v363_v42  ;;  %v347_v46 = vld [vmem:[%s5360_s2 + $0xc0] sm:$0xff]  ;;  %v348_v47 = vld [vmem:[%s5360_s2 + $0xc8] sm:$0xff]  ;;  %v3470_v48 = vpack.c.bf16 %v231_v41, %v230_v40  ;;  %v365_v49 = vld [vmem:[%s5360_s2 + $0x150] sm:$0xff]  ;;  %s2910_s6 = sshll.u32 %s4192_s29, 6  ;;  %s3835_s28 = smul.u32 40, %s4192_s29 }
  0x18   : > { %3462 = vmatpush3.bf16.msra.mxu0 %v3461_v15  ;;  %3487 = vmatprep.subr.bf16.mxu1 %v3486_v30  ;;  %v232_v50 = vld [vmem:[%s5360_s2 + $0x60] sm:$0xff]  ;;  %v233_v51 = vld [vmem:[%s5360_s2 + $0x68] sm:$0xff]  ;;  %v366_v52 = vld [vmem:[%s5360_s2 + $0x158] sm:$0xff]  ;;  %v3496_v53 = vpack.c.bf16 %v348_v47, %v347_v46  ;;  %s4221_s7 = scalar_lea.vmem %s5359_s1, %s2910_s6  ;;  %s3934_s29 = scalar_lea.vmem %s5318_s8, 16 }
  0x19   : > { %3463 = vmatprep.subr.bf16.mxu0 %v3998_v3  ;;  %v3498_v54 = vpack.c.bf16 %v366_v52, %v365_v49  ;;  %v349_v55 = vld [vmem:[%s5360_s2 + $0xd0] sm:$0xff]  ;;  %v350_v56 = vld [vmem:[%s5360_s2 + $0xd8] sm:$0xff]  ;;  %v3473_v57 = vpack.c.bf16 %v233_v51, %v232_v50  ;;  %v367_v58 = vld [vmem:[%s5360_s2 + $0x160] sm:$0xff]  ;;  %s4245_s5 = scalar_lea.vmem %s5358_s0, %s3835_s28  ;;  %p3935_p11 = scmp.ne.s32.totalorder %s5318_s8, %s3934_s29 }
  0x1a   : > { %v368_v59 = vld [vmem:[%s5360_s2 + $0x168] sm:$0xff]  ;;  %v234_v60 = vld [vmem:[%s5360_s2 + $0x70] sm:$0xff]  ;;  %v235_v61 = vld [vmem:[%s5360_s2 + $0x78] sm:$0xff]  ;;  %v3500_v0 = vpack.c.bf16 %v350_v56, %v349_v55  ;;  %s3938_s13 = sshll.u32 %s4001_s19, 4  ;;  %s3939_s13 = int_to_ptr.vmem [resolvable:$false] %s3938_s13 }
  0x1b   : > { %3489 = vmatpush3.bf16.msra.mxu1 %v3488_v33  ;;  %v472_v62 = vld [vmem:[%s5360_s2 + $0x200] sm:$0xff]  ;;  %v473_v63 = vld [vmem:[%s5360_s2 + $0x208] sm:$0xff]  ;;  %v3502_v1 = vpack.c.bf16 %v368_v59, %v367_v58  ;;  %v3476_v5 = vpack.c.bf16 %v235_v61, %v234_v60  ;;  %v369_v7 = vld [vmem:[%s5360_s2 + $0x170] sm:$0xff]  ;;  %p3936_p12 = pnand %p3935_p11, %p4065_p5  ;;  %p3941_p0 = scmp.lt.s32.totalorder %s5318_s8, %s3939_s13 }
  0x1c   : > { %3465 = vmatpush3.bf16.msra.mxu0 %v3464_v25  ;;  %3491 = vmatprep.subr.bf16.mxu1 %v3490_v38  ;;  %v351_v2 = vld [vmem:[%s5360_s2 + $0xe0] sm:$0xff]  ;;  %v352_v4 = vld [vmem:[%s5360_s2 + $0xe8] sm:$0xff]  ;;  %v370_v8 = vld [vmem:[%s5360_s2 + $0x178] sm:$0xff]  ;;  %v3510_v9 = vpack.c.bf16 %v473_v63, %v472_v62 }
  0x1d   : > { %3466 = vmatprep.subr.bf16.mxu0 %v3998_v3  ;;  %v456_v10 = vld [vmem:[%s5360_s2 + $0x180] sm:$0xff]  ;;  %v457_v11 = vld [vmem:[%s5360_s2 + $0x188] sm:$0xff]  ;;  %v474_v13 = vld [vmem:[%s5360_s2 + $0x210] sm:$0xff]  ;;  %v3504_v15 = vpack.c.bf16 %v352_v4, %v351_v2  ;;  %v3506_v16 = vpack.c.bf16 %v370_v8, %v369_v7  ;;  %p3937_p13 = pneg %p3936_p12 }
  0x1e   : > { %v4254_v12 = vld [vmem:[%s4221_s7 + $0x8] sm:$0xff]  ;;  %v475_v14 = vld [vmem:[%s5360_s2 + $0x218] sm:$0xff]  ;;  %v353_v17 = vld [vmem:[%s5360_s2 + $0xf0] sm:$0xff]  ;;  %v3512_v20 = vpack.c.bf16 %v457_v11, %v456_v10 }
  0x1f   : > { %3493 = vmatpush3.bf16.msra.mxu1 %v3492_v43  ;;  %435 = vmatprep.mubr.f32.mxu1 %v4254_v12  ;;  %v354_v18 = vld [vmem:[%s5360_s2 + $0xf8] sm:$0xff]  ;;  %v215_v19 = vld [vmem:[%s4245_s5] sm:$0xff]  ;;  %v3514_v21 = vpack.c.bf16 %v475_v14, %v474_v13  ;;  %v458_v22 = vld [vmem:[%s5360_s2 + $0x190] sm:$0xff] }
  0x20   : > { %3468 = vmatpush3.bf16.msra.mxu0 %v3467_v37  ;;  %3495 = vmatprep.subr.bf16.mxu1 %v3494_v45  ;;  %v459_v23 = vld [vmem:[%s5360_s2 + $0x198] sm:$0xff]  ;;  %v476_v24 = vld [vmem:[%s5360_s2 + $0x220] sm:$0xff]  ;;  %v477_v25 = vld [vmem:[%s5360_s2 + $0x228] sm:$0xff]  ;;  %v3508_v26 = vpack.c.bf16 %v354_v18, %v353_v17 }
  0x21   : > { %3469 = vmatprep.subr.bf16.mxu0 %v3998_v3  ;;  %v216_v27 = vld [vmem:[%s4245_s5 + $0x8] sm:$0xff]  ;;  %v3516_v28 = vpack.c.bf16 %v459_v23, %v458_v22  ;;  %v3518_v29 = vpack.c.bf16 %v477_v25, %v476_v24  ;;  %v460_v30 = vld [vmem:[%s5360_s2 + $0x1a0] sm:$0xff]  ;;  %v478_v32 = vld [vmem:[%s5360_s2 + $0x230] sm:$0xff] }
  0x22   : > { %v461_v31 = vld [vmem:[%s5360_s2 + $0x1a8] sm:$0xff]  ;;  %v479_v33 = vld [vmem:[%s5360_s2 + $0x238] sm:$0xff]  ;;  %v4298_v34 = vld [vmem:[%s4221_s7] sm:$0xff] }
  0x23   : > { %3497 = vmatpush3.bf16.msra.mxu1 %v3496_v53  ;;  %v4301_v35 = vld [vmem:[%s4221_s7 + $0x18] sm:$0xff]  ;;  %v3520_v36 = vpack.c.bf16 %v461_v31, %v460_v30  ;;  %v217_v37 = vld [vmem:[%s4245_s5 + $0x10] sm:$0xff]  ;;  %v3522_v38 = vpack.c.bf16 %v479_v33, %v478_v32  ;;  %v480_v41 = vld [vmem:[%s5360_s2 + $0x240] sm:$0xff] }
  0x24   : > { %3471 = vmatpush3.bf16.msra.mxu0 %v3470_v48  ;;  %3499 = vmatprep.subr.bf16.mxu1 %v3498_v54  ;;  %v462_v39 = vld [vmem:[%s5360_s2 + $0x1b0] sm:$0xff]  ;;  %v463_v40 = vld [vmem:[%s5360_s2 + $0x1b8] sm:$0xff]  ;;  %v481_v42 = vld [vmem:[%s5360_s2 + $0x248] sm:$0xff] }
  0x25   : > { %3472 = vmatprep.subr.bf16.mxu0 %v3998_v3  ;;  %v333_v43 = vld [vmem:[%s4221_s7 + $0x10] sm:$0xff]  ;;  %v336_v44 = vld [vmem:[%s4221_s7 + $0x28] sm:$0xff]  ;;  %v3524_v45 = vpack.c.bf16 %v463_v40, %v462_v39  ;;  %v218_v46 = vld [vmem:[%s4245_s5 + $0x18] sm:$0xff]  ;;  %v3526_v47 = vpack.c.bf16 %v481_v42, %v480_v41 }
  0x26   : > { %v464_v48 = vld [vmem:[%s5360_s2 + $0x1c0] sm:$0xff]  ;;  %v465_v49 = vld [vmem:[%s5360_s2 + $0x1c8] sm:$0xff]  ;;  %v482_v50 = vld [vmem:[%s5360_s2 + $0x250] sm:$0xff] }
  0x27   : > { %3501 = vmatpush3.bf16.msra.mxu1 %v3500_v0  ;;  %v483_v51 = vld [vmem:[%s5360_s2 + $0x258] sm:$0xff]  ;;  %v335_v52 = vld [vmem:[%s4221_s7 + $0x20] sm:$0xff]  ;;  %v3528_v54 = vpack.c.bf16 %v465_v49, %v464_v48  ;;  %v485_v60 = vld [vmem:[%s5360_s2 + $0x268] sm:$0xff] }
  0x28   : > { %3474 = vmatpush3.bf16.msra.mxu0 %v3473_v57  ;;  %3503 = vmatprep.subr.bf16.mxu1 %v3502_v1  ;;  %v338_v53 = vld [vmem:[%s4221_s7 + $0x38] sm:$0xff]  ;;  %v219_v55 = vld [vmem:[%s4245_s5 + $0x20] sm:$0xff]  ;;  %v3530_v56 = vpack.c.bf16 %v483_v51, %v482_v50  ;;  %v466_v57 = vld [vmem:[%s5360_s2 + $0x1d0] sm:$0xff]  ;;  %s3940_s5 = scalar_lea.vmem %s3939_s13, 32 }
  0x29   : > { %3475 = vmatprep.subr.bf16.mxu0 %v3998_v3  ;;  %v467_v58 = vld [vmem:[%s5360_s2 + $0x1d8] sm:$0xff]  ;;  %v484_v59 = vld [vmem:[%s5360_s2 + $0x260] sm:$0xff]  ;;  %v337_v61 = vld [vmem:[%s4221_s7 + $0x30] sm:$0xff]  ;;  %p3942_p1 = scmp.lt.s32.totalorder %s3940_s5, %s3934_s29 }
  0x2a   : > { %v3532_v62 = vpack.c.bf16 %v467_v58, %v466_v57  ;;  %v3534_v63 = vpack.c.bf16 %v485_v60, %v484_v59  ;;  %v468_v0 = vld [vmem:[%s5360_s2 + $0x1e0] sm:$0xff]  ;;  %v469_v1 = vld [vmem:[%s5360_s2 + $0x1e8] sm:$0xff]  ;;  %v486_v2 = vld [vmem:[%s5360_s2 + $0x270] sm:$0xff] }
  0x2b   : > { %3505 = vmatpush3.bf16.msra.mxu1 %v3504_v15  ;;  %v487_v4 = vld [vmem:[%s5360_s2 + $0x278] sm:$0xff]  ;;  %v470_v8 = vld [vmem:[%s5360_s2 + $0x1f0] sm:$0xff]  ;;  %v585_v11 = vld [vmem:[%s5360_s2 + $0x280] sm:$0xff]  ;;  %p3943_p2 = por %p3942_p1, %p3941_p0 }
  0x2c   : > { %3477 = vmatpush3.bf16.msra.mxu0 %v3476_v5  ;;  %3507 = vmatprep.subr.bf16.mxu1 %v3506_v16  ;;  %v3536_v5 = vpack.c.bf16 %v469_v1, %v468_v0  ;;  %v3538_v7 = vpack.c.bf16 %v487_v4, %v486_v2  ;;  %v587_v13 = vld [vmem:[%s5360_s2 + $0x290] sm:$0xff]  ;;  %v588_v15 = vld [vmem:[%s5360_s2 + $0x298] sm:$0xff]  ;;  %v589_v17 = vld [vmem:[%s5360_s2 + $0x2a0] sm:$0xff] }
  0x2d   : > { %3511 = vmatprep.subr.bf16.mxu0 %v3510_v9  ;;  %v471_v9 = vld [vmem:[%s5360_s2 + $0x1f8] sm:$0xff]  ;;  %v3546_v16 = vpack.c.bf16 %v588_v15, %v587_v13  ;;  %v590_v18 = vld [vmem:[%s5360_s2 + $0x2a8] sm:$0xff]  ;;  %v593_v23 = vld [vmem:[%s5360_s2 + $0x2c0] sm:$0xff]  ;;  %p3944_p3 = pnand %p3943_p2, %p3937_p13 }
  0x2e   : > { %v3540_v10 = vpack.c.bf16 %v471_v9, %v470_v8  ;;  %v594_v24 = vld [vmem:[%s5360_s2 + $0x2c8] sm:$0xff]  ;;  %v599_v32 = vld [vmem:[%s5360_s2 + $0x2f0] sm:$0xff]  ;;  %v600_v33 = vld [vmem:[%s5360_s2 + $0x2f8] sm:$0xff] }
  0x2f   : > { %3182 = vmatmul.mubr.f32.vlgmr.msra.gmra.mrb[0].mxu0 %v215_v19  ;;  %3509 = vmatpush3.bf16.msra.mxu1 %v3508_v26  ;;  %v591_v19 = vld [vmem:[%s5360_s2 + $0x2b0] sm:$0xff]  ;;  %v3558_v25 = vpack.c.bf16 %v594_v24, %v593_v23  ;;  %v598_v30 = vld [vmem:[%s5360_s2 + $0x2e8] sm:$0xff] }
  0x30   : > { %3513 = vmatpush3.bf16.msra.mxu0 %v3512_v20  ;;  %3184 = vmatprep.mubr.msk.f32.mxu0 %vm3999_vm0, %v4000_v6  ;;  %v3550_v20 = vpack.c.bf16 %v590_v18, %v589_v17  ;;  %v595_v26 = vld [vmem:[%s5360_s2 + $0x2d0] sm:$0xff] }
  0x31   : > { %3515 = vmatprep.subr.bf16.mxu0 %v3514_v21  ;;  %v592_v21 = vld [vmem:[%s5360_s2 + $0x2b8] sm:$0xff] }
  0x32   : > { %436 = vmatmul.mubr.f32.vlgmr.msra.gmra.mrb[0].mxu1 %v4298_v34  ;;  %v3554_v22 = vpack.c.bf16 %v592_v21, %v591_v19 }
  0x33   : > { %3185 = vmatmul.mubr.f32.gmra.mrb[2].mxu0 %v216_v27  ;;  %440 = vmatprep.mubr.f32.mxu1 %v4301_v35  ;;  %v596_v27 = vld [vmem:[%s5360_s2 + $0x2d8] sm:$0xff] }
  0x34   : > { %3517 = vmatpush3.bf16.msra.mxu0 %v3516_v28  ;;  %3187 = vmatprep.mubr.msk.f32.mxu0 %vm3999_vm0, %v4000_v6  ;;  %v3562_v28 = vpack.c.bf16 %v596_v27, %v595_v26  ;;  %v700_v26 = vld [vmem:[%s5361_s3 + $0x8] sm:$0xff]  ;;  %v699_v27 = vld [vmem:[%s5361_s3] sm:$0xff] }
  0x35   : > { %3519 = vmatprep.subr.bf16.mxu0 %v3518_v29  ;;  %v597_v29 = vld [vmem:[%s5360_s2 + $0x2e0] sm:$0xff] }
  0x36   : > { %441 = vmatmul.mubr.f32.gmra.mrb[2].mxu1 %v333_v43  ;;  %v3566_v31 = vpack.c.bf16 %v598_v30, %v597_v29 }
  0x37   : > { %3188 = vmatmul.mubr.f32.gmra.mrb[4].mxu0 %v217_v37  ;;  %445 = vmatprep.mubr.f32.mxu1 %v336_v44  ;;  %v4427_v37 = vld [vmem:[%s5360_s2 + $0x430] ss:$0 sm:$0xff] }
  0x38   : > { %3521 = vmatpush3.bf16.msra.mxu0 %v3520_v36  ;;  %3190 = vmatprep.mubr.msk.f32.mxu0 %vm3999_vm0, %v4000_v6 }
  0x39   : > { %3523 = vmatprep.subr.bf16.mxu0 %v3522_v38 }
  0x3a   : > { %446 = vmatmul.mubr.f32.gmra.mrb[4].mxu1 %v335_v52 }
  0x3b   : > { %3191 = vmatmul.mubr.f32.gmra.mrb[6].mxu0 %v218_v46  ;;  %450 = vmatprep.mubr.f32.mxu1 %v338_v53 }
  0x3c   : > { %3525 = vmatpush3.bf16.msra.mxu0 %v3524_v45  ;;  %3193 = vmatprep.mubr.msk.f32.mxu0 %vm3999_vm0, %v4000_v6 }
  0x3d   : > { %3527 = vmatprep.subr.bf16.mxu0 %v3526_v47 }
  0x3e   : > { %451 = vmatmul.mubr.f32.gmra.mrb[6].mxu1 %v337_v61 }
  0x3f   : > { %3194 = vmatmul.mubr.f32.gmra.mrb[8].mxu0 %v219_v55 }
  0x40   : > { %3529 = vmatpush3.bf16.msra.mxu0 %v3528_v54  ;;  %552 = vmatprep.mubr.f32.mxu0 %v4254_v12  ;;  %v586_v12 = vld [vmem:[%s5360_s2 + $0x288] sm:$0xff] }
  0x41   : > { %3531 = vmatprep.subr.bf16.mxu0 %v3530_v56  ;;  %v3542_v14 = vpack.c.bf16 %v586_v12, %v585_v11 }
  0x43   : > { %3543 = vmatprep.subr.bf16.mxu1 %v3542_v14 }
  0x44   : > { %3533 = vmatpush3.bf16.msra.mxu0 %v3532_v62  ;;  %3545 = vmatpush3.bf16.msra.mxu1 %v3542_v14 }
  0x45   : > { %3535 = vmatprep.subr.bf16.mxu0 %v3534_v63  ;;  %3547 = vmatprep.subr.bf16.mxu1 %v3546_v16 }
  0x48   : > { %3537 = vmatpush3.bf16.msra.mxu0 %v3536_v5  ;;  %3549 = vmatpush3.bf16.msra.mxu1 %v3546_v16 }
  0x49   : > { %3539 = vmatprep.subr.bf16.mxu0 %v3538_v7  ;;  %3551 = vmatprep.subr.bf16.mxu1 %v3550_v20 }
  0x4c   : > { %3541 = vmatpush3.bf16.msra.mxu0 %v3540_v10  ;;  %3553 = vmatpush3.bf16.msra.mxu1 %v3550_v20 }
  0x4d   : > { %3555 = vmatprep.subr.bf16.mxu1 %v3554_v22 }
  0x4f   : > { %553 = vmatmul.mubr.f32.vlgmr.msra.gmra.mrb[10].mxu0 %v4298_v34  ;;  %v3570_v34 = vpack.c.bf16 %v600_v33, %v599_v32 }
  0x50   : > { %557 = vmatprep.mubr.f32.mxu0 %v4301_v35  ;;  %3557 = vmatpush3.bf16.msra.mxu1 %v3554_v22 }
  0x51   : > { %3559 = vmatprep.subr.bf16.mxu1 %v3558_v25 }
  0x53   : > { %558 = vmatmul.mubr.f32.gmra.mrb[12].mxu0 %v333_v43 }
  0x54   : > { %562 = vmatprep.mubr.f32.mxu0 %v336_v44  ;;  %3561 = vmatpush3.bf16.msra.mxu1 %v3558_v25 }
  0x55   : > { %3563 = vmatprep.subr.bf16.mxu1 %v3562_v28 }
  0x57   : > { %563 = vmatmul.mubr.f32.gmra.mrb[14].mxu0 %v335_v52 }
  0x58   : > { %567 = vmatprep.mubr.f32.mxu0 %v338_v53  ;;  %3565 = vmatpush3.bf16.msra.mxu1 %v3562_v28  ;;  %v701_v28 = vld [vmem:[%s5361_s3 + $0x10] sm:$0xff] }
  0x59   : > { %3567 = vmatprep.subr.bf16.mxu1 %v3566_v31  ;;  %3234 = vmatprep.subr.mxu0 %v701_v28 }
  0x5a   : > { %3235 = vmatpush3.msra.mxu0 %v701_v28  ;;  %v1001_v28 = vld [vmem:[%s5361_s3 + $0x148] sm:$0xff] }
  0x5b   : > { %568 = vmatmul.mubr.f32.gmra.mrb[16].mxu0 %v337_v61 }
  0x5c   : > { %3569 = vmatpush3.bf16.msra.mxu1 %v3566_v31 }
  0x5d   : > { %3571 = vmatprep.subr.bf16.mxu1 %v3570_v34 }
  0x60   : > { %3573 = vmatpush3.bf16.msra.mxu1 %v3570_v34 }
  0x61   : > { %715 = vmatprep.subr.mxu1 %v700_v26 }
 0x102   : > { %v307_v35 = vpop.f32.mrb[0].mxu0 }
 0x103   : > { %v3183_v36 = vpop.f32.mrb[1].mxu0  ;;  %v4430_v39 = vadd.f32 %v4427_v37, %v307_v35 }
 0x105   : > { %v2964_v42 = vpop.f32.mrb[0].mxu1 }
 0x106   : > { %v312_v38 = vpop.f32.mrb[2].mxu0  ;;  %v2965_v44 = vpop.f32.mrb[1].mxu1 }
 0x107   : > { %v4433_v40 = vadd.f32 %v4427_v37, %v312_v38  ;;  %v3186_v41 = vpop.f32.mrb[3].mxu0  ;;  %v2966_v46 = vadd.f32 %v2965_v44, %v2964_v42 }
 0x109   : > { %v3645_v43 = vpack.c.bf16 %v4433_v40, %v4430_v39  ;;  %v2967_v48 = vpop.f32.mrb[2].mxu1  ;;  %v573_v2 = vmul.f32 %v2966_v46, %v2966_v46 }
 0x10a   : > { %v317_v45 = vpop.f32.mrb[4].mxu0  ;;  %v2968_v50 = vpop.f32.mrb[3].mxu1 }
 0x10b   : > { %v3189_v47 = vpop.f32.mrb[5].mxu0  ;;  %v4438_v49 = vadd.f32 %v4427_v37, %v317_v45  ;;  %v2969_v52 = vadd.f32 %v2968_v50, %v2967_v48  ;;  %v974_v50 = vld [vmem:[%s5361_s3 + $0x28] sm:$0xff] }
 0x10d   : > { %v2970_v55 = vpop.f32.mrb[4].mxu1  ;;  %v574_v10 = vmul.f32 %v2969_v52, %v2969_v52 }
 0x10e   : > { %v322_v51 = vpop.f32.mrb[6].mxu0  ;;  %v2971_v57 = vpop.f32.mrb[5].mxu1 }
 0x10f   : > { %v4441_v53 = vadd.f32 %v4427_v37, %v322_v51  ;;  %v3192_v54 = vpop.f32.mrb[7].mxu0  ;;  %v2972_v59 = vadd.f32 %v2971_v57, %v2970_v55  ;;  %v977_v51 = vld [vmem:[%s5361_s3 + $0x48] sm:$0xff]  ;;  %v976_v55 = vld [vmem:[%s5361_s3 + $0x40] sm:$0xff] }
 0x110   : > { %v3574_v52 = vpack.c.bf16 %v977_v51, %v974_v50  ;;  %v973_v54 = vld [vmem:[%s5361_s3 + $0x20] sm:$0xff]  ;;  %v1010_v50 = vld [vmem:[%s5361_s3 + $0x1a8] sm:$0xff] }
 0x111   : > { %v3648_v56 = vpack.c.bf16 %v4441_v53, %v4438_v49  ;;  %v2973_v61 = vpop.f32.mrb[6].mxu1  ;;  %v575_v16 = vmul.f32 %v2972_v59, %v2972_v59  ;;  %v3576_v57 = vpack.c.bf16 %v976_v55, %v973_v54  ;;  %v975_v59 = vld [vmem:[%s5361_s3 + $0x30] sm:$0xff]  ;;  %v1013_v51 = vld [vmem:[%s5361_s3 + $0x1c8] sm:$0xff]  ;;  %v1012_v55 = vld [vmem:[%s5361_s3 + $0x1c0] sm:$0xff] }
 0x112   : > { %v4445_v58 = vpop.f32.mrb[8].mxu0  ;;  %v2974_v62 = vpop.f32.mrb[7].mxu1  ;;  %v3598_v54 = vpack.c.bf16 %v1013_v51, %v1010_v50 }
 0x113   : > { %v3195_v60 = vpop.f32.mrb[9].mxu0  ;;  %v2975_v63 = vadd.f32 %v2974_v62, %v2973_v61  ;;  %v980_v62 = vld [vmem:[%s5361_s3 + $0x68] sm:$0xff]  ;;  %v328_v39 = vadd.f32 %v4427_v37, %v4445_v58 }
 0x114   : > { %v978_v60 = vld [vmem:[%s5361_s3 + $0x50] sm:$0xff] }
 0x115   : > { %v576_v22 = vmul.f32 %v2975_v63, %v2975_v63  ;;  %v3606_v61 = vpack.c.bf16 %v978_v60, %v975_v59  ;;  %v983_v63 = vld [vmem:[%s5361_s3 + $0x88] sm:$0xff]  ;;  %v1014_v59 = vld [vmem:[%s5361_s3 + $0x1d0] sm:$0xff] }
 0x117   : > { %3607 = vmatprep.subr.bf16.mxu0 %v3606_v61 }
 0x122   : > { %v3008_v0 = vpop.f32.mrb[10].mxu0 }
 0x123   : > { %v3009_v1 = vpop.f32.mrb[11].mxu0 }
 0x124   : > { %v3010_v4 = vadd.f32 %v3009_v1, %v3008_v0  ;;  %v3578_v0 = vpack.c.bf16 %v983_v63, %v980_v62  ;;  %v979_v1 = vld [vmem:[%s5361_s3 + $0x60] sm:$0xff]  ;;  %v1016_v62 = vld [vmem:[%s5361_s3 + $0x1e8] sm:$0xff] }
 0x125   : > { %v1019_v63 = vld [vmem:[%s5361_s3 + $0x208] sm:$0xff] }
 0x126   : > { %v577_v5 = vmul.f32 %v3010_v4, %v3010_v4  ;;  %v3011_v7 = vpop.f32.mrb[12].mxu0 }
 0x127   : > { %v3012_v8 = vpop.f32.mrb[13].mxu0 }
 0x128   : > { %v581_v9 = vadd.f32 %v577_v5, %v573_v2  ;;  %v3013_v11 = vadd.f32 %v3012_v8, %v3011_v7  ;;  %v982_v2 = vld [vmem:[%s5361_s3 + $0x80] sm:$0xff]  ;;  %v981_v5 = vld [vmem:[%s5361_s3 + $0x70] sm:$0xff] }
 0x129   : > { %v3580_v4 = vpack.c.bf16 %v982_v2, %v979_v1  ;;  %v984_v7 = vld [vmem:[%s5361_s3 + $0x90] sm:$0xff]  ;;  %v3602_v1 = vpack.c.bf16 %v1019_v63, %v1016_v62  ;;  %v1018_v2 = vld [vmem:[%s5361_s3 + $0x200] sm:$0xff] }
 0x12a   : > { %v578_v12 = vmul.f32 %v3013_v11, %v3013_v11  ;;  %v3014_v13 = vpop.f32.mrb[14].mxu0  ;;  %3228 = vmatprep.mubr.f32.mxu1 %v581_v9  ;;  %v3610_v8 = vpack.c.bf16 %v984_v7, %v981_v5  ;;  %v986_v9 = vld [vmem:[%s5361_s3 + $0xa8] sm:$0xff]  ;;  %v1020_v5 = vld [vmem:[%s5361_s3 + $0x210] sm:$0xff] }
 0x12b   : > { %v3015_v14 = vpop.f32.mrb[15].mxu0 }
 0x12c   : > { %v582_v15 = vadd.f32 %v578_v12, %v574_v10  ;;  %v3016_v17 = vadd.f32 %v3015_v14, %v3014_v13  ;;  %v989_v10 = vld [vmem:[%s5361_s3 + $0xc8] sm:$0xff]  ;;  %v985_v12 = vld [vmem:[%s5361_s3 + $0xa0] sm:$0xff] }
 0x12d   : > { %v3582_v11 = vpack.c.bf16 %v989_v10, %v986_v9  ;;  %v988_v13 = vld [vmem:[%s5361_s3 + $0xc0] sm:$0xff]  ;;  %v694_v9 = vlaneseq }
 0x12e   : > { %v579_v18 = vmul.f32 %v3016_v17, %v3016_v17  ;;  %v3017_v19 = vpop.f32.mrb[16].mxu0  ;;  %3229 = vmatmul.mubr.f32.vlgmr.msra.gmra.mrb[8].mxu1 %v582_v15  ;;  %v3584_v14 = vpack.c.bf16 %v988_v13, %v985_v12  ;;  %v987_v15 = vld [vmem:[%s5361_s3 + $0xb0] sm:$0xff] }
 0x12f   : > { %v3018_v20 = vpop.f32.mrb[17].mxu0  ;;  %716 = vmatpush1.msra.mxu1 %v699_v27  ;;  %v998_v27 = vld [vmem:[%s5361_s3 + $0x128] sm:$0xff]  ;;  %v4615_v10 = vshrl.u32 %v694_v9, 7 }
 0x130   : > { %v583_v21 = vadd.f32 %v579_v18, %v575_v16  ;;  %v3019_v23 = vadd.f32 %v3018_v20, %v3017_v19  ;;  %3575 = vmatprep.subr.bf16.mxu1 %v3574_v52  ;;  %v990_v16 = vld [vmem:[%s5361_s3 + $0xd0] sm:$0xff]  ;;  %v992_v18 = vld [vmem:[%s5361_s3 + $0xe8] sm:$0xff]  ;;  %v1009_v52 = vld [vmem:[%s5361_s3 + $0x1a0] sm:$0xff] }
 0x131   : > { %v3614_v17 = vpack.c.bf16 %v990_v16, %v987_v15  ;;  %v995_v19 = vld [vmem:[%s5361_s3 + $0x108] sm:$0xff]  ;;  %v3600_v60 = vpack.c.bf16 %v1012_v55, %v1009_v52  ;;  %vm914_vm2 = vcmp.lt.s32.totalorder %v4615_v10, 7  ;;  %vm897_vm3 = vcmp.lt.s32.totalorder %v4615_v10, 1 }
 0x132   : > { %v580_v24 = vmul.f32 %v3019_v23, %v3019_v23  ;;  %3231 = vmatprep.mubr.f32.mxu1 %v583_v21  ;;  %v3586_v20 = vpack.c.bf16 %v995_v19, %v992_v18  ;;  %v991_v21 = vld [vmem:[%s5361_s3 + $0xe0] sm:$0xff]  ;;  %vm889_vm4 = vcmp.eq.s32.totalorder %v4615_v10, 0 }
 0x134   : > { %v584_v25 = vadd.f32 %v580_v24, %v576_v22  ;;  %v994_v22 = vld [vmem:[%s5361_s3 + $0x100] sm:$0xff]  ;;  %v993_v24 = vld [vmem:[%s5361_s3 + $0xf0] sm:$0xff] }
 0x135   : > { %v3588_v23 = vpack.c.bf16 %v994_v22, %v991_v21 }
 0x136   : > { %3232 = vmatmul.mubr.f32.gmra.mrb[10].mxu1 %v584_v25  ;;  %v996_v25 = vld [vmem:[%s5361_s3 + $0x110] sm:$0xff] }
 0x137   : > { %779 = vmatprep.mubr.f32.mxu1 %v4000_v6  ;;  %v3618_v26 = vpack.c.bf16 %v996_v25, %v993_v24 }
 0x201   : > { %v3230_v29 = vpop.f32.mrb[8].mxu1 }
 0x202   : > { %v673_v30 = vadd.f32 1e-06, %v3230_v29  ;;  %v667_v31 = vpop.f32.mrb[9].mxu1  ;;  %v3590_v29 = vpack.c.bf16 %v1001_v28, %v998_v27 }
 0x203   : > { %v668_v32 = vadd.f32 1e-06, %v667_v31  ;;  %v1000_v31 = vld [vmem:[%s5361_s3 + $0x140] sm:$0xff] }
 0x204   : > { %3878 = vlog2.f32 %v673_v30  ;;  %v997_v30 = vld [vmem:[%s5361_s3 + $0x120] sm:$0xff] }
 0x205   : > { %3880 = vlog2.f32 %v668_v32  ;;  %v3592_v32 = vpack.c.bf16 %v1000_v31, %v997_v30  ;;  %v4624_v30 = vadd.s32 24, %v4615_v10 }
 0x207   : > { %vm909_vm5 = vcmp.eq.s32.totalorder %v4624_v30, 31 }
 0x209   : > { %v3233_v33 = vpop.f32.mrb[10].mxu1 }
 0x20a   : > { %v683_v34 = vadd.f32 1e-06, %v3233_v33  ;;  %v677_v35 = vpop.f32.mrb[11].mxu1  ;;  %v999_v33 = vld [vmem:[%s5361_s3 + $0x130] sm:$0xff] }
 0x20b   : > { %v678_v36 = vadd.f32 1e-06, %v677_v35 }
 0x20c   : > { %3882 = vlog2.f32 %v683_v34  ;;  %v1002_v34 = vld [vmem:[%s5361_s3 + $0x150] sm:$0xff] }
 0x20d   : > { %3884 = vlog2.f32 %v678_v36  ;;  %v3622_v35 = vpack.c.bf16 %v1002_v34, %v999_v33  ;;  %v1004_v36 = vld [vmem:[%s5361_s3 + $0x168] sm:$0xff] }
 0x20e   : > { %v3879_v38 = vpop.eup %3878 }
 0x20f   : > { %v3881_v41 = vpop.eup %3880  ;;  %v689_v44 = vmul.f32 0.6931472, %v3879_v38  ;;  %v1007_v38 = vld [vmem:[%s5361_s3 + $0x188] sm:$0xff] }
 0x210   : > { %v687_v42 = vmul.f32 0.6931472, %v3881_v41  ;;  %v3594_v41 = vpack.c.bf16 %v1007_v38, %v1004_v36 }
 0x212   : > { %2870 = vmatmul.mubr.msk.f32.vlgmr.msra.gmra.mrb[12].mxu1 %vm702_vm1, %v687_v42  ;;  %3236 = vmatprep.mubr.msk.f32.mxu0 %vm702_vm1, %v687_v42  ;;  %v1003_v42 = vld [vmem:[%s5361_s3 + $0x160] sm:$0xff] }
 0x213   : > { %3237 = vmatmul.mubr.msk.f32.vlgmr.msra.gmra.mrb[18].mxu0 %vm702_vm1, %v689_v44  ;;  %785 = vmatprep.mubr.f32.mxu1 %v4000_v6 }
 0x214   : > { %3577 = vmatpush1.bf16.msra.mxu1 %v3576_v57  ;;  %3609 = vmatpush3.bf16.msra.mxu0 %v3606_v61  ;;  %v1011_v57 = vld [vmem:[%s5361_s3 + $0x1b0] sm:$0xff] }
 0x215   : > { %3579 = vmatprep.subr.bf16.mxu1 %v3578_v0  ;;  %3611 = vmatprep.subr.bf16.mxu0 %v3610_v8  ;;  %v3630_v61 = vpack.c.bf16 %v1014_v59, %v1011_v57  ;;  %v1015_v0 = vld [vmem:[%s5361_s3 + $0x1e0] sm:$0xff] }
 0x216   : > { %v3883_v45 = vpop.eup %3882  ;;  %2871 = vmatmul.mubr.msk.f32.gmra.mrb[14].mxu1 %vm702_vm1, %v689_v44  ;;  %v1006_v44 = vld [vmem:[%s5361_s3 + $0x180] sm:$0xff] }
 0x217   : > { %v3885_v46 = vpop.eup %3884  ;;  %791 = vmatprep.mubr.f32.mxu1 %v4000_v6  ;;  %v693_v48 = vmul.f32 0.6931472, %v3883_v45  ;;  %v3596_v45 = vpack.c.bf16 %v1006_v44, %v1003_v42 }
 0x218   : > { %v691_v47 = vmul.f32 0.6931472, %v3885_v46  ;;  %3581 = vmatpush1.bf16.msra.mxu1 %v3580_v4  ;;  %3613 = vmatpush3.bf16.msra.mxu0 %v3610_v8  ;;  %v1005_v46 = vld [vmem:[%s5361_s3 + $0x170] sm:$0xff]  ;;  %v3604_v8 = vpack.c.bf16 %v1018_v2, %v1015_v0 }
 0x219   : > { %3583 = vmatprep.subr.bf16.mxu1 %v3582_v11  ;;  %3615 = vmatprep.subr.bf16.mxu0 %v3614_v17  ;;  %v1017_v4 = vld [vmem:[%s5361_s3 + $0x1f0] sm:$0xff] }
 0x21a   : > { %2872 = vmatmul.mubr.msk.f32.gmra.mrb[16].mxu1 %vm702_vm1, %v691_v47  ;;  %3239 = vmatprep.mubr.msk.f32.mxu0 %vm702_vm1, %v691_v47  ;;  %v1008_v47 = vld [vmem:[%s5361_s3 + $0x190] sm:$0xff]  ;;  %v3634_v7 = vpack.c.bf16 %v1020_v5, %v1017_v4 }
 0x21b   : > { %3240 = vmatmul.mubr.msk.f32.gmra.mrb[20].mxu0 %vm702_vm1, %v693_v48  ;;  %797 = vmatprep.mubr.f32.mxu1 %v4000_v6 }
 0x21c   : > { %3585 = vmatpush1.bf16.msra.mxu1 %v3584_v14  ;;  %3617 = vmatpush3.bf16.msra.mxu0 %v3614_v17 }
 0x21d   : > { %3587 = vmatprep.subr.bf16.mxu1 %v3586_v20  ;;  %3619 = vmatprep.subr.bf16.mxu0 %v3618_v26 }
 0x21e   : > { %2873 = vmatmul.mubr.msk.f32.gmra.mrb[18].mxu1 %vm702_vm1, %v693_v48  ;;  %v3626_v48 = vpack.c.bf16 %v1008_v47, %v1005_v46  ;;  %v2879_v47 = vld [vmem:[%s5360_s2 + $0x440] ss:$0 sm:$0xff] }
 0x21f   : > { %1085 = vmatprep.mubr.f32.mxu1 %v4000_v6 }
 0x220   : > { %3589 = vmatpush1.bf16.msra.mxu1 %v3588_v23  ;;  %3621 = vmatpush3.bf16.msra.mxu0 %v3618_v26 }
 0x221   : > { %3591 = vmatprep.subr.bf16.mxu1 %v3590_v29  ;;  %3623 = vmatprep.subr.bf16.mxu0 %v3622_v35 }
 0x224   : > { %3593 = vmatpush1.bf16.msra.mxu1 %v3592_v32  ;;  %3625 = vmatpush3.bf16.msra.mxu0 %v3622_v35 }
 0x225   : > { %3595 = vmatprep.subr.bf16.mxu1 %v3594_v41  ;;  %3627 = vmatprep.subr.bf16.mxu0 %v3626_v48  ;;  %v2878_v41 = vld [vmem:[%s5360_s2 + $0x438] ss:$0 sm:$0xff] }
 0x228   : > { %3597 = vmatpush1.bf16.msra.mxu1 %v3596_v45  ;;  %3629 = vmatpush3.bf16.msra.mxu0 %v3626_v48 }
 0x229   : > { %3599 = vmatprep.subr.bf16.mxu1 %v3598_v54  ;;  %3631 = vmatprep.subr.bf16.mxu0 %v3630_v61 }
 0x22c   : > { %3601 = vmatpush1.bf16.msra.mxu1 %v3600_v60  ;;  %3633 = vmatpush3.bf16.msra.mxu0 %v3630_v61 }
 0x22d   : > { %3603 = vmatprep.subr.bf16.mxu1 %v3602_v1  ;;  %3635 = vmatprep.subr.bf16.mxu0 %v3634_v7 }
 0x230   : > { %3605 = vmatpush1.bf16.msra.mxu1 %v3604_v8  ;;  %3637 = vmatpush3.bf16.msra.mxu0 %v3634_v7 }
 0x231   : > { %3644 = vmatprep.subr.bf16.mxu1 %v3998_v3  ;;  %3638 = vmatprep.subr.bf16.mxu0 %v3998_v3 }
 0x2e5   : > { %v781_v11 = vpop.f32.mrb[12].mxu1 }
 0x2e6   : > { %v783_v12 = vpop.f32.mrb[13].mxu1  ;;  %v3238_v13 = vpop.f32.mrb[18].mxu0  ;;  %v893_v18 = vrot.slane %v781_v11, 7 }
 0x2e7   : > { %v911_v14 = vrot.slane %v3238_v13, 1  ;;  %v870_v15 = vpop.f32.mrb[19].mxu0 }
 0x2e8   : > { %v910_v16 = vrot.slane %v870_v15, 1 }
 0x2e9   : > { %v787_v17 = vpop.f32.mrb[14].mxu1 }
 0x2ea   : > { %v917_v19 = vsel %vm914_vm2, %v910_v16, %v911_v14  ;;  %v894_v20 = vrot.slane %v787_v17, 7  ;;  %v789_v21 = vpop.f32.mrb[15].mxu1 }
 0x2ec   : > { %v900_v22 = vsel %vm897_vm3, %v893_v18, %v894_v20 }
 0x2ed   : > { %v924_v23 = vadd.f32 %v900_v22, %v789_v21  ;;  %v793_v24 = vpop.f32.mrb[16].mxu1 }
 0x2ee   : > { %v895_v25 = vrot.slane %v793_v24, 7  ;;  %v795_v26 = vpop.f32.mrb[17].mxu1  ;;  %v3241_v27 = vpop.f32.mrb[20].mxu0 }
 0x2ef   : > { %v913_v28 = vrot.slane %v3241_v27, 1  ;;  %v880_v29 = vpop.f32.mrb[21].mxu0 }
 0x2f0   : > { %v899_v31 = vsel %vm897_vm3, %v894_v20, %v895_v25  ;;  %v912_v32 = vrot.slane %v880_v29, 1 }
 0x2f1   : > { %v925_v33 = vadd.f32 %v899_v31, %v795_v26  ;;  %v799_v34 = vpop.f32.mrb[18].mxu1  ;;  %v918_v35 = vsel %vm914_vm2, %v913_v28, %v910_v16 }
 0x2f2   : > { %v915_v36 = vsel %vm914_vm2, %v912_v32, %v913_v28  ;;  %v916_v38 = vsel %vm914_vm2, %v911_v14, %v912_v32  ;;  %v896_v42 = vrot.slane %v799_v34, 7  ;;  %v801_v44 = vpop.f32.mrb[19].mxu1  ;;  %v922_v59 = vsel %vm909_vm5, 0.0, %v918_v35 }
 0x2f3   : > { %v928_v45 = vadd.f32 %v924_v23, %v916_v38  ;;  %v929_v46 = vadd.f32 %v925_v33, %v915_v36 }
 0x2f4   : > { %v901_v48 = vsel %vm897_vm3, %v896_v42, %v893_v18  ;;  %v898_v50 = vsel %vm897_vm3, %v895_v25, %v896_v42 }
 0x2f5   : > { %v937_v51 = vmul.f32 %v2878_v41, %v928_v45  ;;  %v902_v52 = vsel %vm889_vm4, 0.0, %v901_v48  ;;  %v926_v54 = vadd.f32 %v898_v50, %v801_v44  ;;  %v938_v55 = vmul.f32 %v2878_v41, %v929_v46  ;;  %v2880_v50 = vld [vmem:[%s5360_s2 + $0x448] ss:$0 sm:$0xff] }
 0x2f6   : > { %v923_v57 = vadd.f32 %v902_v52, %v783_v12 }
 0x2f7   : > { %v946_v60 = vadd.f32 %v2879_v47, %v937_v51  ;;  %v930_v61 = vadd.f32 %v926_v54, %v922_v59  ;;  %v947_v62 = vadd.f32 %v2879_v47, %v938_v55 }
 0x2f8   : > { %v927_v63 = vadd.f32 %v923_v57, %v917_v19  ;;  %v2881_v57 = vld [vmem:[%s5360_s2 + $0x450] ss:$0 sm:$0xff] }
 0x2f9   : > { %v950_v0 = vsub.f32 0.0, %v946_v60  ;;  %v939_v1 = vmul.f32 %v2878_v41, %v930_v61  ;;  %v951_v2 = vsub.f32 0.0, %v947_v62 }
 0x2fa   : > { %v936_v4 = vmul.f32 %v2878_v41, %v927_v63 }
 0x2fb   : > { %v955_v5 = vmul.f32 1.442695, %v950_v0  ;;  %v957_v7 = vmul.f32 1.442695, %v951_v2  ;;  %v948_v8 = vadd.f32 %v2879_v47, %v939_v1 }
 0x2fc   : > { %v945_v9 = vadd.f32 %v2879_v47, %v936_v4 }
 0x2fd   : > { %3886 = vpow2.f32 %v955_v5  ;;  %v952_v11 = vsub.f32 0.0, %v948_v8 }
 0x2fe   : > { %v949_v13 = vsub.f32 0.0, %v945_v9  ;;  %3888 = vpow2.f32 %v957_v7 }
 0x2ff   : > { %v959_v12 = vmul.f32 1.442695, %v952_v11 }
 0x300   : > { %v953_v14 = vmul.f32 1.442695, %v949_v13 }
 0x301   : > { %3890 = vpow2.f32 %v959_v12 }
 0x302   : > { %3892 = vpow2.f32 %v953_v14 }
 0x307   : > { %v3887_v15 = vpop.eup %3886 }
 0x308   : > { %v3889_v16 = vpop.eup %3888  ;;  %v962_v17 = vadd.f32 1.0, %v3887_v15 }
 0x309   : > { %v963_v18 = vadd.f32 1.0, %v3889_v16 }
 0x30a   : > { %3894 = vrcp.f32 %v962_v17 }
 0x30b   : > { %v3891_v19 = vpop.eup %3890  ;;  %3896 = vrcp.f32 %v963_v18 }
 0x30c   : > { %v3893_v20 = vpop.eup %3892  ;;  %v964_v22 = vadd.f32 1.0, %v3891_v19 }
 0x30d   : > { %v961_v21 = vadd.f32 1.0, %v3893_v20 }
 0x30f   : > { %3898 = vrcp.f32 %v961_v21 }
 0x310   : > { %3900 = vrcp.f32 %v964_v22 }
 0x314   : > { %v3895_v23 = vpop.eup %3894 }
 0x315   : > { %v3897_v24 = vpop.eup %3896  ;;  %v970_v27 = vmul.f32 %v3895_v23, %v946_v60 }
 0x316   : > { %v971_v29 = vmul.f32 %v3897_v24, %v947_v62 }
 0x319   : > { %v3899_v25 = vpop.eup %3898 }
 0x31a   : > { %v969_v26 = vmul.f32 %v3899_v25, %v945_v9  ;;  %v3901_v28 = vpop.eup %3900 }
 0x31b   : > { %v972_v31 = vmul.f32 %v3901_v28, %v948_v8 }
 0x31c   : > { %1086 = vmatmul.mubr.f32.vlgmr.msra.gmra.mrb[20].mxu1 %v969_v26  ;;  %3274 = vmatprep.mubr.f32.mxu0 %v969_v26 }
 0x31d   : > { %3646 = vmatpush3.bf16.msra.mxu1 %v3645_v43  ;;  %3275 = vmatmul.mubr.f32.vlgmr.msra.gmra.mrb[22].mxu0 %v970_v27 }
 0x31e   : > { %3277 = vmatprep.mubr.f32.mxu0 %v971_v29  ;;  %1091 = vmatprep.mubr.f32.mxu1 %v4000_v6 }
 0x31f   : > { %3647 = vmatprep.subr.bf16.mxu1 %v3998_v3 }
 0x320   : > { %1092 = vmatmul.mubr.f32.gmra.mrb[22].mxu1 %v970_v27 }
 0x321   : > { %3649 = vmatpush3.bf16.msra.mxu1 %v3648_v56  ;;  %3278 = vmatmul.mubr.f32.gmra.mrb[24].mxu0 %v972_v31 }
 0x322   : > { %1097 = vmatprep.mubr.f32.mxu1 %v4000_v6  ;;  %3311 = vmatprep.subr.mxu1 %v4000_v6 }
 0x323   : > { %3288 = vmatprep.mubr.msk.f32.mxu0 %vm3999_vm0, %v4000_v6 }
 0x324   : > { %1098 = vmatmul.mubr.f32.gmra.mrb[24].mxu1 %v971_v29 }
 0x325   : > { %3312 = vmatpush3.msra.mxu1 %v328_v39  ;;  %1103 = vmatprep.mubr.f32.mxu1 %v4000_v6 }
 0x326   : > { %3650 = vmatprep.subr.bf16.mxu1 %v3998_v3 }
 0x328   : > { %1104 = vmatmul.mubr.f32.gmra.mrb[26].mxu1 %v972_v31 }
 0x329   : > { %3313 = vmatprep.mubr.msk.f32.mxu1 %vm3999_vm0, %v4000_v6 }
 0x3ef   : > { %v1087_v40 = vpop.f32.mrb[20].mxu1 }
 0x3f0   : > { %v1089_v43 = vpop.f32.mrb[21].mxu1  ;;  %v3276_v49 = vpop.f32.mrb[22].mxu0  ;;  %v1195_v58 = vrot.slane %v1087_v40, 7 }
 0x3f1   : > { %v1208_v53 = vrot.slane %v3276_v49, 1  ;;  %v1176_v56 = vpop.f32.mrb[23].mxu0 }
 0x3f2   : > { %v1207_v32 = vrot.slane %v1176_v56, 1 }
 0x3f3   : > { %v1093_v37 = vpop.f32.mrb[22].mxu1 }
 0x3f4   : > { %v1213_v33 = vsel %vm914_vm2, %v1207_v32, %v1208_v53  ;;  %v1196_v34 = vrot.slane %v1093_v37, 7  ;;  %v1095_v35 = vpop.f32.mrb[23].mxu1  ;;  %v3279_v36 = vpop.f32.mrb[24].mxu0 }
 0x3f5   : > { %v1210_v38 = vrot.slane %v3279_v36, 1  ;;  %v1186_v41 = vpop.f32.mrb[25].mxu0 }
 0x3f6   : > { %v1201_v42 = vsel %vm897_vm3, %v1195_v58, %v1196_v34  ;;  %v1209_v44 = vrot.slane %v1186_v41, 1  ;;  %v1270_v41 = vld [vmem:[%s5360_s2 + $0x308] sm:$0xff] }
 0x3f7   : > { %v1220_v45 = vadd.f32 %v1201_v42, %v1095_v35  ;;  %v1099_v46 = vpop.f32.mrb[24].mxu1  ;;  %v1214_v47 = vsel %vm914_vm2, %v1210_v38, %v1207_v32  ;;  %v1271_v42 = vld [vmem:[%s5360_s2 + $0x310] sm:$0xff] }
 0x3f8   : > { %v1212_v48 = vsel %vm914_vm2, %v1208_v53, %v1209_v44  ;;  %v1197_v51 = vrot.slane %v1099_v46, 7  ;;  %v1101_v52 = vpop.f32.mrb[25].mxu1  ;;  %v1211_v54 = vsel %vm914_vm2, %v1209_v44, %v1210_v38  ;;  %v1218_v12 = vsel %vm909_vm5, 0.0, %v1214_v47  ;;  %v1269_v38 = vld [vmem:[%s5360_s2 + $0x300] sm:$0xff]  ;;  %v1272_v44 = vld [vmem:[%s5360_s2 + $0x318] sm:$0xff]  ;;  %v4727_v46 = vld [vmem:[%s5360_s2 + $0x328] sm:$0xff] }
 0x3f9   : > { %v1224_v55 = vadd.f32 %v1220_v45, %v1212_v48  ;;  %v1273_v45 = vld [vmem:[%s5360_s2 + $0x320] sm:$0xff]  ;;  %3314 = vmatmul.mubr.msk.f32.vlgmr.msra.gmra.mrb[28].mxu1 %vm1381_vm7, %v4727_v46  ;;  %v1542_v47 = vld [vmem:[%s5361_s3 + $0x2a8] sm:$0xff] }
 0x3fa   : > { %v1200_v59 = vsel %vm897_vm3, %v1196_v34, %v1197_v51  ;;  %3326 = vmatprep.mubr.msk.f32.mxu1 %vm3999_vm0, %v4000_v6  ;;  %v1546_v48 = vld [vmem:[%s5361_s3 + $0x2c8] sm:$0xff] }
 0x3fb   : > { %v1233_v60 = vmul.f32 %v2880_v50, %v1224_v55  ;;  %v1221_v61 = vadd.f32 %v1200_v59, %v1101_v52  ;;  %v1105_v62 = vpop.f32.mrb[26].mxu1  ;;  %v1545_v52 = vld [vmem:[%s5361_s3 + $0x2c0] sm:$0xff]  ;;  %v1550_v55 = vld [vmem:[%s5361_s3 + $0x2e8] sm:$0xff] }
 0x3fc   : > { %v1198_v63 = vrot.slane %v1105_v62, 7  ;;  %v1107_v0 = vpop.f32.mrb[27].mxu1  ;;  %v1549_v59 = vld [vmem:[%s5361_s3 + $0x2e0] sm:$0xff] }
 0x3fd   : > { %v1242_v1 = vadd.f32 %v2881_v57, %v1233_v60  ;;  %v1225_v2 = vadd.f32 %v1221_v61, %v1211_v54  ;;  %v1553_v60 = vld [vmem:[%s5361_s3 + $0x300] sm:$0xff] }
 0x3fe   : > { %v1202_v4 = vsel %vm897_vm3, %v1198_v63, %v1195_v58  ;;  %v1199_v5 = vsel %vm897_vm3, %v1197_v51, %v1198_v63  ;;  %v3656_v51 = vpack.c.bf16 %v1546_v48, %v1542_v47  ;;  %v3662_v62 = vpack.c.bf16 %v1553_v60, %v1549_v59  ;;  %v1558_v63 = vld [vmem:[%s5361_s3 + $0x328] sm:$0xff]  ;;  %v1547_v47 = vld [vmem:[%s5361_s3 + $0x2d0] sm:$0xff]  ;;  %v1552_v48 = vld [vmem:[%s5361_s3 + $0x2f8] sm:$0xff] }
 0x3ff   : > { %v1246_v7 = vsub.f32 0.0, %v1242_v1  ;;  %v1234_v8 = vmul.f32 %v2880_v50, %v1225_v2  ;;  %v1203_v9 = vsel %vm889_vm4, 0.0, %v1202_v4  ;;  %v1222_v11 = vadd.f32 %v1199_v5, %v1107_v0  ;;  %v1562_v0 = vld [vmem:[%s5361_s3 + $0x348] sm:$0xff]  ;;  %v1557_v2 = vld [vmem:[%s5361_s3 + $0x320] sm:$0xff]  ;;  %v1551_v59 = vld [vmem:[%s5361_s3 + $0x2f0] sm:$0xff] }
 0x400   : > { %v1219_v13 = vadd.f32 %v1203_v9, %v1089_v43  ;;  %v1561_v4 = vld [vmem:[%s5361_s3 + $0x340] sm:$0xff]  ;;  %v1555_v60 = vld [vmem:[%s5361_s3 + $0x310] sm:$0xff] }
 0x401   : > { %v1243_v14 = vadd.f32 %v2881_v57, %v1234_v8  ;;  %v1226_v15 = vadd.f32 %v1222_v11, %v1218_v12  ;;  %v1251_v16 = vmul.f32 1.442695, %v1246_v7  ;;  %v3666_v5 = vpack.c.bf16 %v1561_v4, %v1557_v2  ;;  %v1566_v7 = vld [vmem:[%s5361_s3 + $0x368] sm:$0xff]  ;;  %v1565_v9 = vld [vmem:[%s5361_s3 + $0x360] sm:$0xff]  ;;  %v1563_v2 = vld [vmem:[%s5361_s3 + $0x350] sm:$0xff] }
 0x402   : > { %v1223_v17 = vadd.f32 %v1219_v13, %v1213_v33  ;;  %v1570_v8 = vld [vmem:[%s5361_s3 + $0x388] sm:$0xff]  ;;  %v1569_v13 = vld [vmem:[%s5361_s3 + $0x380] sm:$0xff]  ;;  %v1568_v4 = vld [vmem:[%s5361_s3 + $0x378] sm:$0xff] }
 0x403   : > { %v1247_v18 = vsub.f32 0.0, %v1243_v14  ;;  %v1235_v19 = vmul.f32 %v2880_v50, %v1226_v15  ;;  %3902 = vpow2.f32 %v1251_v16  ;;  %v3668_v11 = vpack.c.bf16 %v1570_v8, %v1566_v7  ;;  %v1578_v15 = vld [vmem:[%s5361_s3 + $0x3c8] sm:$0xff]  ;;  %v1573_v16 = vld [vmem:[%s5361_s3 + $0x3a0] sm:$0xff]  ;;  %v1567_v8 = vld [vmem:[%s5361_s3 + $0x370] sm:$0xff] }
 0x404   : > { %v1232_v20 = vmul.f32 %v2880_v50, %v1223_v17  ;;  %v1541_v50 = vld [vmem:[%s5361_s3 + $0x2a0] sm:$0xff]  ;;  %v3670_v12 = vpack.c.bf16 %v1569_v13, %v1565_v9  ;;  %v1571_v9 = vld [vmem:[%s5361_s3 + $0x390] sm:$0xff]  ;;  %v1580_v13 = vld [vmem:[%s5361_s3 + $0x3d8] sm:$0xff] }
 0x405   : > { %v1253_v21 = vmul.f32 1.442695, %v1247_v18  ;;  %v1244_v22 = vadd.f32 %v2881_v57, %v1235_v19  ;;  %v3658_v54 = vpack.c.bf16 %v1545_v52, %v1541_v50  ;;  %v1577_v18 = vld [vmem:[%s5361_s3 + $0x3c0] sm:$0xff]  ;;  %v1556_v50 = vld [vmem:[%s5361_s3 + $0x318] sm:$0xff] }
 0x406   : > { %v1241_v23 = vadd.f32 %v2881_v57, %v1232_v20  ;;  %v1554_v57 = vld [vmem:[%s5361_s3 + $0x308] sm:$0xff]  ;;  %v3674_v19 = vpack.c.bf16 %v1577_v18, %v1573_v16  ;;  %v1579_v16 = vld [vmem:[%s5361_s3 + $0x3d0] sm:$0xff]  ;;  %v1588_v18 = vld [vmem:[%s5361_s3 + $0x418] sm:$0xff] }
 0x407   : > { %3904 = vpow2.f32 %v1253_v21  ;;  %v1248_v24 = vsub.f32 0.0, %v1244_v22  ;;  %v3660_v61 = vpack.c.bf16 %v1554_v57, %v1550_v55  ;;  %v1582_v20 = vld [vmem:[%s5361_s3 + $0x3e8] sm:$0xff]  ;;  %v3692_v57 = vpack.c.bf16 %v1556_v50, %v1552_v48 }
 0x408   : > { %v1245_v10 = vsub.f32 0.0, %v1241_v23  ;;  %v1586_v21 = vld [vmem:[%s5361_s3 + $0x408] sm:$0xff] }
 0x409   : > { %v1255_v25 = vmul.f32 1.442695, %v1248_v24  ;;  %v1585_v24 = vld [vmem:[%s5361_s3 + $0x400] sm:$0xff] }
 0x40a   : > { %v1249_v26 = vmul.f32 1.442695, %v1245_v10 }
 0x40b   : > { %3906 = vpow2.f32 %v1255_v25  ;;  %v1590_v25 = vld [vmem:[%s5361_s3 + $0x428] sm:$0xff] }
 0x40c   : > { %3908 = vpow2.f32 %v1249_v26  ;;  %v1594_v26 = vld [vmem:[%s5361_s3 + $0x448] sm:$0xff] }
 0x40d   : > { %v3903_v30 = vpop.eup %3902 }
 0x40e   : > { %v1258_v29 = vadd.f32 1.0, %v3903_v30  ;;  %v1589_v30 = vld [vmem:[%s5361_s3 + $0x420] sm:$0xff] }
 0x411   : > { %v3905_v27 = vpop.eup %3904 }
 0x412   : > { %v1259_v28 = vadd.f32 1.0, %v3905_v27  ;;  %v3680_v27 = vpack.c.bf16 %v1594_v26, %v1590_v25  ;;  %v1591_v26 = vld [vmem:[%s5361_s3 + $0x430] sm:$0xff] }
 0x414   : > { %3910 = vrcp.f32 %v1259_v28  ;;  %v1593_v28 = vld [vmem:[%s5361_s3 + $0x440] sm:$0xff] }
 0x415   : > { %v3907_v31 = vpop.eup %3906  ;;  %3912 = vrcp.f32 %v1258_v29  ;;  %v3682_v29 = vpack.c.bf16 %v1593_v28, %v1589_v30  ;;  %v1595_v30 = vld [vmem:[%s5361_s3 + $0x450] sm:$0xff]  ;;  %v1604_v28 = vld [vmem:[%s5361_s3 + $0x498] sm:$0xff] }
 0x416   : > { %v3909_v39 = vpop.eup %3908  ;;  %v1260_v40 = vadd.f32 1.0, %v3907_v31  ;;  %v1598_v31 = vld [vmem:[%s5361_s3 + $0x468] sm:$0xff] }
 0x417   : > { %v1257_v43 = vadd.f32 1.0, %v3909_v39  ;;  %v1602_v39 = vld [vmem:[%s5361_s3 + $0x488] sm:$0xff] }
 0x418   : > { %3914 = vrcp.f32 %v1260_v40  ;;  %v1597_v40 = vld [vmem:[%s5361_s3 + $0x460] sm:$0xff] }
 0x419   : > { %3916 = vrcp.f32 %v1257_v43  ;;  %v1601_v43 = vld [vmem:[%s5361_s3 + $0x480] sm:$0xff] }
 0x41e   : > { %v3911_v49 = vpop.eup %3910 }
 0x41f   : > { %v3913_v53 = vpop.eup %3912  ;;  %v1267_v37 = vmul.f32 %v3911_v49, %v1243_v14  ;;  %v1574_v14 = vld [vmem:[%s5361_s3 + $0x3a8] sm:$0xff]  ;;  %v3684_v49 = vpack.c.bf16 %v1602_v39, %v1598_v31  ;;  %v1599_v39 = vld [vmem:[%s5361_s3 + $0x470] sm:$0xff] }
 0x420   : > { %v1266_v34 = vmul.f32 %v3913_v53, %v1242_v1  ;;  %v3664_v1 = vpack.c.bf16 %v1562_v0, %v1558_v63  ;;  %v3672_v17 = vpack.c.bf16 %v1578_v15, %v1574_v14  ;;  %v3686_v53 = vpack.c.bf16 %v1601_v43, %v1597_v40  ;;  %v1575_v15 = vld [vmem:[%s5361_s3 + $0x3b0] sm:$0xff] }
 0x421   : > { %v3694_v63 = vpack.c.bf16 %v1555_v60, %v1551_v59  ;;  %v1603_v40 = vld [vmem:[%s5361_s3 + $0x490] sm:$0xff] }
 0x422   : > { %v3915_v56 = vpop.eup %3914  ;;  %v3718_v43 = vpack.c.bf16 %v1603_v40, %v1599_v39  ;;  %v1527_v60 = vld [vmem:[%s5361_s3 + $0x230] sm:$0xff]  ;;  %v1916_v39 = vld [vmem:[%s5361_s3 + $0x580] sm:$0xff] }
 0x423   : > { %v3917_v32 = vpop.eup %3916  ;;  %v1268_v58 = vmul.f32 %v3915_v56, %v1244_v22  ;;  %v1581_v22 = vld [vmem:[%s5361_s3 + $0x3e0] sm:$0xff]  ;;  %v1915_v40 = vld [vmem:[%s5361_s3 + $0x570] sm:$0xff] }
 0x424   : > { %v1265_v33 = vmul.f32 %v3917_v32, %v1241_v23  ;;  %v3676_v23 = vpack.c.bf16 %v1586_v21, %v1582_v20  ;;  %v3678_v10 = vpack.c.bf16 %v1585_v24, %v1581_v22  ;;  %v1583_v21 = vld [vmem:[%s5361_s3 + $0x3f0] sm:$0xff]  ;;  %v1596_v24 = vld [vmem:[%s5361_s3 + $0x458] sm:$0xff] }
 0x425   : > { %v3642_v35 = vpack.c.bf16 %v1268_v58, %v1267_v37  ;;  %v1587_v22 = vld [vmem:[%s5361_s3 + $0x410] sm:$0xff] }
 0x426   : > { %v3639_v36 = vpack.c.bf16 %v1266_v34, %v1265_v33 }
 0x428   : > { %3640 = vmatpush3.bf16.msra.mxu0 %v3639_v36 }
 0x429   : > { %3641 = vmatprep.subr.bf16.mxu0 %v3998_v3 }
 0x42c   : > { %3643 = vmatpush3.bf16.msra.mxu0 %v3642_v35 }
 0x42d   : > { %3657 = vmatprep.subr.bf16.mxu0 %v3656_v51 }
 0x42f   : > { %3289 = vmatmul.mubr.msk.f32.vlgmr.msra.gmra.mrb[26].mxu0 %vm1274_vm6, %v1269_v38 }
 0x430   : > { %3291 = vmatprep.mubr.msk.f32.mxu0 %vm3999_vm0, %v4000_v6  ;;  %3659 = vmatpush1.bf16.msra.mxu0 %v3658_v54 }
 0x431   : > { %3661 = vmatprep.subr.bf16.mxu0 %v3660_v61  ;;  %v1560_v61 = vld [vmem:[%s5361_s3 + $0x338] sm:$0xff] }
 0x433   : > { %3292 = vmatmul.mubr.msk.f32.gmra.mrb[28].mxu0 %vm1274_vm6, %v1270_v41 }
 0x434   : > { %3294 = vmatprep.mubr.msk.f32.mxu0 %vm3999_vm0, %v4000_v6  ;;  %3663 = vmatpush1.bf16.msra.mxu0 %v3662_v62  ;;  %v1564_v62 = vld [vmem:[%s5361_s3 + $0x358] sm:$0xff] }
 0x435   : > { %3665 = vmatprep.subr.bf16.mxu0 %v3664_v1  ;;  %v3696_v0 = vpack.c.bf16 %v1564_v62, %v1560_v61  ;;  %v1559_v1 = vld [vmem:[%s5361_s3 + $0x330] sm:$0xff] }
 0x436   : > { %v1531_v61 = vld [vmem:[%s5361_s3 + $0x250] sm:$0xff] }
 0x437   : > { %3295 = vmatmul.mubr.msk.f32.gmra.mrb[30].mxu0 %vm1274_vm6, %v1271_v42  ;;  %v1544_v42 = vld [vmem:[%s5361_s3 + $0x2b8] sm:$0xff] }
 0x438   : > { %3297 = vmatprep.mubr.msk.f32.mxu0 %vm3999_vm0, %v4000_v6  ;;  %3667 = vmatpush1.bf16.msra.mxu0 %v3666_v5  ;;  %v3698_v5 = vpack.c.bf16 %v1563_v2, %v1559_v1  ;;  %v3730_v1 = vpack.c.bf16 %v1531_v61, %v1527_v60  ;;  %v1934_v60 = vld [vmem:[%s5361_s3 + $0x640] sm:$0xff]  ;;  %v1933_v61 = vld [vmem:[%s5361_s3 + $0x630] sm:$0xff] }
 0x439   : > { %3669 = vmatprep.subr.bf16.mxu0 %v3668_v11  ;;  %v1576_v11 = vld [vmem:[%s5361_s3 + $0x3b8] sm:$0xff] }
 0x43a   : > { %v3704_v14 = vpack.c.bf16 %v1580_v13, %v1576_v11  ;;  %v1895_v11 = vld [vmem:[%s5361_s3 + $0x4a0] sm:$0xff] }
 0x43b   : > { %3298 = vmatmul.mubr.msk.f32.gmra.mrb[32].mxu0 %vm1274_vm6, %v1272_v44  ;;  %v1548_v44 = vld [vmem:[%s5361_s3 + $0x2d8] sm:$0xff]  ;;  %v1898_v13 = vld [vmem:[%s5361_s3 + $0x4c0] sm:$0xff] }
 0x43c   : > { %3300 = vmatprep.mubr.msk.f32.mxu0 %vm3999_vm0, %v4000_v6  ;;  %3671 = vmatpush1.bf16.msra.mxu0 %v3670_v12  ;;  %v3688_v52 = vpack.c.bf16 %v1548_v44, %v1544_v42  ;;  %v3702_v12 = vpack.c.bf16 %v1571_v9, %v1567_v8  ;;  %v1533_v44 = vld [vmem:[%s5361_s3 + $0x260] sm:$0xff] }
 0x43d   : > { %3673 = vmatprep.subr.bf16.mxu0 %v3672_v17  ;;  %v1584_v17 = vld [vmem:[%s5361_s3 + $0x3f8] sm:$0xff] }
 0x43e   : > { %v3708_v20 = vpack.c.bf16 %v1588_v18, %v1584_v17  ;;  %v1901_v17 = vld [vmem:[%s5361_s3 + $0x4e0] sm:$0xff] }
 0x43f   : > { %3301 = vmatmul.mubr.msk.f32.gmra.mrb[34].mxu0 %vm1274_vm6, %v1273_v45  ;;  %v1543_v45 = vld [vmem:[%s5361_s3 + $0x2b0] sm:$0xff]  ;;  %v1904_v18 = vld [vmem:[%s5361_s3 + $0x500] sm:$0xff] }
 0x440   : > { %1669 = vmatprep.mubr.f32.mxu0 %v4000_v6  ;;  %3675 = vmatpush1.bf16.msra.mxu0 %v3674_v19  ;;  %v3690_v55 = vpack.c.bf16 %v1547_v47, %v1543_v45  ;;  %v3706_v19 = vpack.c.bf16 %v1579_v16, %v1575_v15  ;;  %v1537_v45 = vld [vmem:[%s5361_s3 + $0x280] sm:$0xff]  ;;  %v1528_v47 = vld [vmem:[%s5361_s3 + $0x238] sm:$0xff]  ;;  %v3738_v15 = vpack.c.bf16 %v1898_v13, %v1895_v11 }
 0x441   : > { %3677 = vmatprep.subr.bf16.mxu0 %v3676_v23  ;;  %v1592_v23 = vld [vmem:[%s5361_s3 + $0x438] sm:$0xff] }
 0x442   : > { %v3712_v25 = vpack.c.bf16 %v1596_v24, %v1592_v23  ;;  %v1907_v23 = vld [vmem:[%s5361_s3 + $0x520] sm:$0xff] }
 0x443   : > { %v1910_v24 = vld [vmem:[%s5361_s3 + $0x540] sm:$0xff] }
 0x444   : > { %3679 = vmatpush1.bf16.msra.mxu0 %v3678_v10  ;;  %v3710_v10 = vpack.c.bf16 %v1587_v22, %v1583_v21  ;;  %v3742_v21 = vpack.c.bf16 %v1904_v18, %v1901_v17 }
 0x445   : > { %3681 = vmatprep.subr.bf16.mxu0 %v3680_v27  ;;  %v1600_v27 = vld [vmem:[%s5361_s3 + $0x478] sm:$0xff] }
 0x446   : > { %v3716_v31 = vpack.c.bf16 %v1604_v28, %v1600_v27  ;;  %v1914_v27 = vld [vmem:[%s5361_s3 + $0x568] sm:$0xff] }
 0x447   : > { %v1917_v28 = vld [vmem:[%s5361_s3 + $0x588] sm:$0xff] }
 0x448   : > { %3683 = vmatpush1.bf16.msra.mxu0 %v3682_v29  ;;  %v3714_v29 = vpack.c.bf16 %v1595_v30, %v1591_v26  ;;  %v1912_v26 = vld [vmem:[%s5361_s3 + $0x550] sm:$0xff] }
 0x449   : > { %3685 = vmatprep.subr.bf16.mxu0 %v3684_v49 }
 0x44c   : > { %3687 = vmatpush1.bf16.msra.mxu0 %v3686_v53 }
 0x4cc   : > { %v4931_v49 = vpop.f32.mrb[28].mxu1 }
 0x4cd   : > { %v3315_v53 = vpop.f32.mrb[29].mxu1 }
 0x502   : > { %v1356_v56 = vpop.f32.mrb[26].mxu0 }
 0x503   : > { %v3290_v32 = vpop.f32.mrb[27].mxu0 }
 0x504   : > { %v1530_v32 = vld [vmem:[%s5361_s3 + $0x248] sm:$0xff] }
 0x506   : > { %v1361_v37 = vpop.f32.mrb[28].mxu0 }
 0x507   : > { %v3651_v58 = vpack.c.bf16 %v1361_v37, %v1356_v56  ;;  %v3293_v33 = vpop.f32.mrb[29].mxu0  ;;  %v1526_v56 = vld [vmem:[%s5361_s3 + $0x228] sm:$0xff] }
 0x508   : > { %v3720_v37 = vpack.c.bf16 %v1530_v32, %v1526_v56  ;;  %v1529_v33 = vld [vmem:[%s5361_s3 + $0x240] sm:$0xff]  ;;  %v1920_v56 = vld [vmem:[%s5361_s3 + $0x5a8] sm:$0xff] }
 0x509   : > { %3652 = vmatpush3.bf16.msra.mxu1 %v3651_v58  ;;  %v1525_v58 = vld [vmem:[%s5361_s3 + $0x220] sm:$0xff]  ;;  %v1923_v32 = vld [vmem:[%s5361_s3 + $0x5c8] sm:$0xff] }
 0x50a   : > { %v1366_v34 = vpop.f32.mrb[30].mxu0  ;;  %3653 = vmatprep.subr.bf16.mxu1 %v3998_v3  ;;  %3721 = vmatprep.subr.bf16.mxu0 %v3720_v37  ;;  %v3752_v37 = vpack.c.bf16 %v1923_v32, %v1920_v56  ;;  %v5176_v56 = vld [vmem:[%s5360_s2 + $0x360] sm:$0xff] }
 0x50b   : > { %v3296_v35 = vpop.f32.mrb[31].mxu0 }
 0x50c   : > { %v1538_v35 = vld [vmem:[%s5361_s3 + $0x288] sm:$0xff] }
 0x50e   : > { %v1371_v36 = vpop.f32.mrb[32].mxu0 }
 0x50f   : > { %v3654_v38 = vpack.c.bf16 %v1371_v36, %v1366_v34  ;;  %v3299_v41 = vpop.f32.mrb[33].mxu0  ;;  %v1534_v34 = vld [vmem:[%s5361_s3 + $0x268] sm:$0xff]  ;;  %v1897_v36 = vld [vmem:[%s5361_s3 + $0x4b0] sm:$0xff] }
 0x510   : > { %v3722_v41 = vpack.c.bf16 %v1529_v33, %v1525_v58  ;;  %v3724_v42 = vpack.c.bf16 %v1538_v35, %v1534_v34  ;;  %v1919_v58 = vld [vmem:[%s5361_s3 + $0x5a0] sm:$0xff]  ;;  %v1921_v34 = vld [vmem:[%s5361_s3 + $0x5b0] sm:$0xff] }
 0x511   : > { %3655 = vmatpush3.bf16.msra.mxu1 %v3654_v38  ;;  %v1900_v38 = vld [vmem:[%s5361_s3 + $0x4d0] sm:$0xff]  ;;  %v1922_v33 = vld [vmem:[%s5361_s3 + $0x5c0] sm:$0xff] }
 0x512   : > { %v1376_v51 = vpop.f32.mrb[34].mxu0  ;;  %3324 = vmatprep.subr.mxu1 %v4000_v6  ;;  %v3769_v48 = vpack.c.bf16 %v1900_v38, %v1897_v36  ;;  %v3754_v35 = vpack.c.bf16 %v1922_v33, %v1919_v58  ;;  %v1924_v36 = vld [vmem:[%s5361_s3 + $0x5d0] sm:$0xff] }
 0x513   : > { %v3302_v54 = vpop.f32.mrb[35].mxu0  ;;  %v3781_v38 = vpack.c.bf16 %v1924_v36, %v1921_v34  ;;  %v5183_v34 = vld [vmem:[%s5360_s2 + $0x368] sm:$0xff] }
 0x514   : > { %v1906_v54 = vld [vmem:[%s5361_s3 + $0x510] sm:$0xff] }
 0x515   : > { %3325 = vmatpush3.msra.mxu1 %v1376_v51  ;;  %v1532_v51 = vld [vmem:[%s5361_s3 + $0x258] sm:$0xff] }
 0x516   : > { %3327 = vmatmul.mubr.msk.f32.vlgmr.msra.gmra.mrb[30].mxu1 %vm1381_vm7, %v4727_v46  ;;  %3689 = vmatprep.subr.bf16.mxu1 %v3688_v52  ;;  %v1572_v46 = vld [vmem:[%s5361_s3 + $0x398] sm:$0xff]  ;;  %v1903_v52 = vld [vmem:[%s5361_s3 + $0x4f0] sm:$0xff]  ;;  %v3728_v59 = vpack.c.bf16 %v1532_v51, %v1528_v47  ;;  %v1928_v47 = vld [vmem:[%s5361_s3 + $0x600] sm:$0xff] }
 0x517   : > { %3691 = vmatpush1.bf16.msra.mxu1 %v3690_v55  ;;  %1740 = vmatprep.mubr.f32.mxu1 %v4000_v6  ;;  %v3700_v7 = vpack.c.bf16 %v1572_v46, %v1568_v4  ;;  %v3772_v62 = vpack.c.bf16 %v1906_v54, %v1903_v52  ;;  %v1535_v4 = vld [vmem:[%s5361_s3 + $0x270] sm:$0xff]  ;;  %v1932_v54 = vld [vmem:[%s5361_s3 + $0x628] sm:$0xff] }
 0x518   : > { %3693 = vmatprep.subr.bf16.mxu1 %v3692_v57  ;;  %v3726_v57 = vpack.c.bf16 %v1537_v45, %v1533_v44  ;;  %v1539_v46 = vld [vmem:[%s5361_s3 + $0x290] sm:$0xff]  ;;  %v1925_v45 = vld [vmem:[%s5361_s3 + $0x5e0] sm:$0xff] }
 0x519   : > { %v3734_v8 = vpack.c.bf16 %v1539_v46, %v1535_v4  ;;  %v1930_v51 = vld [vmem:[%s5361_s3 + $0x610] sm:$0xff]  ;;  %v1937_v46 = vld [vmem:[%s5361_s3 + $0x660] sm:$0xff] }
 0x51b   : > { %3695 = vmatpush1.bf16.msra.mxu1 %v3694_v63  ;;  %v1536_v63 = vld [vmem:[%s5361_s3 + $0x278] sm:$0xff] }
 0x51c   : > { %3697 = vmatprep.subr.bf16.mxu1 %v3696_v0  ;;  %v1540_v0 = vld [vmem:[%s5361_s3 + $0x298] sm:$0xff] }
 0x51d   : > { %v3732_v2 = vpack.c.bf16 %v1540_v0, %v1536_v63  ;;  %v1936_v63 = vld [vmem:[%s5361_s3 + $0x650] sm:$0xff] }
 0x51e   : > { %v3787_v0 = vpack.c.bf16 %v1936_v63, %v1933_v61 }
 0x51f   : > { %3699 = vmatpush1.bf16.msra.mxu1 %v3698_v5  ;;  %v1896_v5 = vld [vmem:[%s5361_s3 + $0x4a8] sm:$0xff] }
 0x520   : > { %3701 = vmatprep.subr.bf16.mxu1 %v3700_v7  ;;  %v1899_v7 = vld [vmem:[%s5361_s3 + $0x4c8] sm:$0xff] }
 0x521   : > { %v3736_v9 = vpack.c.bf16 %v1899_v7, %v1896_v5  ;;  %v1940_v5 = vld [vmem:[%s5361_s3 + $0x680] sm:$0xff]  ;;  %v1939_v7 = vld [vmem:[%s5361_s3 + $0x670] sm:$0xff] }
 0x523   : > { %3703 = vmatpush1.bf16.msra.mxu1 %v3702_v12  ;;  %v1902_v12 = vld [vmem:[%s5361_s3 + $0x4e8] sm:$0xff] }
 0x524   : > { %3705 = vmatprep.subr.bf16.mxu1 %v3704_v14  ;;  %v1905_v14 = vld [vmem:[%s5361_s3 + $0x508] sm:$0xff] }
 0x525   : > { %v3740_v16 = vpack.c.bf16 %v1905_v14, %v1902_v12 }
 0x527   : > { %3707 = vmatpush1.bf16.msra.mxu1 %v3706_v19  ;;  %v1908_v19 = vld [vmem:[%s5361_s3 + $0x528] sm:$0xff] }
 0x528   : > { %3709 = vmatprep.subr.bf16.mxu1 %v3708_v20  ;;  %v1911_v20 = vld [vmem:[%s5361_s3 + $0x548] sm:$0xff] }
 0x529   : > { %v3744_v22 = vpack.c.bf16 %v1911_v20, %v1908_v19 }
 0x52b   : > { %3711 = vmatpush1.bf16.msra.mxu1 %v3710_v10  ;;  %v1909_v10 = vld [vmem:[%s5361_s3 + $0x530] sm:$0xff] }
 0x52c   : > { %3713 = vmatprep.subr.bf16.mxu1 %v3712_v25  ;;  %v3746_v25 = vpack.c.bf16 %v1910_v24, %v1907_v23  ;;  %v3775_v30 = vpack.c.bf16 %v1912_v26, %v1909_v10  ;;  %v2106_v23 = vld [vmem:[%s5360_s2 + $0x330] sm:$0xff]  ;;  %v2891_v24 = vld [vmem:[%s5360_s2 + $0x458] ss:$0 sm:$0xff]  ;;  %v2893_v10 = vld [vmem:[%s5360_s2 + $0x468] ss:$0 sm:$0xff] }
 0x52f   : > { %3715 = vmatpush1.bf16.msra.mxu1 %v3714_v29  ;;  %v1913_v29 = vld [vmem:[%s5361_s3 + $0x560] sm:$0xff] }
 0x530   : > { %3717 = vmatprep.subr.bf16.mxu1 %v3716_v31  ;;  %v3748_v31 = vpack.c.bf16 %v1917_v28, %v1914_v27 }
 0x533   : > { %3719 = vmatpush1.bf16.msra.mxu1 %v3718_v43  ;;  %v1918_v43 = vld [vmem:[%s5361_s3 + $0x590] sm:$0xff] }
 0x534   : > { %3768 = vmatprep.subr.bf16.mxu1 %v3998_v3  ;;  %v3778_v53 = vpack.c.bf16 %v1918_v43, %v1915_v40  ;;  %v2107_v40 = vld [vmem:[%s5360_s2 + $0x338] sm:$0xff]  ;;  %v2108_v43 = vld [vmem:[%s5360_s2 + $0x340] sm:$0xff] }
 0x5e9   : > { %v1521_v50 = vpop.f32.mrb[30].mxu1 }
 0x5ea   : > { %v3328_v55 = vpop.f32.mrb[31].mxu1  ;;  %1670 = vmatmul.mubr.f32.vlgmr.msra.gmra.mrb[36].mxu0 %v1521_v50  ;;  %1741 = vmatmul.mubr.f32.vlgmr.msra.gmra.mrb[32].mxu1 %v1521_v50  ;;  %v3758_v50 = vpack.c.bf16 %v1928_v47, %v1925_v45 }
 0x5eb   : > { %3723 = vmatpush1.bf16.msra.mxu0 %v3722_v41  ;;  %1814 = vmatprep.mubr.f32.mxu0 %v4000_v6  ;;  %v1926_v41 = vld [vmem:[%s5361_s3 + $0x5e8] sm:$0xff] }
 0x5ec   : > { %3725 = vmatprep.subr.bf16.mxu0 %v3724_v42  ;;  %3770 = vmatpush3.bf16.msra.mxu1 %v3769_v48  ;;  %v1929_v42 = vld [vmem:[%s5361_s3 + $0x608] sm:$0xff]  ;;  %v1927_v48 = vld [vmem:[%s5361_s3 + $0x5f0] sm:$0xff] }
 0x5ed   : > { %3771 = vmatprep.subr.bf16.mxu1 %v3998_v3  ;;  %3361 = vmatprep.mubr.msk.f32.mxu1 %vm3999_vm0, %v4000_v6  ;;  %v3756_v44 = vpack.c.bf16 %v1929_v42, %v1926_v41  ;;  %v3784_v52 = vpack.c.bf16 %v1930_v51, %v1927_v48  ;;  %v1935_v55 = vld [vmem:[%s5361_s3 + $0x648] sm:$0xff] }
 0x5ef   : > { %3727 = vmatpush1.bf16.msra.mxu0 %v3726_v57  ;;  %v3760_v57 = vpack.c.bf16 %v1935_v55, %v1932_v54 }
 0x5f0   : > { %3729 = vmatprep.subr.bf16.mxu0 %v3728_v59  ;;  %3773 = vmatpush3.bf16.msra.mxu1 %v3772_v62  ;;  %v1931_v59 = vld [vmem:[%s5361_s3 + $0x620] sm:$0xff] }
 0x5f1   : > { %3774 = vmatprep.subr.bf16.mxu1 %v3998_v3  ;;  %v3762_v62 = vpack.c.bf16 %v1934_v60, %v1931_v59 }
 0x5f2   : > { %2889 = vmatmul.mubr.msk.f32.vlgmr.msra.gmra.mrb[36].mxu0 %vm1274_vm6, %v4931_v49 }
 0x5f3   : > { %3731 = vmatpush1.bf16.msra.mxu0 %v3730_v1  ;;  %1885 = vmatprep.mubr.f32.mxu0 %v4000_v6  ;;  %v1938_v1 = vld [vmem:[%s5361_s3 + $0x668] sm:$0xff] }
 0x5f4   : > { %3733 = vmatprep.subr.bf16.mxu0 %v3732_v2  ;;  %3776 = vmatpush3.bf16.msra.mxu1 %v3775_v30  ;;  %v1941_v2 = vld [vmem:[%s5361_s3 + $0x688] sm:$0xff] }
 0x5f5   : > { %3777 = vmatprep.subr.bf16.mxu1 %v3998_v3  ;;  %v3764_v4 = vpack.c.bf16 %v1941_v2, %v1938_v1 }
 0x5f7   : > { %3735 = vmatpush1.bf16.msra.mxu0 %v3734_v8  ;;  %v3766_v8 = vpack.c.bf16 %v1940_v5, %v1937_v46 }
 0x5f8   : > { %3737 = vmatprep.subr.bf16.mxu0 %v3736_v9  ;;  %3779 = vmatpush3.bf16.msra.mxu1 %v3778_v53  ;;  %v1942_v9 = vld [vmem:[%s5361_s3 + $0x690] sm:$0xff]  ;;  %v5171_v53 = vld [vmem:[%s5360_s2 + $0x358] sm:$0xff] }
 0x5f9   : > { %3780 = vmatprep.subr.bf16.mxu1 %v3998_v3  ;;  %v3790_v11 = vpack.c.bf16 %v1942_v9, %v1939_v7 }
 0x5fa   : > { %2890 = vmatmul.mubr.msk.f32.vlgmr.msra.gmra.mrb[38].mxu0 %vm1274_vm6, %v4931_v49  ;;  %v3750_v49 = vpack.c.bf16 %v1916_v39, %v1913_v29 }
 0x5fb   : > { %3739 = vmatpush1.bf16.msra.mxu0 %v3738_v15  ;;  %2007 = vmatprep.mubr.f32.mxu0 %v4000_v6 }
 0x5fc   : > { %3741 = vmatprep.subr.bf16.mxu0 %v3740_v16  ;;  %3782 = vmatpush3.bf16.msra.mxu1 %v3781_v38 }
 0x5fd   : > { %3783 = vmatprep.subr.bf16.mxu1 %v3998_v3 }
 0x5ff   : > { %3743 = vmatpush1.bf16.msra.mxu0 %v3742_v21 }
 0x600   : > { %3745 = vmatprep.subr.bf16.mxu0 %v3744_v22  ;;  %3785 = vmatpush3.bf16.msra.mxu1 %v3784_v52 }
 0x601   : > { %3786 = vmatprep.subr.bf16.mxu1 %v3998_v3 }
 0x603   : > { %3747 = vmatpush1.bf16.msra.mxu0 %v3746_v25  ;;  %v2892_v25 = vld [vmem:[%s5360_s2 + $0x460] ss:$0 sm:$0xff] }
 0x604   : > { %3749 = vmatprep.subr.bf16.mxu0 %v3748_v31  ;;  %3788 = vmatpush3.bf16.msra.mxu1 %v3787_v0 }
 0x605   : > { %3789 = vmatprep.subr.bf16.mxu1 %v3998_v3 }
 0x607   : > { %3751 = vmatpush1.bf16.msra.mxu0 %v3750_v49  ;;  %v2109_v49 = vld [vmem:[%s5360_s2 + $0x348] sm:$0xff] }
 0x608   : > { %3753 = vmatprep.subr.bf16.mxu0 %v3752_v37  ;;  %3791 = vmatpush3.bf16.msra.mxu1 %v3790_v11 }
 0x60b   : > { %3755 = vmatpush1.bf16.msra.mxu0 %v3754_v35  ;;  %v5188_v35 = vld [vmem:[%s5360_s2 + $0x370] sm:$0xff] }
 0x60c   : > { %3757 = vmatprep.subr.bf16.mxu0 %v3756_v44 }
 0x60f   : > { %3759 = vmatpush1.bf16.msra.mxu0 %v3758_v50 }
 0x610   : > { %3761 = vmatprep.subr.bf16.mxu0 %v3760_v57 }
 0x613   : > { %3763 = vmatpush1.bf16.msra.mxu0 %v3762_v62 }
 0x614   : > { %3765 = vmatprep.subr.bf16.mxu0 %v3764_v4 }
 0x617   : > { %3767 = vmatpush1.bf16.msra.mxu0 %v3766_v8 }
 0x6bd   : > { %v1742_v13 = vpop.f32.mrb[32].mxu1 }
 0x6be   : > { %v1744_v12 = vpop.f32.mrb[33].mxu1 }
 0x6c5   : > { %v1816_v14 = vpop.f32.mrb[36].mxu0 }
 0x6c6   : > { %v1818_v15 = vpop.f32.mrb[37].mxu0 }
 0x6c7   : > { %v1892_v16 = vmax.f32 %v1816_v14, %v1818_v15 }
 0x6cd   : > { %v1887_v17 = vpop.f32.mrb[38].mxu0 }
 0x6ce   : > { %v1888_v18 = vadd.f32 %v1887_v17, %v1742_v13  ;;  %v1889_v19 = vpop.f32.mrb[39].mxu0 }
 0x6cf   : > { %v1890_v20 = vadd.f32 %v1889_v19, %v1744_v12 }
 0x6d1   : > { %v1893_v21 = vmax.f32 %v1888_v18, %v1890_v20 }
 0x6d3   : > { %v1894_v22 = vmax.f32 %v1892_v16, %v1893_v21 }
 0x6d5   : > { %2008 = vmatmul.mubr.f32.vlgmr.msra.gmra.mrb[40].mxu0 %v1894_v22  ;;  %3362 = vmatmul.mubr.f32.vlgmr.msra.gmra.mrb[34].mxu1 %v1894_v22 }
 0x6d6   : > { %3366 = vmatprep.mubr.msk.f32.mxu0 %vm702_vm1, %v2106_v23 }
 0x7a8   : > { %v2009_v26 = vpop.f32.mrb[40].mxu0  ;;  %v2080_v30 = vpop.f32.mrb[34].mxu1 }
 0x7a9   : > { %v2089_v27 = vadd.f32 %v2891_v24, %v2009_v26  ;;  %v2101_v28 = vadd.f32 %v2893_v10, %v2080_v30  ;;  %v2011_v29 = vpop.f32.mrb[41].mxu0  ;;  %v3363_v31 = vpop.f32.mrb[35].mxu1 }
 0x7aa   : > { %v2095_v39 = vadd.f32 %v2892_v25, %v2011_v29  ;;  %v2519_v29 = vld [vmem:[%s5360_s2 + $0x378] sm:$0xff]  ;;  %v2520_v31 = vld [vmem:[%s5360_s2 + $0x380] sm:$0xff] }
 0x7ab   : > { %3364 = vmatprep.subr.mxu0 %v2089_v27  ;;  %3380 = vmatprep.subr.mxu1 %v2101_v28 }
 0x7ac   : > { %3365 = vmatpush3.msra.mxu0 %v2089_v27  ;;  %3381 = vmatpush3.msra.mxu1 %v2101_v28 }
 0x7ad   : > { %3367 = vmatmul.mubr.msk.f32.vlgmr.msra.gmra.mrb[42].mxu0 %vm702_vm1, %v2107_v40  ;;  %3372 = vmatprep.subr.mxu0 %v2095_v39  ;;  %v3799_v40 = vpack.c.bf16 %v2520_v31, %v2519_v29  ;;  %v2706_v29 = vld [vmem:[%s5360_s2 + $0x480] sm:$0x1] }
 0x7ae   : > { %3369 = vmatprep.mubr.msk.f32.mxu0 %vm702_vm1, %v2108_v43  ;;  %3798 = vmatprep.subr.bf16.mxu1 %v3998_v3  ;;  %v2522_v43 = vld [vmem:[%s5360_s2 + $0x390] sm:$0xff] }
 0x7b1   : > { %3370 = vmatmul.mubr.msk.f32.gmra.mrb[44].mxu0 %vm702_vm1, %v2109_v49 }
 0x7b3   : > { %3373 = vmatpush3.xpose.msra.mxu0 %v2095_v39  ;;  %v2521_v39 = vld [vmem:[%s5360_s2 + $0x388] sm:$0xff] }
 0x7b4   : > { %3792 = vmatprep.subr.bf16.mxu0 %v3998_v3  ;;  %v3802_v49 = vpack.c.bf16 %v2522_v43, %v2521_v39 }
 0x880   : > { %v3368_v32 = vpop.f32.mrb[42].mxu0 }
 0x881   : > { %v2188_v37 = vpop.f32.mrb[43].mxu0  ;;  %v2208_v33 = vmul.f32 %v3368_v32, %v5176_v56  ;;  %v2523_v32 = vld [vmem:[%s5360_s2 + $0x398] sm:$0xff] }
 0x882   : > { %v2207_v58 = vmul.f32 %v2188_v37, %v5171_v53  ;;  %v2524_v37 = vld [vmem:[%s5360_s2 + $0x3a0] sm:$0xff] }
 0x884   : > { %v3371_v36 = vpop.f32.mrb[44].mxu0  ;;  %3374 = vmatprep.mubr.f32.mxu0 %v2207_v58  ;;  %v3805_v58 = vpack.c.bf16 %v2524_v37, %v2523_v32 }
 0x885   : > { %v2198_v38 = vpop.f32.mrb[45].mxu0  ;;  %3375 = vmatmul.mubr.f32.vlgmr.msra.gmra.mrb[46].mxu0 %v2208_v33  ;;  %v2210_v42 = vmul.f32 %v3371_v36, %v5188_v35  ;;  %v2525_v33 = vld [vmem:[%s5360_s2 + $0x3a8] sm:$0xff]  ;;  %v2526_v36 = vld [vmem:[%s5360_s2 + $0x3b0] sm:$0xff] }
 0x886   : > { %v2209_v41 = vmul.f32 %v2198_v38, %v5183_v34  ;;  %v3808_v38 = vpack.c.bf16 %v2526_v36, %v2525_v33 }
 0x888   : > { %3377 = vmatprep.mubr.f32.mxu0 %v2209_v41  ;;  %v2527_v41 = vld [vmem:[%s5360_s2 + $0x3b8] sm:$0xff] }
 0x889   : > { %3378 = vmatmul.mubr.f32.gmra.mrb[48].mxu0 %v2210_v42  ;;  %v2528_v42 = vld [vmem:[%s5360_s2 + $0x3c0] sm:$0xff] }
 0x88a   : > { %3396 = vmatprep.mubr.msk.f32.mxu0 %vm3999_vm0, %v4000_v6 }
 0x958   : > { %v3376_v44 = vpop.f32.mrb[46].mxu0 }
 0x959   : > { %v2277_v45 = vpop.f32.mrb[47].mxu0  ;;  %v2297_v48 = vmul.f32 0.31622776, %v3376_v44  ;;  %v3811_v44 = vpack.c.bf16 %v2528_v42, %v2527_v41 }
 0x95a   : > { %v2296_v47 = vmul.f32 0.31622776, %v2277_v45  ;;  %v2529_v45 = vld [vmem:[%s5360_s2 + $0x3c8] sm:$0xff] }
 0x95b   : > { %v2303_v57 = vsel %vm702_vm1, %v2297_v48, -inf }
 0x95c   : > { %v3379_v50 = vpop.f32.mrb[48].mxu0  ;;  %v2300_v51 = vsel %vm702_vm1, %v2296_v47, -inf }
 0x95d   : > { %2301 = vmax.xlane.f32.xlu0 %v2300_v51  ;;  %v2287_v52 = vpop.f32.mrb[49].mxu0  ;;  %v2299_v55 = vmul.f32 0.31622776, %v3379_v50  ;;  %v2531_v50 = vld [vmem:[%s5360_s2 + $0x3d8] sm:$0xff]  ;;  %v2532_v51 = vld [vmem:[%s5360_s2 + $0x3e0] sm:$0xff] }
 0x95e   : > { %v2298_v54 = vmul.f32 0.31622776, %v2287_v52  ;;  %v3817_v52 = vpack.c.bf16 %v2532_v51, %v2531_v50 }
 0x95f   : > { %v2309_v60 = vsel %vm702_vm1, %v2299_v55, -inf }
 0x960   : > { %v2306_v59 = vsel %vm702_vm1, %v2298_v54, -inf }
 0x961   : > { %2304 = vmax.xlane.f32.xlu0 %v2303_v57  ;;  %2307 = vmax.xlane.f32.xlu1 %v2306_v59 }
 0x965   : > { %2310 = vmax.xlane.f32.xlu1 %v2309_v60 }
 0x9ea   : > { %v2302_v61 = vpop.xlane.xlu0 %2301 }
 0x9eb   : > { %v2312_v62 = vsub.f32 %v2296_v47, %v2302_v61  ;;  %v2530_v47 = vld [vmem:[%s5360_s2 + $0x3d0] sm:$0xff] }
 0x9ed   : > { %v2316_v63 = vmul.f32 1.442695, %v2312_v62 }
 0x9ee   : > { %v2305_v0 = vpop.xlane.xlu0 %2304  ;;  %v2308_v1 = vpop.xlane.xlu1 %2307 }
 0x9ef   : > { %3918 = vpow2.f32 %v2316_v63  ;;  %v2313_v2 = vsub.f32 %v2297_v48, %v2305_v0  ;;  %v2314_v4 = vsub.f32 %v2298_v54, %v2308_v1  ;;  %v3814_v48 = vpack.c.bf16 %v2530_v47, %v2529_v45  ;;  %v2533_v54 = vld [vmem:[%s5360_s2 + $0x3e8] sm:$0xff] }
 0x9f1   : > { %v2318_v46 = vmul.f32 1.442695, %v2313_v2  ;;  %v2320_v5 = vmul.f32 1.442695, %v2314_v4 }
 0x9f2   : > { %v2311_v7 = vpop.xlane.xlu1 %2310 }
 0x9f3   : > { %3920 = vpow2.f32 %v2318_v46  ;;  %v2315_v8 = vsub.f32 %v2299_v55, %v2311_v7  ;;  %v2534_v55 = vld [vmem:[%s5360_s2 + $0x3f0] sm:$0xff] }
 0x9f4   : > { %3922 = vpow2.f32 %v2320_v5  ;;  %v3820_v57 = vpack.c.bf16 %v2534_v55, %v2533_v54  ;;  %v2445_v5 = vld [vmem:[%s5360_s2 + $0x350] sm:$0xff] }
 0x9f5   : > { %v2322_v9 = vmul.f32 1.442695, %v2315_v8  ;;  %v2613_v7 = vld [vmem:[%s5360_s2 + $0x410] sm:$0xff] }
 0x9f7   : > { %3924 = vpow2.f32 %v2322_v9 }
 0x9f9   : > { %v3919_v11 = vpop.eup %3918 }
 0x9fa   : > { %v2324_v13 = vsel %vm702_vm1, %v3919_v11, 0.0 }
 0x9fb   : > { %2325 = vadd.xlane.f32.xlu0 %v2324_v13  ;;  %v2614_v13 = vld [vmem:[%s5360_s2 + $0x418] sm:$0xff] }
 0x9fd   : > { %v3921_v12 = vpop.eup %3920 }
 0x9fe   : > { %v3923_v14 = vpop.eup %3922  ;;  %v2327_v15 = vsel %vm702_vm1, %v3921_v12, 0.0 }
 0x9ff   : > { %2328 = vadd.xlane.f32.xlu1 %v2327_v15  ;;  %v2330_v16 = vsel %vm702_vm1, %v3923_v14, 0.0 }
 0xa00   : > { %2331 = vadd.xlane.f32.xlu0 %v2330_v16 }
 0xa01   : > { %v3925_v17 = vpop.eup %3924 }
 0xa02   : > { %v2333_v18 = vsel %vm702_vm1, %v3925_v17, 0.0 }
 0xa03   : > { %2334 = vadd.xlane.f32.xlu1 %v2333_v18 }
 0xa88   : > { %v2326_v19 = vpop.xlane.xlu0 %2325 }
 0xa89   : > { %3926 = vrcp.f32 %v2326_v19  ;;  %v2904_v19 = vld [vmem:[%s5360_s2 + $0x478] ss:$0 sm:$0xff] }
 0xa8c   : > { %v2329_v20 = vpop.xlane.xlu1 %2328 }
 0xa8d   : > { %v2332_v21 = vpop.xlane.xlu0 %2331  ;;  %3928 = vrcp.f32 %v2329_v20 }
 0xa8e   : > { %3930 = vrcp.f32 %v2332_v21 }
 0xa90   : > { %v2335_v22 = vpop.xlane.xlu1 %2334 }
 0xa91   : > { %3932 = vrcp.f32 %v2335_v22 }
 0xa93   : > { %v3927_v23 = vpop.eup %3926 }
 0xa94   : > { %v2340_v24 = vmul.f32 %v3927_v23, %v3919_v11 }
 0xa96   : > { %3382 = vmatprep.mubr.msk.f32.mxu1 %vm702_vm1, %v2340_v24 }
 0xa97   : > { %v3929_v10 = vpop.eup %3928 }
 0xa98   : > { %v3931_v25 = vpop.eup %3930  ;;  %v2341_v26 = vmul.f32 %v3929_v10, %v3921_v12  ;;  %v2903_v12 = vld [vmem:[%s5360_s2 + $0x470] ss:$0 sm:$0xff] }
 0xa99   : > { %v2342_v30 = vmul.f32 %v3931_v25, %v3923_v14 }
 0xa9a   : > { %3383 = vmatmul.mubr.msk.f32.vlgmr.msra.gmra.mrb[36].mxu1 %vm702_vm1, %v2341_v26 }
 0xa9b   : > { %v3933_v27 = vpop.eup %3932  ;;  %3385 = vmatprep.mubr.msk.f32.mxu1 %vm702_vm1, %v2342_v30  ;;  %3800 = vmatpush3.bf16.msra.mxu1 %v3799_v40 }
 0xa9c   : > { %v2343_v28 = vmul.f32 %v3933_v27, %v3925_v17  ;;  %3801 = vmatprep.subr.bf16.mxu1 %v3998_v3  ;;  %v2704_v17 = vld [vmem:[%s5360_s2 + $0x420] sm:$0xff] }
 0xa9e   : > { %3386 = vmatmul.mubr.msk.f32.gmra.mrb[38].mxu1 %vm702_vm1, %v2343_v28 }
 0xa9f   : > { %3431 = vmatprep.mubr.msk.f32.mxu1 %vm3999_vm0, %v4000_v6  ;;  %3803 = vmatpush3.bf16.msra.mxu1 %v3802_v49 }
 0xaa0   : > { %3804 = vmatprep.subr.bf16.mxu1 %v3998_v3 }
 0xaa3   : > { %3806 = vmatpush3.bf16.msra.mxu1 %v3805_v58 }
 0xaa4   : > { %3807 = vmatprep.subr.bf16.mxu1 %v3998_v3 }
 0xaa7   : > { %3809 = vmatpush3.bf16.msra.mxu1 %v3808_v38 }
 0xaa8   : > { %3810 = vmatprep.subr.bf16.mxu1 %v3998_v3 }
 0xaab   : > { %3812 = vmatpush3.bf16.msra.mxu1 %v3811_v44 }
 0xaac   : > { %3813 = vmatprep.subr.bf16.mxu1 %v3998_v3 }
 0xaaf   : > { %3815 = vmatpush3.bf16.msra.mxu1 %v3814_v48 }
 0xab0   : > { %3816 = vmatprep.subr.bf16.mxu1 %v3998_v3 }
 0xab3   : > { %3818 = vmatpush3.bf16.msra.mxu1 %v3817_v52 }
 0xab4   : > { %3819 = vmatprep.subr.bf16.mxu1 %v3998_v3 }
 0xab7   : > { %3821 = vmatpush3.bf16.msra.mxu1 %v3820_v57 }
 0xb6d   : > { %v3384_v59 = vpop.f32.mrb[36].mxu1 }
 0xb6e   : > { %v2442_v60 = vmul.f32 %v3384_v59, %v5176_v56  ;;  %v2422_v61 = vpop.f32.mrb[37].mxu1  ;;  %v2611_v56 = vld [vmem:[%s5360_s2 + $0x400] sm:$0xff] }
 0xb6f   : > { %v2441_v62 = vmul.f32 %v2422_v61, %v5171_v53  ;;  %v2610_v53 = vld [vmem:[%s5360_s2 + $0x3f8] sm:$0xff] }
 0xb71   : > { %v3793_v63 = vpack.c.bf16 %v2442_v60, %v2441_v62  ;;  %v3387_v0 = vpop.f32.mrb[38].mxu1 }
 0xb72   : > { %v2444_v1 = vmul.f32 %v3387_v0, %v5188_v35  ;;  %v2432_v2 = vpop.f32.mrb[39].mxu1  ;;  %v3823_v35 = vpack.c.bf16 %v2611_v56, %v2610_v53 }
 0xb73   : > { %v2443_v4 = vmul.f32 %v2432_v2, %v5183_v34  ;;  %3794 = vmatpush3.bf16.msra.mxu0 %v3793_v63  ;;  %v2612_v34 = vld [vmem:[%s5360_s2 + $0x408] sm:$0xff] }
 0xb74   : > { %3795 = vmatprep.subr.bf16.mxu0 %v3998_v3  ;;  %v3826_v8 = vpack.c.bf16 %v2613_v7, %v2612_v34 }
 0xb75   : > { %v3796_v46 = vpack.c.bf16 %v2444_v1, %v2443_v4 }
 0xb77   : > { %3797 = vmatpush3.bf16.msra.mxu0 %v3796_v46 }
 0xb78   : > { %3822 = vmatprep.subr.bf16.mxu0 %v3998_v3 }
 0xb7a   : > { %3397 = vmatmul.mubr.msk.f32.vlgmr.msra.gmra.mrb[50].mxu0 %vm1274_vm6, %v2445_v5 }
 0xb7b   : > { %3444 = vmatprep.mubr.msk.f32.mxu0 %vm3999_vm0, %v4000_v6  ;;  %3824 = vmatpush3.bf16.msra.mxu0 %v3823_v35 }
 0xb7c   : > { %3825 = vmatprep.subr.bf16.mxu0 %v3998_v3 }
 0xb7f   : > { %3827 = vmatpush3.bf16.msra.mxu0 %v3826_v8 }
 0xb80   : > { %3442 = vmatprep.subr.mxu0 %v4000_v6 }
 0xb83   : > { %3443 = vmatpush3.msra.mxu0 %v2614_v13 }
 0xb84   : > { %3828 = vmatprep.subr.bf16.mxu0 %v3998_v3  ;;  %v2705_v3 = vld [vmem:[%s5360_s2 + $0x428] sm:$0xff] }
 0xb85   : > { %v3829_v18 = vpack.c.bf16 %v2705_v3, %v2704_v17 }
 0xc4d   : > { %v2515_v9 = vpop.f32.mrb[50].mxu0 }
 0xc4e   : > { %3432 = vmatmul.mubr.f32.vlgmr.msra.gmra.mrb[40].mxu1 %v2515_v9  ;;  %v3398_v11 = vpop.f32.mrb[51].mxu0 }
 0xd21   : > { %v2606_v14 = vpop.f32.mrb[40].mxu1 }
 0xd22   : > { %v2607_v15 = vadd.f32 %v2903_v12, %v2606_v14  ;;  %v3433_v16 = vpop.f32.mrb[41].mxu1 }
 0xd24   : > { %3445 = vmatmul.mubr.msk.f32.vlgmr.msra.gmra.mrb[52].mxu0 %vm1381_vm7, %v2607_v15 }
 0xd25   : > { %3451 = vmatprep.mubr.msk.f32.mxu0 %vm3999_vm0, %v4000_v6  ;;  %3830 = vmatpush3.bf16.msra.mxu0 %v3829_v18 }
 0xdf7   : > { %v2689_v20 = vpop.f32.mrb[52].mxu0 }
 0xdf8   : > { %v2690_v21 = vadd.f32 %v2904_v19, %v2689_v20  ;;  %v3446_v22 = vpop.f32.mrb[53].mxu0 }
 0xdfa   : > { %v2693_v6 = vmax.f32 %v2690_v21, 0.0 }
 0xdfc   : > { %v2695_v23 = vsel %vm2694_vm8, %v2693_v6, 0.0 }
 0xdfd   : > { %v2696_v24 = vrot.slane %v2695_v23, 4 }
 0xdff   : > { %v2697_v10 = vadd.f32 %v2696_v24, %v2695_v23 }
 0xe01   : > { %v2698_v25 = vrot.slane %v2697_v10, 2 }
 0xe03   : > { %v2699_v26 = vadd.f32 %v2698_v25, %v2697_v10 }
 0xe05   : > { %v2700_v30 = vrot.slane %v2699_v26, 1 }
 0xe07   : > { %v2701_v27 = vadd.f32 %v2700_v30, %v2699_v26 }
 0xe09   : > { %v2703_v28 = vmul.f32 0.125, %v2701_v27 }
 0xe0b   : > { %3452 = vmatmul.mubr.msk.f32.vlgmr.msra.gmra.mrb[54].mxu0 %vm2694_vm8, %v2703_v28 }
 0xede   : > { %v2776_v31 = vpop.f32.mrb[54].mxu0 }
 0xedf   : > { %v2777_v39 = vadd.f32 %v2776_v31, %v2706_v29  ;;  %v3453_v40 = vpop.f32.mrb[55].mxu0 }
 0xee1   : > { %2781 = vst.msk [vmem:[%s204_s30] sm:$0x1] %vm2780_vm9, %v2777_v39 }
 0xee2   : > { %3947 = shalt.err (!%p3944_p3)
}
 0xee3   : > { %s3948_s6 = scalar_lea.hbm %s5316_s11, 16  ;;  %s3952_s20 = scalar_lea.hbm %s5362_s4, 32 }
 0xee4   : > { %p3949_p4 = scmp.ne.s32.totalorder %s5316_s11, %s3948_s6  ;;  %p3953_p9 = scmp.lt.u32.totalorder %s5316_s11, %s5362_s4 }
 0xee5   : > { %p3954_p10 = scmp.lt.u32.totalorder %s3952_s20, %s3948_s6  ;;  %p3956_p12 = scmp.lt.u32.totalorder %s3948_s6, %s5316_s11 }
 0xee6   : > { %p3950_p7 = pnand %p3949_p4, %p4065_p5 }
 0xee7   : > { %p3955_p11 = por %p3954_p10, %p3953_p9 }
 0xee8   : > { %p3951_p8 = pneg %p3950_p7 }
 0xee9   : > { %p3957_p13 = por %p3956_p12, %p3955_p11 }
 0xeeb   : > { %p3958_p0 = pnand %p3957_p13, %p3951_p8 }
 0xeed   : > { %3961 = shalt.err (!%p3958_p0)
}
 0xeee   : > { %3836 = dma.vmem_to_hbm [thread:$0]  (%p4065_p5), %s5318_s8, 16, %s5316_s11, %s2783_s12  }
 0xeef PF: > { %p3842_p1 = scmp.ge.s32.totalorder %s3996_s18, 2  ;;  %s2807_s23 = sand.u32 1, %s3984_s15  }
 0xef0   : > { %s2808_s27 = scalar_lea.sflag [#allocation3], %s2807_s23 }
 0xef1   : > { %p3839_p2 = pnand %p3842_p1, %p4069_p6 }
 0xef3   : > { %3979 = dma.done.wait (!%p3839_p2), %s2808_s27, 16  }
 0xef4   : > { %3981 = vsyncadd (!%p3839_p2), %s2808_s27, 4294967280  ;;  %p14_p3 = scmp.ge.s32.totalorder %s4052_s21, 4   ;;  %s5365_s15 = smov %s3988_s16 }
 0xef5   : > { %s5366_s16 = smov %s3992_s17  ;;  %s5367_s17 = smov %s4063_s24 }
 0xef6   : > { %s5368_s18 = smov %s4052_s21  ;;  %16 = sbr.rel (!%p14_p3) target bundleno = 3 (0x3), region = 74 }
 0xefd   :  { %2812 = vsyncpa [#allocation3], 1 }
 0xefe   :  { %2814 = vsyncpa [#allocation3 + $0x1], 1 }

</bundles_post_ra>
